<compile_context>
chip_gen: v5e
topology: v5e:2x2
jax: 0.10.0
libtpu: 0.0.40
codegen_flags: <defaults>
</compile_context>

<pallas_src>
import functools

import jax
import jax.numpy as jnp
from jax.experimental import pallas as pl
from jax.experimental.pallas import tpu as pltpu


def _silu(v):
    # x * sigmoid(x); reciprocal goes to the EUP slot (approx) instead of a VPU divide.
    return v * pl.reciprocal(1.0 + jnp.exp(-v), approx=True)


def _is_pow2(n):
    return n > 0 and (n & (n - 1)) == 0


# ------------------------------ Pallas kernel ------------------------------

def _detect_scale_kernel(x_ref, w1_ref, b1_ref, w2_ref, b2_ref,
                         wp_ref, bp_ref, o_ref, *, H, W):
    """One branch (grid axis b: 0 = reg, 1 = cls) of one scale, all batches fused.

    x_ref  : (M, C)      bf16  flat NHWC pixels, M = N*H*W
    w1_ref : (1, 9C, C)  bf16  BN-folded 3x3 conv #1, rows ordered tap-major
    b1_ref : (1, 1, C)   f32
    w2_ref : (1, 9C, C)  bf16  BN-folded 3x3 conv #2
    b2_ref : (1, 1, C)   f32
    wp_ref : (1, C, P)   bf16  1x1 pred conv, zero-padded to lane-dense P
    bp_ref : (1, 1, P)   f32
    o_ref  : (M, P)      f32   shared by both branches (accumulated in VMEM)
    """
    branch = pl.program_id(0)
    M, C = x_ref.shape

    # ---- per-tap interior masks from iota (no mask DMA), hoisted for both convs ----
    pix = jax.lax.broadcasted_iota(jnp.int32, (M, 1), 0)
    if _is_pow2(W) and _is_pow2(H):
        ww = jnp.bitwise_and(pix, W - 1)             # column within row
        phw = jnp.bitwise_and(pix, H * W - 1)        # pixel index within image
    else:
        # TODO(synk): if vector i32 rem is unsupported on the target, fall back
        # to a host-packed (M, 16) mask input (tap index on the lane axis).
        ww = pix % W
        phw = pix % (H * W)

    def fmask(ok):                                    # (M, 1) bool -> (M, 1) f32
        return jnp.where(ok, 1.0, 0.0)

    row_m = (fmask(phw >= W), None, fmask(phw < (H - 1) * W))   # dy = 0, 1, 2
    col_m = (fmask(ww >= 1), None, fmask(ww < (W - 1)))         # dx = 0, 1, 2
    tap_mask = []
    for dy in range(3):
        for dx in range(3):
            r, c = row_m[dy], col_m[dx]
            if r is None and c is None:
                tap_mask.append(None)                 # centre tap: always valid
            elif r is None:
                tap_mask.append(c)
            elif c is None:
                tap_mask.append(r)
            else:
                tap_mask.append(r * c)

    def im2col(src_f32):
        # 3x3 "SAME" neighbourhood as an (M, 9C) slab: +/-W row rolls done once,
        # dx taps derived with +/-1 rolls (XLU); rolls wrap across image/row
        # boundaries, which the interior masks zero out.
        taps = []
        for dy in range(3):
            off_y = (dy - 1) * W
            row = src_f32 if off_y == 0 else pltpu.roll(src_f32, (-off_y) % M, 0)
            for dx in range(3):
                off_x = dx - 1
                v = row if off_x == 0 else pltpu.roll(row, (-off_x) % M, 0)
                m = tap_mask[dy * 3 + dx]
                if m is not None:
                    v = v * m                         # (M, 1) mask broadcast
                taps.append(v)
        return jnp.concatenate(taps, axis=1)          # (M, 9C) f32

    def conv3x3_silu(src_f32, w_ref, b_ref):
        # Single (M, 9C) @ (9C, C) MXU dot per conv (taps concatenated along K),
        # one bf16 cast of the slab (no per-tap casts, no 9-way accumulate).
        slab = im2col(src_f32).astype(jnp.bfloat16)
        y = jnp.dot(slab, w_ref[0], preferred_element_type=jnp.float32)
        return _silu(y + b_ref[0])                    # (M, C) f32

    x = x_ref[...].astype(jnp.float32)                # (M, C)
    y1 = conv3x3_silu(x, w1_ref, b1_ref)
    y2 = conv3x3_silu(y1, w2_ref, b2_ref)
    pred = jnp.dot(y2.astype(jnp.bfloat16), wp_ref[0],
                   preferred_element_type=jnp.float32) + bp_ref[0]   # (M, P)

    # Both branches target the same lane-dense (M, P) slab: reg fills columns
    # [0:4], cls fills [4:4+nc]; accumulating in the resident VMEM block is
    # exactly the channel concat, written back to HBM once.
    @pl.when(branch == 0)
    def _():
        o_ref[...] = pred

    @pl.when(branch != 0)
    def _():
        o_ref[...] = o_ref[...] + pred


# ------------------------------ host wrapper -------------------------------

def _detect_scale(x_nchw, p):
    """Fused cls+reg head for one scale. Returns (N, 4+nc, H, W) f32."""
    N, C, H, W = x_nchw.shape
    nc = p["cls_pred"][0].shape[1]
    no = nc + 4
    M = N * H * W
    P = ((no + 127) // 128) * 128          # lane-dense padded pred width

    # ---- stack branch params (branch 0 = reg, 1 = cls); 3x3 weights become
    #      (9C, C) so the in-kernel im2col slab hits them as one matmul ----
    def flat3(w):                           # (9, C, C) -> (9C, C), tap-major rows
        return w.reshape(9 * C, C)

    w1 = jnp.stack([flat3(p["reg_conv"][0]), flat3(p["cls_conv"][0])]).astype(jnp.bfloat16)
    b1 = jnp.stack([p["reg_conv"][1], p["cls_conv"][1]])
    w2 = jnp.stack([flat3(p["reg_conv"][2]), flat3(p["cls_conv"][2])]).astype(jnp.bfloat16)
    b2 = jnp.stack([p["reg_conv"][3], p["cls_conv"][3]])
    wp_reg, bp_reg = p["reg_pred"]          # (C, 4),  (1, 4)
    wp_cls, bp_cls = p["cls_pred"]          # (C, nc), (1, nc)
    # reg occupies output cols [0:4], cls occupies [4:4+nc]; the shared output
    # block accumulates both, so the result equals cat([reg, cls], channel).
    wp = jnp.zeros((2, C, P), jnp.float32)
    wp = wp.at[0, :, 0:4].set(wp_reg).at[1, :, 4:4 + nc].set(wp_cls)
    wp = wp.astype(jnp.bfloat16)
    bp = jnp.zeros((2, 1, P), jnp.float32)
    bp = bp.at[0, 0, 0:4].set(bp_reg[0]).at[1, 0, 4:4 + nc].set(bp_cls[0])

    # ---- flatten input to (M, C); activations feed the MXU in bf16 ----
    x_flat = jnp.transpose(x_nchw, (0, 2, 3, 1)).reshape(M, C).astype(jnp.bfloat16)

    kernel = functools.partial(_detect_scale_kernel, H=H, W=W)
    out = pl.pallas_call(
        kernel,
        out_shape=jax.ShapeDtypeStruct((M, P), jnp.float32),
        grid_spec=pltpu.PrefetchScalarGridSpec(
            num_scalar_prefetch=0,
            grid=(2,),                      # branch axis: 0 = reg, 1 = cls
            in_specs=[
                pl.BlockSpec((M, C), lambda b: (0, 0)),            # x (shared)
                pl.BlockSpec((1, 9 * C, C), lambda b: (b, 0, 0)),  # conv1 w
                pl.BlockSpec((1, 1, C), lambda b: (b, 0, 0)),      # conv1 b
                pl.BlockSpec((1, 9 * C, C), lambda b: (b, 0, 0)),  # conv2 w
                pl.BlockSpec((1, 1, C), lambda b: (b, 0, 0)),      # conv2 b
                pl.BlockSpec((1, C, P), lambda b: (b, 0, 0)),      # pred w
                pl.BlockSpec((1, 1, P), lambda b: (b, 0, 0)),      # pred b
            ],
            # Same block for both branches -> output stays resident in VMEM and
            # is written back once (branch axis must therefore be "arbitrary").
            out_specs=pl.BlockSpec((M, P), lambda b: (0, 0)),
        ),
        compiler_params=pltpu.CompilerParams(
            dimension_semantics=("arbitrary",)),
    )(x_flat, w1, b1, w2, b2, wp, bp)

    y = out[:, :no]                                              # (M, 4+nc)
    return jnp.transpose(y.reshape(N, H, W, no), (0, 3, 1, 2))   # NCHW


# ------------------------- parameter construction --------------------------

def _init_conv3x3(key, cin, cout):
    kw, kb = jax.random.split(key)
    # BN-folded effective weight/bias (Conv2d 3x3 no-bias + BN fused).
    w = jax.random.normal(kw, (9, cin, cout), jnp.float32) / jnp.sqrt(9.0 * cin)
    b = 0.05 * jax.random.normal(kb, (1, cout), jnp.float32)
    return w, b


def _init_conv1x1(key, cin, cout):
    kw, kb = jax.random.split(key)
    w = jax.random.normal(kw, (cin, cout), jnp.float32) / jnp.sqrt(float(cin))
    b = 0.05 * jax.random.normal(kb, (1, cout), jnp.float32)
    return w, b


def init_detect_params(key, nc, ch):
    params = []
    for i, c in enumerate(ch):
        ks = jax.random.split(jax.random.fold_in(key, i), 6)
        params.append({
            "cls_conv": _init_conv3x3(ks[0], c, c) + _init_conv3x3(ks[1], c, c),
            "cls_pred": _init_conv1x1(ks[2], c, nc),
            "reg_conv": _init_conv3x3(ks[3], c, c) + _init_conv3x3(ks[4], c, c),
            "reg_pred": _init_conv1x1(ks[5], c, 4),
        })
    return params


# ------------------------------- forward -----------------------------------

def detect_forward(xs_nchw, params):
    """Pallas Detect forward. Input: list of NCHW feature maps.
    Output: list of (B, 4+nc, H, W) tensors (reg first, then cls)."""
    return [_detect_scale(x.astype(jnp.float32), p)
            for x, p in zip(xs_nchw, params)]


# ---------------------- pure-JAX reference (for check) ---------------------

def _silu_ref(v):
    return v * (1.0 / (1.0 + jnp.exp(-v)))


def _ref_branch(x_nhwc, w1, b1, w2, b2, wp, bp):
    def conv3(x, w, b):
        w_hwio = w.reshape(3, 3, w.shape[1], w.shape[2])
        y = jax.lax.conv_general_dilated(
            x, w_hwio, window_strides=(1, 1), padding="SAME",
            dimension_numbers=("NHWC", "HWIO", "NHWC"))
        return _silu_ref(y + b.reshape(1, 1, 1, -1))

    y = conv3(conv3(x_nhwc, w1, b1), w2, b2)
    return jnp.einsum("nhwc,cd->nhwd", y, wp) + bp.reshape(1, 1, 1, -1)


def detect_forward_ref(xs_nchw, params):
    outs = []
    for x, p in zip(xs_nchw, params):
        x_nhwc = jnp.transpose(x, (0, 2, 3, 1)).astype(jnp.float32)
        cls = _ref_branch(x_nhwc, *p["cls_conv"], *p["cls_pred"])
        reg = _ref_branch(x_nhwc, *p["reg_conv"], *p["reg_pred"])
        out = jnp.concatenate([reg, cls], axis=-1)
        outs.append(jnp.transpose(out, (0, 3, 1, 2)))
    return outs


if __name__ == "__main__":
    # Small shapes consistent with the module: Detect(nc=16, ch=(32, 64, 128)),
    # 3 scales of NCHW feature maps with spatial sizes 8/4/2, batch 2.
    nc = 16
    ch = (32, 64, 128)
    spatial = (8, 4, 2)
    N = 2

    key = jax.random.PRNGKey(0)
    k_in, k_par = jax.random.split(key)
    in_keys = jax.random.split(k_in, len(ch))
    xs = [jax.random.normal(in_keys[i], (N, ch[i], spatial[i], spatial[i]),
                            jnp.float32) for i in range(len(ch))]

    params = init_detect_params(k_par, nc, ch)

    outs = detect_forward(xs, params)
    outs = jax.block_until_ready(outs)

    # sanity: shapes (B, 4+nc, H, W) and values match the pure-JAX f32 reference
    # (tolerance covers the bf16 MXU path and the approx-EUP sigmoid).
    refs = detect_forward_ref(xs, params)
    for i, (o, r) in enumerate(zip(outs, refs)):
        assert o.shape == (N, 4 + nc, spatial[i], spatial[i]), o.shape
        err = float(jnp.max(jnp.abs(o - r)))
        scale = 1.0 + float(jnp.max(jnp.abs(r)))
        assert err <= 3e-2 * scale, f"scale {i}: max abs err {err}"

    print("KERNEL_OK")
</pallas_src>

<mosaic_0001>
module attributes {stable_mosaic.version = 11 : i64} {
  func.func @_detect_scale_kernel(%arg0: i32, %arg1: memref<128x32xbf16, #tpu.memory_space<vmem>>, %arg2: memref<1x288x32xbf16, #tpu.memory_space<vmem>>, %arg3: memref<1x1x32xf32, #tpu.memory_space<vmem>>, %arg4: memref<1x288x32xbf16, #tpu.memory_space<vmem>>, %arg5: memref<1x1x32xf32, #tpu.memory_space<vmem>>, %arg6: memref<1x32x128xbf16, #tpu.memory_space<vmem>>, %arg7: memref<1x1x128xf32, #tpu.memory_space<vmem>>, %arg8: memref<128x128xf32, #tpu.memory_space<vmem>>) attributes {dimension_semantics = [#tpu.dimension_semantics<arbitrary>], iteration_bounds = array<i64: 2>, scalar_prefetch = 0 : i64, scratch_operands = 0 : i64, tpu.core_type = #tpu.core_type<tc>, window_params = [{pipeline_mode = #tpu.pipeline_mode<synchronous>, transform_indices = @transform_0, window_bounds = array<i64: 128, 32>}, {transform_indices = @transform_1, window_bounds = array<i64: 1, 288, 32>}, {transform_indices = @transform_2, window_bounds = array<i64: 1, 1, 32>}, {transform_indices = @transform_3, window_bounds = array<i64: 1, 288, 32>}, {transform_indices = @transform_4, window_bounds = array<i64: 1, 1, 32>}, {transform_indices = @transform_5, window_bounds = array<i64: 1, 32, 128>}, {transform_indices = @transform_6, window_bounds = array<i64: 1, 1, 128>}, {pipeline_mode = #tpu.pipeline_mode<synchronous>, transform_indices = @transform_7, window_bounds = array<i64: 128, 128>}]} {
    %0 = tpu.iota {dimensions = array<i32: 0>} : vector<128x1xi32>
    %c7_i32 = arith.constant 7 : i32
    %1 = vector.broadcast %c7_i32 : i32 to vector<128x1xi32>
    %2 = arith.andi %0, %1 : vector<128x1xi32>
    %c63_i32 = arith.constant 63 : i32
    %3 = vector.broadcast %c63_i32 : i32 to vector<128x1xi32>
    %4 = arith.andi %0, %3 : vector<128x1xi32>
    %c8_i32 = arith.constant 8 : i32
    %5 = vector.broadcast %c8_i32 : i32 to vector<128x1xi32>
    %6 = arith.cmpi sge, %4, %5 : vector<128x1xi32>
    %cst = arith.constant 1.000000e+00 : f32
    %cst_0 = arith.constant 0.000000e+00 : f32
    %7 = vector.broadcast %cst : f32 to vector<128x1xf32>
    %8 = vector.broadcast %cst_0 : f32 to vector<128x1xf32>
    %9 = arith.select %6, %7, %8 : vector<128x1xi1>, vector<128x1xf32>
    %c56_i32 = arith.constant 56 : i32
    %10 = vector.broadcast %c56_i32 : i32 to vector<128x1xi32>
    %11 = arith.cmpi slt, %4, %10 : vector<128x1xi32>
    %cst_1 = arith.constant 1.000000e+00 : f32
    %cst_2 = arith.constant 0.000000e+00 : f32
    %12 = vector.broadcast %cst_1 : f32 to vector<128x1xf32>
    %13 = vector.broadcast %cst_2 : f32 to vector<128x1xf32>
    %14 = arith.select %11, %12, %13 : vector<128x1xi1>, vector<128x1xf32>
    %c1_i32 = arith.constant 1 : i32
    %15 = vector.broadcast %c1_i32 : i32 to vector<128x1xi32>
    %16 = arith.cmpi sge, %2, %15 : vector<128x1xi32>
    %cst_3 = arith.constant 1.000000e+00 : f32
    %cst_4 = arith.constant 0.000000e+00 : f32
    %17 = vector.broadcast %cst_3 : f32 to vector<128x1xf32>
    %18 = vector.broadcast %cst_4 : f32 to vector<128x1xf32>
    %19 = arith.select %16, %17, %18 : vector<128x1xi1>, vector<128x1xf32>
    %c7_i32_5 = arith.constant 7 : i32
    %20 = vector.broadcast %c7_i32_5 : i32 to vector<128x1xi32>
    %21 = arith.cmpi slt, %2, %20 : vector<128x1xi32>
    %cst_6 = arith.constant 1.000000e+00 : f32
    %cst_7 = arith.constant 0.000000e+00 : f32
    %22 = vector.broadcast %cst_6 : f32 to vector<128x1xf32>
    %23 = vector.broadcast %cst_7 : f32 to vector<128x1xf32>
    %24 = arith.select %21, %22, %23 : vector<128x1xi1>, vector<128x1xf32>
    %25 = arith.mulf %9, %19 : vector<128x1xf32>
    %26 = arith.mulf %9, %24 : vector<128x1xf32>
    %27 = arith.mulf %14, %19 : vector<128x1xf32>
    %28 = arith.mulf %14, %24 : vector<128x1xf32>
    %c0 = arith.constant 0 : index
    %c0_8 = arith.constant 0 : index
    %29 = vector.load %arg1[%c0, %c0_8] : memref<128x32xbf16, #tpu.memory_space<vmem>>, vector<128x32xbf16>
    %30 = arith.extf %29 : vector<128x32xbf16> to vector<128x32xf32>
    %c8_i32_9 = arith.constant 8 : i32
    %31 = tpu.dynamic_rotate %30 by %c8_i32_9 dim 0 : vector<128x32xf32>, i32 -> vector<128x32xf32>
    %c1_i32_10 = arith.constant 1 : i32
    %32 = tpu.dynamic_rotate %31 by %c1_i32_10 dim 0 : vector<128x32xf32>, i32 -> vector<128x32xf32>
    %33 = vector.broadcast %25 : vector<128x1xf32> to vector<128x32xf32>
    %34 = arith.mulf %32, %33 : vector<128x32xf32>
    %35 = vector.broadcast %9 : vector<128x1xf32> to vector<128x32xf32>
    %36 = arith.mulf %31, %35 : vector<128x32xf32>
    %c127_i32 = arith.constant 127 : i32
    %37 = tpu.dynamic_rotate %31 by %c127_i32 dim 0 : vector<128x32xf32>, i32 -> vector<128x32xf32>
    %38 = vector.broadcast %26 : vector<128x1xf32> to vector<128x32xf32>
    %39 = arith.mulf %37, %38 : vector<128x32xf32>
    %c1_i32_11 = arith.constant 1 : i32
    %40 = tpu.dynamic_rotate %30 by %c1_i32_11 dim 0 : vector<128x32xf32>, i32 -> vector<128x32xf32>
    %41 = vector.broadcast %19 : vector<128x1xf32> to vector<128x32xf32>
    %42 = arith.mulf %40, %41 : vector<128x32xf32>
    %c127_i32_12 = arith.constant 127 : i32
    %43 = tpu.dynamic_rotate %30 by %c127_i32_12 dim 0 : vector<128x32xf32>, i32 -> vector<128x32xf32>
    %44 = vector.broadcast %24 : vector<128x1xf32> to vector<128x32xf32>
    %45 = arith.mulf %43, %44 : vector<128x32xf32>
    %c120_i32 = arith.constant 120 : i32
    %46 = tpu.dynamic_rotate %30 by %c120_i32 dim 0 : vector<128x32xf32>, i32 -> vector<128x32xf32>
    %c1_i32_13 = arith.constant 1 : i32
    %47 = tpu.dynamic_rotate %46 by %c1_i32_13 dim 0 : vector<128x32xf32>, i32 -> vector<128x32xf32>
    %48 = vector.broadcast %27 : vector<128x1xf32> to vector<128x32xf32>
    %49 = arith.mulf %47, %48 : vector<128x32xf32>
    %50 = vector.broadcast %14 : vector<128x1xf32> to vector<128x32xf32>
    %51 = arith.mulf %46, %50 : vector<128x32xf32>
    %c127_i32_14 = arith.constant 127 : i32
    %52 = tpu.dynamic_rotate %46 by %c127_i32_14 dim 0 : vector<128x32xf32>, i32 -> vector<128x32xf32>
    %53 = vector.broadcast %28 : vector<128x1xf32> to vector<128x32xf32>
    %54 = arith.mulf %52, %53 : vector<128x32xf32>
    %55 = tpu.concatenate %34, %36, %39, %42, %30, %45, %49, %51, %54 in 1 : vector<128x32xf32>, vector<128x32xf32>, vector<128x32xf32>, vector<128x32xf32>, vector<128x32xf32>, vector<128x32xf32>, vector<128x32xf32>, vector<128x32xf32>, vector<128x32xf32> -> vector<128x288xf32>
    %56 = arith.truncf %55 : vector<128x288xf32> to vector<128x288xbf16>
    %c0_15 = arith.constant 0 : index
    %c0_16 = arith.constant 0 : index
    %c0_17 = arith.constant 0 : index
    %57 = vector.load %arg2[%c0_15, %c0_16, %c0_17] : memref<1x288x32xbf16, #tpu.memory_space<vmem>>, vector<1x288x32xbf16>
    %58 = vector.shape_cast %57 : vector<1x288x32xbf16> to vector<288x32xbf16>
    %cst_18 = arith.constant dense<0.000000e+00> : vector<128x32xf32>
    %59 = tpu.matmul %56, %58, %cst_18 {dimension_numbers = #tpu.dot_dimension_numbers<[1], [0], [0], [1], [0, 0, 1, 1], [], []>} : vector<128x288xbf16>, vector<288x32xbf16>, vector<128x32xf32> -> vector<128x32xf32>
    %c0_19 = arith.constant 0 : index
    %c0_20 = arith.constant 0 : index
    %c0_21 = arith.constant 0 : index
    %60 = vector.load %arg3[%c0_19, %c0_20, %c0_21] : memref<1x1x32xf32, #tpu.memory_space<vmem>>, vector<1x1x32xf32>
    %61 = vector.shape_cast %60 : vector<1x1x32xf32> to vector<1x32xf32>
    %62 = vector.broadcast %61 : vector<1x32xf32> to vector<128x32xf32>
    %63 = arith.addf %59, %62 : vector<128x32xf32>
    %cst_22 = arith.constant 0.000000e+00 : f32
    %64 = vector.broadcast %cst_22 : f32 to vector<128x32xf32>
    %65 = arith.subf %64, %63 : vector<128x32xf32>
    %66 = math.exp %65 : vector<128x32xf32>
    %cst_23 = arith.constant 1.000000e+00 : f32
    %67 = vector.broadcast %cst_23 : f32 to vector<128x32xf32>
    %68 = arith.addf %67, %66 : vector<128x32xf32>
    %69 = tpu.reciprocal %68 {approx = true} : vector<128x32xf32> -> vector<128x32xf32>
    %70 = arith.mulf %63, %69 : vector<128x32xf32>
    %c8_i32_24 = arith.constant 8 : i32
    %71 = tpu.dynamic_rotate %70 by %c8_i32_24 dim 0 : vector<128x32xf32>, i32 -> vector<128x32xf32>
    %c1_i32_25 = arith.constant 1 : i32
    %72 = tpu.dynamic_rotate %71 by %c1_i32_25 dim 0 : vector<128x32xf32>, i32 -> vector<128x32xf32>
    %73 = vector.broadcast %25 : vector<128x1xf32> to vector<128x32xf32>
    %74 = arith.mulf %72, %73 : vector<128x32xf32>
    %75 = vector.broadcast %9 : vector<128x1xf32> to vector<128x32xf32>
    %76 = arith.mulf %71, %75 : vector<128x32xf32>
    %c127_i32_26 = arith.constant 127 : i32
    %77 = tpu.dynamic_rotate %71 by %c127_i32_26 dim 0 : vector<128x32xf32>, i32 -> vector<128x32xf32>
    %78 = vector.broadcast %26 : vector<128x1xf32> to vector<128x32xf32>
    %79 = arith.mulf %77, %78 : vector<128x32xf32>
    %c1_i32_27 = arith.constant 1 : i32
    %80 = tpu.dynamic_rotate %70 by %c1_i32_27 dim 0 : vector<128x32xf32>, i32 -> vector<128x32xf32>
    %81 = vector.broadcast %19 : vector<128x1xf32> to vector<128x32xf32>
    %82 = arith.mulf %80, %81 : vector<128x32xf32>
    %c127_i32_28 = arith.constant 127 : i32
    %83 = tpu.dynamic_rotate %70 by %c127_i32_28 dim 0 : vector<128x32xf32>, i32 -> vector<128x32xf32>
    %84 = vector.broadcast %24 : vector<128x1xf32> to vector<128x32xf32>
    %85 = arith.mulf %83, %84 : vector<128x32xf32>
    %c120_i32_29 = arith.constant 120 : i32
    %86 = tpu.dynamic_rotate %70 by %c120_i32_29 dim 0 : vector<128x32xf32>, i32 -> vector<128x32xf32>
    %c1_i32_30 = arith.constant 1 : i32
    %87 = tpu.dynamic_rotate %86 by %c1_i32_30 dim 0 : vector<128x32xf32>, i32 -> vector<128x32xf32>
    %88 = vector.broadcast %27 : vector<128x1xf32> to vector<128x32xf32>
    %89 = arith.mulf %87, %88 : vector<128x32xf32>
    %90 = vector.broadcast %14 : vector<128x1xf32> to vector<128x32xf32>
    %91 = arith.mulf %86, %90 : vector<128x32xf32>
    %c127_i32_31 = arith.constant 127 : i32
    %92 = tpu.dynamic_rotate %86 by %c127_i32_31 dim 0 : vector<128x32xf32>, i32 -> vector<128x32xf32>
    %93 = vector.broadcast %28 : vector<128x1xf32> to vector<128x32xf32>
    %94 = arith.mulf %92, %93 : vector<128x32xf32>
    %95 = tpu.concatenate %74, %76, %79, %82, %70, %85, %89, %91, %94 in 1 : vector<128x32xf32>, vector<128x32xf32>, vector<128x32xf32>, vector<128x32xf32>, vector<128x32xf32>, vector<128x32xf32>, vector<128x32xf32>, vector<128x32xf32>, vector<128x32xf32> -> vector<128x288xf32>
    %96 = arith.truncf %95 : vector<128x288xf32> to vector<128x288xbf16>
    %c0_32 = arith.constant 0 : index
    %c0_33 = arith.constant 0 : index
    %c0_34 = arith.constant 0 : index
    %97 = vector.load %arg4[%c0_32, %c0_33, %c0_34] : memref<1x288x32xbf16, #tpu.memory_space<vmem>>, vector<1x288x32xbf16>
    %98 = vector.shape_cast %97 : vector<1x288x32xbf16> to vector<288x32xbf16>
    %cst_35 = arith.constant dense<0.000000e+00> : vector<128x32xf32>
    %99 = tpu.matmul %96, %98, %cst_35 {dimension_numbers = #tpu.dot_dimension_numbers<[1], [0], [0], [1], [0, 0, 1, 1], [], []>} : vector<128x288xbf16>, vector<288x32xbf16>, vector<128x32xf32> -> vector<128x32xf32>
    %c0_36 = arith.constant 0 : index
    %c0_37 = arith.constant 0 : index
    %c0_38 = arith.constant 0 : index
    %100 = vector.load %arg5[%c0_36, %c0_37, %c0_38] : memref<1x1x32xf32, #tpu.memory_space<vmem>>, vector<1x1x32xf32>
    %101 = vector.shape_cast %100 : vector<1x1x32xf32> to vector<1x32xf32>
    %102 = vector.broadcast %101 : vector<1x32xf32> to vector<128x32xf32>
    %103 = arith.addf %99, %102 : vector<128x32xf32>
    %cst_39 = arith.constant 0.000000e+00 : f32
    %104 = vector.broadcast %cst_39 : f32 to vector<128x32xf32>
    %105 = arith.subf %104, %103 : vector<128x32xf32>
    %106 = math.exp %105 : vector<128x32xf32>
    %cst_40 = arith.constant 1.000000e+00 : f32
    %107 = vector.broadcast %cst_40 : f32 to vector<128x32xf32>
    %108 = arith.addf %107, %106 : vector<128x32xf32>
    %109 = tpu.reciprocal %108 {approx = true} : vector<128x32xf32> -> vector<128x32xf32>
    %110 = arith.mulf %103, %109 : vector<128x32xf32>
    %111 = arith.truncf %110 : vector<128x32xf32> to vector<128x32xbf16>
    %c0_41 = arith.constant 0 : index
    %c0_42 = arith.constant 0 : index
    %c0_43 = arith.constant 0 : index
    %112 = vector.load %arg6[%c0_41, %c0_42, %c0_43] : memref<1x32x128xbf16, #tpu.memory_space<vmem>>, vector<1x32x128xbf16>
    %113 = vector.shape_cast %112 : vector<1x32x128xbf16> to vector<32x128xbf16>
    %cst_44 = arith.constant dense<0.000000e+00> : vector<128x128xf32>
    %114 = tpu.matmul %111, %113, %cst_44 {dimension_numbers = #tpu.dot_dimension_numbers<[1], [0], [0], [1], [0, 0, 1, 1], [], []>} : vector<128x32xbf16>, vector<32x128xbf16>, vector<128x128xf32> -> vector<128x128xf32>
    %c0_45 = arith.constant 0 : index
    %c0_46 = arith.constant 0 : index
    %c0_47 = arith.constant 0 : index
    %115 = vector.load %arg7[%c0_45, %c0_46, %c0_47] : memref<1x1x128xf32, #tpu.memory_space<vmem>>, vector<1x1x128xf32>
    %116 = vector.shape_cast %115 : vector<1x1x128xf32> to vector<1x128xf32>
    %117 = vector.broadcast %116 : vector<1x128xf32> to vector<128x128xf32>
    %118 = arith.addf %114, %117 : vector<128x128xf32>
    %c0_i32 = arith.constant 0 : i32
    %119 = arith.cmpi eq, %arg0, %c0_i32 : i32
    %120 = arith.extui %119 : i1 to i32
    %c0_i32_48 = arith.constant 0 : i32
    %121 = arith.cmpi ne, %120, %c0_i32_48 : i32
    scf.if %121 {
      %c0_51 = arith.constant 0 : index
      %c0_52 = arith.constant 0 : index
      %125 = vector.load %arg8[%c0_51, %c0_52] : memref<128x128xf32, #tpu.memory_space<vmem>>, vector<128x128xf32>
      tpu.vector_store %arg8[%c0_51, %c0_52], %118 {strides = array<i32>} : memref<128x128xf32, #tpu.memory_space<vmem>>, vector<128x128xf32>,
    } else {
    }
    %c0_i32_49 = arith.constant 0 : i32
    %122 = arith.cmpi ne, %arg0, %c0_i32_49 : i32
    %123 = arith.extui %122 : i1 to i32
    %c0_i32_50 = arith.constant 0 : i32
    %124 = arith.cmpi ne, %123, %c0_i32_50 : i32
    scf.if %124 {
      %c0_51 = arith.constant 0 : index
      %c0_52 = arith.constant 0 : index
      %125 = vector.load %arg8[%c0_51, %c0_52] : memref<128x128xf32, #tpu.memory_space<vmem>>, vector<128x128xf32>
      %126 = arith.addf %125, %118 : vector<128x128xf32>
      %c0_53 = arith.constant 0 : index
      %c0_54 = arith.constant 0 : index
      %127 = vector.load %arg8[%c0_53, %c0_54] : memref<128x128xf32, #tpu.memory_space<vmem>>, vector<128x128xf32>
      tpu.vector_store %arg8[%c0_53, %c0_54], %126 {strides = array<i32>} : memref<128x128xf32, #tpu.memory_space<vmem>>, vector<128x128xf32>,
    } else {
    }
    return
  }
  func.func @transform_0(%arg0: i32) -> (i32, i32) {
    %c0_i32 = arith.constant 0 : i32
    %c0_i32_0 = arith.constant 0 : i32
    %c0_i32_1 = arith.constant 0 : i32
    return %c0_i32, %c0_i32_0 : i32, i32
  }
  func.func @transform_1(%arg0: i32) -> (i32, i32, i32) {
    %c0_i32 = arith.constant 0 : i32
    %c0_i32_0 = arith.constant 0 : i32
    %c0_i32_1 = arith.constant 0 : i32
    return %arg0, %c0_i32, %c0_i32_0 : i32, i32, i32
  }
  func.func @transform_2(%arg0: i32) -> (i32, i32, i32) {
    %c0_i32 = arith.constant 0 : i32
    %c0_i32_0 = arith.constant 0 : i32
    %c0_i32_1 = arith.constant 0 : i32
    return %arg0, %c0_i32, %c0_i32_0 : i32, i32, i32
  }
  func.func @transform_3(%arg0: i32) -> (i32, i32, i32) {
    %c0_i32 = arith.constant 0 : i32
    %c0_i32_0 = arith.constant 0 : i32
    %c0_i32_1 = arith.constant 0 : i32
    return %arg0, %c0_i32, %c0_i32_0 : i32, i32, i32
  }
  func.func @transform_4(%arg0: i32) -> (i32, i32, i32) {
    %c0_i32 = arith.constant 0 : i32
    %c0_i32_0 = arith.constant 0 : i32
    %c0_i32_1 = arith.constant 0 : i32
    return %arg0, %c0_i32, %c0_i32_0 : i32, i32, i32
  }
  func.func @transform_5(%arg0: i32) -> (i32, i32, i32) {
    %c0_i32 = arith.constant 0 : i32
    %c0_i32_0 = arith.constant 0 : i32
    %c0_i32_1 = arith.constant 0 : i32
    return %arg0, %c0_i32, %c0_i32_0 : i32, i32, i32
  }
  func.func @transform_6(%arg0: i32) -> (i32, i32, i32) {
    %c0_i32 = arith.constant 0 : i32
    %c0_i32_0 = arith.constant 0 : i32
    %c0_i32_1 = arith.constant 0 : i32
    return %arg0, %c0_i32, %c0_i32_0 : i32, i32, i32
  }
  func.func @transform_7(%arg0: i32) -> (i32, i32) {
    %c0_i32 = arith.constant 0 : i32
    %c0_i32_0 = arith.constant 0 : i32
    %c0_i32_1 = arith.constant 0 : i32
    return %c0_i32, %c0_i32_0 : i32, i32
  }
}

</mosaic_0001>

<bundles_post_ra>
// kernel: tpu_custom_call.1
= control target key start
LH: loop header
LB: loop body
LE: loop exit
PB: predicated region body
PF: predicated region fallthrough
CT: control target
= control target key end

     0   :  { %12 = vsyncpa [#allocation3], 0  ;;  %s4126_s24 = smov 0   ;;  %s5822_s0 = inlined_call_operand.vmem [shape: bf16[128,32], index: 0, kind: input, shape index: {}]   ;;  %s5823_s1 = inlined_call_operand.vmem [shape: bf16[2,288,32], index: 1, kind: input, shape index: {}]   ;;  %s5824_s2 = inlined_call_operand.vmem [shape: f32[2,1,32], index: 2, kind: input, shape index: {}]   ;;  %s5825_s3 = inlined_call_operand.vmem [shape: bf16[2,288,32], index: 3, kind: input, shape index: {}]   ;;  %s5826_s4 = inlined_call_operand.vmem [shape: f32[2,1,32], index: 4, kind: input, shape index: {}]   ;;  %s5827_s5 = inlined_call_operand.vmem [shape: bf16[2,32,128], index: 5, kind: input, shape index: {}]   ;;  %s5828_s6 = inlined_call_operand.vmem [shape: f32[2,1,128], index: 6, kind: input, shape index: {}]   ;;  %s5829_s7 = inlined_call_operand.hbm [shape: f32[128,128], index: 7, kind: output, shape index: {}]  }
   0x1 LB: > { %s4132_s25 = sadd.s32 4294967295, %s4077_s24   ;;  %p3125_p0 = scmp.ge.s32.totalorder %s4077_s24, 1  ;;  %s4077_s24 = sphi %s4126_s24, %s18_s24  }
   0x2   : > { %p277_p1 = scmp.lt.s32.totalorder %s4077_s24, 3 }
   0x4   : > { %p278_p2 = pnand %p3125_p0, %p277_p1 }
   0x6   : > { %281 = sbr.rel (%p278_p2) target bundleno = 960 (0x3c0), region = 48 }
   0xb   : > { %v4139_v0 = vld [vmem:[%s5822_s0 + $0x28] sm:$0xff]   ;;  %v3388_v1 = vld [vmem:[%s5822_s0 + $0x30] sm:$0xff]   ;;  %v348_v2 = vlaneseq  ;;  %v3389_v7 = vld [vmem:[%s5822_s0 + $0x38] sm:$0xff]   ;;  %s4079_s9 = smov 32   ;;  %v5832_v23 = vmov 0.0   ;;  %p323_p3 = scmp.lt.s32.totalorder %s4132_s25, 1 }
   0xc   : > { %v4145_v3 = vunpack.c.h.bf16 %v4139_v0  ;;  %v4147_v4 = vunpack.c.l.bf16 %v3388_v1  ;;  %v4149_v5 = vunpack.c.h.bf16 %v3388_v1  ;;  %v4172_v15 = vunpack.c.l.bf16 %v3389_v7  ;;  %s4081_s10 = smov 64   ;;  %v3352_v42 = vld [vmem:[%s5822_s0] sm:$0xff]   ;;  %s4082_s14 = smov 96   ;;  %v3383_v47 = vld [vmem:[%s5822_s0 + $0x8] sm:$0xff]  }
   0xd   : > { %v4151_v6 = vshrl.u32 %v348_v2, 7  ;;  %v4227_v40 = vunpack.c.h.bf16 %v3389_v7  ;;  %s4232_s11 = scalar_select %p323_p3, %s4132_s25, 1  ;;  %v4243_v49 = vunpack.c.l.bf16 %v3352_v42  ;;  %v4257_v53 = vunpack.c.h.bf16 %v3352_v42 }
   0xe   : > { %v4158_v8 = vpack.i.bf16 %v4147_v4, %v4145_v3  ;;  %v5831_v9 = vrot.slane %v4145_v3, 1  ;;  %v699_v10 = vrot.slane %v4147_v4, 1  ;;  %v700_v11 = vrot.slane %v4149_v5, 1  ;;  %5910 = vst [vmem:[#allocation5_spill] sm:$0xff] %v4172_v15  ;;  %p3306_p4 = scmp.ne.s32.totalorder %s4132_s25, 0 }
   0xf   : > { %v361_v12 = vadd.s32 96, %v4151_v6  ;;  %v362_v13 = vadd.s32 104, %v4151_v6  ;;  %vm702_vm0 = vcmp.lt.s32.totalorder %v4151_v6, 7  ;;  %v5830_v19 = vrot.slane %v4145_v3, 7  ;;  %5915 = vst [vmem:[#allocation10_spill] sm:$0xff] %v4227_v40  ;;  %s3406_s17 = smul.u32 144, %s4232_s11  ;;  %s330_s8 = scalar_lea.vmem %s5824_s2, %s4232_s11 }
  0x10   : > { %3429 = vrot.lane.b32.xlu0 %v4158_v8, %s4079_s9  ;;  %v4170_v14 = vsel %vm702_vm0, %v699_v10, %v700_v11  ;;  %v4178_v18 = vsel %vm702_vm0, %v5831_v9, %v699_v10  ;;  %v634_v20 = vrot.slane %v4147_v4, 7  ;;  %v635_v21 = vrot.slane %v4149_v5, 7  ;;  %s338_s19 = scalar_lea.vmem %s5826_s4, %s4232_s11  ;;  %s346_s28 = scalar_lea.vmem %s5828_s6, %s4232_s11 }
  0x11   : > { %v377_v16 = vand.u32 7, %v361_v12  ;;  %v378_v17 = vand.u32 7, %v362_v13  ;;  %vm637_vm1 = vcmp.lt.s32.totalorder %v4151_v6, 1  ;;  %v701_v22 = vrot.slane %v4172_v15, 1  ;;  %s4292_s20 = scalar_lea.vmem %s5823_s1, %s3406_s17  ;;  %s5065_s18 = scalar_lea.vmem %s5825_s3, %s3406_s17 }
  0x12   : > { %v4204_v30 = vsel %vm637_vm1, %v634_v20, %v635_v21  ;;  %v4210_v31 = vsel %vm637_vm1, %v5830_v19, %v634_v20  ;;  %v363_v34 = vadd.s32 112, %v4151_v6  ;;  %v364_v36 = vadd.s32 120, %v4151_v6 }
  0x13   : > { %vm505_vm2 = vcmp.lt.s32.totalorder %v377_v16, 7  ;;  %vm506_vm3 = vcmp.lt.s32.totalorder %v378_v17, 7  ;;  %vm473_vm4 = vcmp.ge.s32.totalorder %v377_v16, 1  ;;  %vm474_vm5 = vcmp.ge.s32.totalorder %v378_v17, 1 }
  0x14   : > { %v4186_v24 = vsel %vm505_vm2, 1.0, %v5832_v23  ;;  %v4189_v25 = vsel %vm506_vm3, 1.0, %v5832_v23  ;;  %v4192_v26 = vsel %vm473_vm4, 1.0, %v5832_v23  ;;  %v4199_v29 = vsel %vm474_vm5, 1.0, %v5832_v23 }
  0x15   : > { %5911 = vst [vmem:[#allocation6_spill] sm:$0xff] %v4186_v24  ;;  %v731_v27 = vmul.f32 %v4178_v18, %v4186_v24  ;;  %v732_v28 = vmul.f32 %v4170_v14, %v4189_v25  ;;  %v4214_v32 = vsel %vm702_vm0, %v700_v11, %v701_v22  ;;  %v747_v35 = vmul.f32 %v4210_v31, %v4192_v26 }
  0x16   : > { %5912 = vst [vmem:[#allocation7_spill] sm:$0xff] %v4189_v25  ;;  %v748_v37 = vmul.f32 %v4204_v30, %v4199_v29  ;;  %v763_v38 = vmul.f32 %v4170_v14, %v4186_v24  ;;  %v764_v39 = vmul.f32 %v4214_v32, %v4189_v25  ;;  %v379_v43 = vand.u32 7, %v363_v34 }
  0x17   : > { %5913 = vst [vmem:[#allocation8_spill] sm:$0xff] %v4192_v26  ;;  %v3433_v33 = vpack.i.bf16 %v732_v28, %v731_v27  ;;  %v380_v44 = vand.u32 7, %v364_v36  ;;  %v636_v45 = vrot.slane %v4172_v15, 7  ;;  %v686_v46 = vrot.slane %v4227_v40, 1 }
  0x18   : > { %5914 = vst [vmem:[#allocation9_spill] sm:$0xff] %v4199_v29  ;;  %v3438_v41 = vpack.i.bf16 %v748_v37, %v747_v35  ;;  %v3458_v48 = vpack.i.bf16 %v764_v39, %v763_v38  ;;  %v4246_v50 = vadd.s32 8, %v4151_v6  ;;  %vm4249_vm6 = vcmp.ge.s32.totalorder %v379_v43, 1 }
  0x19   : > { %3434 = vrot.lane.b32.xlu0 %v3433_v33, %s4081_s10  ;;  %v4255_v52 = vpack.i.bf16 %v4172_v15, %v4149_v5  ;;  %v365_v54 = vand.u32 7, %v4151_v6  ;;  %vm507_vm7 = vcmp.lt.s32.totalorder %v379_v43, 7  ;;  %vm508_vm8 = vcmp.lt.s32.totalorder %v380_v44, 7 }
  0x1a   : > { %3439 = vrot.lane.b32.xlu1 %v3438_v41, %s4082_s14  ;;  %v4262_v55 = vsel %vm702_vm0, %v701_v22, %v686_v46  ;;  %v4264_v56 = vunpack.c.l.bf16 %v3383_v47  ;;  %vm4266_vm9 = vcmp.ge.s32.totalorder %v380_v44, 1  ;;  %v4272_v58 = vsel %vm637_vm1, %v635_v21, %v636_v45  ;;  %v3330_v21 = vld [vmem:[%s4292_s20 + $0x88] sm:$0xff] }
  0x1b   : > { %v4275_v59 = vsel %vm507_vm7, 1.0, %v5832_v23  ;;  %v4278_v60 = vsel %vm508_vm8, 1.0, %v5832_v23  ;;  %v670_v61 = vmul.f32 0.0, %v4227_v40  ;;  %v366_v62 = vand.u32 7, %v4246_v50  ;;  %1598 = vmatpush.bf16.msra.mxu2 %v3330_v21  ;;  %v3329_v50 = vld [vmem:[%s4292_s20 + $0x80] sm:$0xff] }
  0x1c   : > { %5918 = vst [vmem:[#allocation11_spill] sm:$0xff] %v4264_v56  ;;  %v733_v63 = vmul.f32 %v4214_v32, %v4275_v59  ;;  %v734_v1 = vmul.f32 %v4262_v55, %v4278_v60  ;;  %v4297_v2 = vsel %vm4249_vm6, 1.0, %v5832_v23  ;;  %vm493_vm10 = vcmp.lt.s32.totalorder %v365_v54, 7 }
  0x1d   : > { %v689_v7 = vrot.slane %v4264_v56, 1  ;;  %v779_v10 = vmul.f32 %v4204_v30, %v4192_v26  ;;  %v780_v11 = vmul.f32 %v4272_v58, %v4199_v29  ;;  %v4309_v13 = vsel %vm4266_vm9, 1.0, %v5832_v23 }
  0x1e   : > { %v3448_v12 = vpack.i.bf16 %v734_v1, %v733_v63  ;;  %5921 = vst [vmem:[#allocation12_spill] sm:$0xff] %v4309_v13  ;;  %v687_v16 = vrot.slane %v4243_v49, 1  ;;  %v688_v17 = vrot.slane %v4257_v53, 1  ;;  %v621_v20 = vrot.slane %v4227_v40, 7 }
  0x1f   : > { %v3473_v22 = vpack.i.bf16 %v4243_v49, %v670_v61  ;;  %vm494_vm11 = vcmp.lt.s32.totalorder %v366_v62, 7  ;;  %v4317_v27 = vsel %vm493_vm10, 1.0, %v5832_v23  ;;  %v749_v28 = vmul.f32 %v4272_v58, %v4297_v2  ;;  %1599 = vmatpush.bf16.msra.mxu2 %v3329_v50 }
  0x20   : > { %5922 = vst [vmem:[#allocation13_spill] sm:$0xff] %v4317_v27  ;;  %3449 = vrot.lane.b32.xlu2 %v3448_v12, %s4081_s10  ;;  %v4324_v33 = vsel %vm702_vm0, %v688_v17, %v689_v7  ;;  %v4328_v34 = vsel %vm637_vm1, %v636_v45, %v621_v20  ;;  %v3463_v35 = vpack.i.bf16 %v780_v11, %v779_v10  ;;  %v4333_v37 = vsel %vm494_vm11, 1.0, %v5832_v23 }
  0x21   : > { %3459 = vrot.lane.b32.xlu0 %v3458_v48, %s4079_s9  ;;  %v750_v36 = vmul.f32 %v4328_v34, %v4309_v13  ;;  %5923 = vst [vmem:[#allocation14_spill] sm:$0xff] %v4333_v37  ;;  %v4336_v38 = vmul.f32 0.0, %v4317_v27  ;;  %v4340_v39 = vsel %vm702_vm0, %v687_v16, %v688_v17  ;;  %v4344_v41 = vsel %vm702_vm0, %v686_v46, %v687_v16  ;;  %v3384_v17 = vld [vmem:[%s5822_s0 + $0x10] sm:$0xff]  }
  0x22   : > { %3444 = vrot.lane.b32.xlu1 %v4255_v52, %s4079_s9  ;;  %v751_v42 = vmul.f32 %v4340_v39, %v4317_v27  ;;  %v752_v43 = vmul.f32 %v4324_v33, %v4333_v37  ;;  %v4351_v45 = vunpack.c.h.bf16 %v3383_v47  ;;  %v622_v48 = vrot.slane %v4243_v49, 7 }
  0x23   : > { %5924 = vst [vmem:[#allocation15_spill] sm:$0xff] %v4336_v38  ;;  %v3453_v44 = vpack.i.bf16 %v750_v36, %v749_v28  ;;  %v719_v46 = vmul.f32 %v4344_v41, %v4336_v38  ;;  %v720_v57 = vmul.f32 %v4340_v39, %v4333_v37  ;;  %v4363_v47 = vmul.f32 0.0, %v4309_v13 }
  0x24   : > { %5925 = vst [vmem:[#allocation16_spill] sm:$0xff] %v4351_v45  ;;  %v690_v51 = vrot.slane %v4351_v45, 1  ;;  %v3488_v61 = vpack.i.bf16 %v752_v43, %v751_v42  ;;  %v799_v63 = vmul.f32 %v4324_v33, %v4317_v27  ;;  %v4369_v1 = vsel %vm637_vm1, %v621_v20, %v622_v48 }
  0x25   : > { %5926 = vst [vmem:[#allocation17_spill] sm:$0xff] %v4363_v47  ;;  %v623_v11 = vrot.slane %v4257_v53, 7  ;;  %vm461_vm12 = vcmp.ge.s32.totalorder %v365_v54, 1  ;;  %vm462_vm13 = vcmp.ge.s32.totalorder %v366_v62, 1  ;;  %v351_v12 = vadd.s32 16, %v4151_v6 }
  0x26   : > { %v4373_v10 = vsel %vm702_vm0, %v689_v7, %v690_v51  ;;  %v3478_v21 = vpack.i.bf16 %v720_v57, %v719_v46  ;;  %v781_v20 = vmul.f32 %v4328_v34, %v4297_v2  ;;  %vm1199_vm14 = vcmask 261120  }
  0x27   : > { %v800_v16 = vmul.f32 %v4373_v10, %v4333_v37  ;;  %v782_v54 = vmul.f32 %v4369_v1, %v4363_v47  ;;  %v352_v62 = vadd.s32 24, %v4151_v6  ;;  %v4392_v28 = vsel %vm462_vm13, 1.0, %v5832_v23 }
  0x28   : > { %3454 = vrot.lane.b32.xlu2 %v3453_v44, %s4082_s14  ;;  %v4398_v36 = vunpack.c.l.bf16 %v3384_v17  ;;  %v367_v42 = vand.u32 7, %v351_v12  ;;  %v765_v43 = vmul.f32 %v4262_v55, %v4275_v59  ;;  %v766_v44 = vmul.f32 %v4344_v41, %v4278_v60 }
  0x29   : > { %3474 = vrot.lane.b32.xlu0 %v3473_v22, %s4079_s9  ;;  %v1300_v7 = vpack.c.bf16 %v800_v16, %v799_v63  ;;  %v4389_v22 = vsel %vm461_vm12, 1.0, %v5832_v23  ;;  %v3503_v50 = vpack.i.bf16 %v782_v54, %v781_v20  ;;  %v368_v46 = vand.u32 7, %v352_v62 }
  0x2a   : > { %3464 = vrot.lane.b32.xlu1 %v3463_v35, %s4081_s10  ;;  %v4396_v35 = vsel %vm637_vm1, %v622_v48, %v623_v11  ;;  %5927 = vst [vmem:[#allocation18_spill] sm:$0xff] %v4398_v36  ;;  %v735_v48 = vmul.f32 %v4369_v1, %v4389_v22  ;;  %v624_v63 = vrot.slane %v4264_v56, 7  ;;  %vm495_vm15 = vcmp.lt.s32.totalorder %v367_v42, 7 }
  0x2b   : > { %3202 = vmatmul.msk.bf16.vlgmr.msra.gmra.mxu2 %vm1199_vm14, %v1300_v7  ;;  %v736_v57 = vmul.f32 %v4396_v35, %v4392_v28  ;;  %v3493_v12 = vpack.i.bf16 %v766_v44, %v765_v43  ;;  %v4414_v16 = vunpack.c.h.bf16 %v3384_v17  ;;  %vm496_vm2 = vcmp.lt.s32.totalorder %v368_v46, 7 }
  0x2c   : > { %v4426_v54 = vsel %vm637_vm1, %v623_v11, %v624_v63  ;;  %v4433_v7 = vsel %vm496_vm2, 1.0, %v5832_v23  ;;  %v767_v11 = vmul.f32 %v4396_v35, %v4389_v22  ;;  %vm463_vm3 = vcmp.ge.s32.totalorder %v367_v42, 1 }
  0x2d   : > { %5928 = vst [vmem:[#allocation19_spill] sm:$0xff] %v4414_v16  ;;  %v692_v62 = vrot.slane %v4414_v16, 1  ;;  %v768_v44 = vmul.f32 %v4426_v54, %v4392_v28  ;;  %v722_v38 = vmul.f32 %v4373_v10, %v4433_v7  ;;  %vm464_vm4 = vcmp.ge.s32.totalorder %v368_v46, 1 }
  0x2e   : > { %5930 = vst [vmem:[#allocation21_spill] sm:$0xff] %v4426_v54 }
  0x2f   : > { %5931 = vst [vmem:[#allocation22_spill] sm:$0xff] %v4433_v7  ;;  %v3498_v9 = vpack.i.bf16 %v768_v44, %v767_v11  ;;  %v625_v11 = vrot.slane %v4351_v45, 7  ;;  %v5841_v44 = vrot.slane %v4398_v36, 7 }
  0x30   : > { %3469 = vrot.lane.b32.xlu2 %v4255_v52, %s4082_s14  ;;  %v4418_v52 = vsel %vm495_vm15, 1.0, %v5832_v23 }
  0x31   : > { %3489 = vrot.lane.b32.xlu0 %v3488_v61, %s4079_s9  ;;  %v691_v61 = vrot.slane %v4398_v36, 1  ;;  %5929 = vst [vmem:[#allocation20_spill] sm:$0xff] %v4418_v52  ;;  %v4489_v42 = vsel %vm637_vm1, %v624_v63, %v625_v11 }
  0x32   : > { %3479 = vrot.lane.b32.xlu1 %v3478_v21, %s4081_s10  ;;  %v3483_v21 = vpack.i.bf16 %v736_v57, %v735_v48  ;;  %v353_v48 = vadd.s32 32, %v4151_v6  ;;  %v354_v57 = vadd.s32 40, %v4151_v6  ;;  %5936 = vst [vmem:[#allocation26_spill] sm:$0xff] %v4489_v42 }
  0x33   : > { %v4422_v20 = vsel %vm702_vm0, %v690_v51, %v691_v61  ;;  %v4437_v43 = vsel %vm702_vm0, %v691_v61, %v692_v62  ;;  %v3518_v51 = vpack.i.bf16 %v4264_v56, %v4257_v53 }
  0x34   : > { %v801_v17 = vmul.f32 %v4422_v20, %v4418_v52  ;;  %v754_v19 = vmul.f32 %v4422_v20, %v4433_v7  ;;  %v369_v47 = vand.u32 7, %v353_v48  ;;  %v370_v27 = vand.u32 7, %v354_v57 }
  0x35   : > { %v798_v48 = vmul.f32 0.0, %v4243_v49 }
  0x36   : > { %vm497_vm5 = vcmp.lt.s32.totalorder %v369_v47, 7  ;;  %vm498_vm6 = vcmp.lt.s32.totalorder %v370_v27, 7  ;;  %vm4545_vm7 = vcmp.ge.s32.totalorder %v369_v47, 1  ;;  %vm4549_vm8 = vcmp.ge.s32.totalorder %v370_v27, 1 }
  0x38   : > { %3484 = vrot.lane.b32.xlu2 %v3483_v21, %s4082_s14  ;;  %v753_v21 = vmul.f32 %v4373_v10, %v4418_v52 }
  0x39   : > { %3504 = vrot.lane.b32.xlu0 %v3503_v50, %s4081_s10  ;;  %v802_v50 = vmul.f32 %v4437_v43, %v4433_v7  ;;  %v3386_v7 = vld [vmem:[%s5822_s0 + $0x20] sm:$0xff]  }
  0x3a   : > { %3494 = vrot.lane.b32.xlu1 %v3493_v12, %s4079_s9  ;;  %v3385_v12 = vld [vmem:[%s5822_s0 + $0x18] sm:$0xff]   ;;  %v3533_v37 = vpack.i.bf16 %v754_v19, %v753_v21 }
  0x3b   : > { %v1303_v61 = vpack.c.bf16 %v802_v50, %v801_v17  ;;  %v4458_v23 = vunpack.c.l.bf16 %v3385_v12  ;;  %v4461_v17 = vunpack.c.h.bf16 %v3385_v12  ;;  %v721_v50 = vmul.f32 %v4324_v33, %v4418_v52 }
  0x3d   : > { %5932 = vst [vmem:[#allocation23_spill] sm:$0xff] %v4458_v23  ;;  %3203 = vmatmul.msk.bf16.gmra.mxu2 %vm1199_vm14, %v1303_v61  ;;  %v693_v57 = vrot.slane %v4458_v23, 1  ;;  %v3523_v33 = vpack.i.bf16 %v722_v38, %v721_v50  ;;  %v5933_v61 = vmov 0.0   ;;  %v3513_v38 = vpack.i.bf16 %v798_v48, %v4227_v40 }
  0x3e   : > { %v4475_v10 = vsel %vm463_vm3, 1.0, %v5933_v61  ;;  %v4479_v19 = vsel %vm464_vm4, 1.0, %v5933_v61  ;;  %v4493_v46 = vsel %vm497_vm5, 1.0, %v5933_v61  ;;  %v3548_v48 = vpack.i.bf16 %v4398_v36, %v4351_v45 }
  0x3f   : > { %5934 = vst [vmem:[#allocation24_spill] sm:$0xff] %v4479_v19  ;;  %v4500_v12 = vsel %vm702_vm0, %v692_v62, %v693_v57  ;;  %v5852_v47 = vrot.slane %v4458_v23, 7 }
  0x40   : > { %3499 = vrot.lane.b32.xlu2 %v3498_v9, %s4081_s10  ;;  %v4485_v9 = vsel %vm637_vm1, %v625_v11, %v5841_v44  ;;  %5937 = vst [vmem:[#allocation27_spill] sm:$0xff] %v4493_v46  ;;  %v803_v63 = vmul.f32 %v4500_v12, %v4493_v46  ;;  %v769_v11 = vmul.f32 %v4489_v42, %v4475_v10  ;;  %v4528_v44 = vadd.s32 48, %v4151_v6 }
  0x41   : > { %3519 = vrot.lane.b32.xlu0 %v3518_v51, %s4079_s9  ;;  %5935 = vst [vmem:[#allocation25_spill] sm:$0xff] %v4485_v9  ;;  %v770_v62 = vmul.f32 %v4485_v9, %v4479_v19 }
  0x42   : > { %3509 = vrot.lane.b32.xlu1 %v3518_v51, %s4082_s14  ;;  %v5840_v51 = vrot.slane %v4461_v17, 1 }
  0x43   : > { %v3538_v56 = vpack.i.bf16 %v770_v62, %v769_v11  ;;  %v5945_v11 = vrot.slane %v4398_v36, 7  ;;  %v4631_v36 = vadd.s32 72, %v4151_v6 }
  0x44   : > { %v4506_v21 = vsel %vm702_vm0, %v693_v57, %v5840_v51  ;;  %v4521_v57 = vadd.s32 56, %v4151_v6  ;;  %v737_v51 = vmul.f32 %v4426_v54, %v4475_v10 }
  0x48   : > { %3514 = vrot.lane.b32.xlu2 %v3513_v38, %s4082_s14  ;;  %v755_v38 = vmul.f32 %v4437_v43, %v4493_v46 }
  0x49   : > { %3534 = vrot.lane.b32.xlu0 %v3533_v37, %s4079_s9  ;;  %v4496_v37 = vsel %vm498_vm6, 1.0, %v5933_v61 }
  0x4a   : > { %5938 = vst [vmem:[#allocation28_spill] sm:$0xff] %v4496_v37  ;;  %v804_v50 = vmul.f32 %v4506_v21, %v4496_v37  ;;  %3524 = vrot.lane.b32.xlu1 %v3523_v33, %s4081_s10  ;;  %v738_v33 = vmul.f32 %v4489_v42, %v4479_v19  ;;  %v756_v45 = vmul.f32 %v4500_v12, %v4496_v37  ;;  %v372_v42 = vand.u32 7, %v4521_v57  ;;  %v3320_v57 = vld [vmem:[%s4292_s20 + $0x38] sm:$0xff] }
  0x4b   : > { %v4539_v19 = vunpack.c.l.bf16 %v3386_v7  ;;  %3390 = vmatpush.bf16.msra.mxu3 %v3320_v57  ;;  %1494 = vmatpush.bf16.msra.mxu0 %v3320_v57  ;;  %v5949_v57 = vrot.slane %v4461_v17, 1 }
  0x4c   : > { %v1306_v52 = vpack.c.bf16 %v804_v50, %v803_v63  ;;  %v3528_v54 = vpack.i.bf16 %v738_v33, %v737_v51  ;;  %v371_v63 = vand.u32 7, %v4528_v44  ;;  %v4543_v50 = vunpack.c.h.bf16 %v3386_v7  ;;  %v3319_v33 = vld [vmem:[%s4292_s20 + $0x30] sm:$0xff] }
  0x4d   : > { %v723_v51 = vmul.f32 %v4422_v20, %v4493_v46  ;;  %v724_v44 = vmul.f32 %v4437_v43, %v4496_v37  ;;  %v627_v7 = vrot.slane %v4414_v16, 7  ;;  %vm500_vm9 = vcmp.lt.s32.totalorder %v372_v42, 7  ;;  %v3318_v37 = vld [vmem:[%s4292_s20 + $0x28] sm:$0xff] }
  0x4e   : > { %3204 = vmatmul.msk.bf16.gmra.mxu2 %vm1199_vm14, %v1306_v52  ;;  %v3563_v52 = vpack.i.bf16 %v756_v45, %v755_v38  ;;  %v695_v27 = vrot.slane %v4539_v19, 1  ;;  %vm499_vm10 = vcmp.lt.s32.totalorder %v371_v63, 7  ;;  %v4568_v20 = vsel %vm4545_vm7, 1.0, %v5933_v61 }
  0x4f   : > { %v4573_v45 = vsel %vm4549_vm8, 1.0, %v5933_v61  ;;  %v4576_v43 = vsel %vm500_vm9, 1.0, %v5933_v61  ;;  %v4583_v38 = vsel %vm637_vm1, %v627_v7, %v5852_v47  ;;  %v4589_v62 = vsel %vm637_vm1, %v5945_v11, %v627_v7  ;;  %3391 = vmatpush.bf16.msra.mxu3 %v3319_v33  ;;  %1495 = vmatpush.bf16.msra.mxu0 %v3319_v33 }
  0x50   : > { %3529 = vrot.lane.b32.xlu2 %v3528_v54, %s4082_s14  ;;  %v3553_v54 = vpack.i.bf16 %v724_v44, %v723_v51  ;;  %5943 = vst [vmem:[#allocation29_spill] sm:$0xff] %v4576_v43  ;;  %v4592_v51 = vmul.f32 0.0, %v4576_v43  ;;  %v4595_v44 = vsel %vm499_vm10, 1.0, %v5933_v61  ;;  %v772_v46 = vmul.f32 %v4583_v38, %v4573_v45 }
  0x51   : > { %3549 = vrot.lane.b32.xlu0 %v3548_v48, %s4079_s9  ;;  %5944 = vst [vmem:[#allocation30_spill] sm:$0xff] %v4583_v38  ;;  %v739_v33 = vmul.f32 %v4485_v9, %v4568_v20  ;;  %vm468_vm11 = vcmp.ge.s32.totalorder %v372_v42, 1  ;;  %vm4644_vm12 = vcmp.ge.s32.totalorder %v371_v63, 1  ;;  %v726_v42 = vmul.f32 %v4506_v21, %v4576_v43 }
  0x52   : > { %3539 = vrot.lane.b32.xlu1 %v3538_v56, %s4081_s10  ;;  %v5857_v56 = vrot.slane %v4543_v50, 1  ;;  %5946 = vst [vmem:[#allocation31_spill] sm:$0xff] %v4589_v62  ;;  %v5865_v63 = vrot.slane %v4539_v19, 7  ;;  %vm1216_vm8 = vcmask 523264   ;;  %vm1233_vm9 = vcmask 785408  }
  0x53   : > { %5947 = vst [vmem:[#allocation32_spill] sm:$0xff] %v4592_v51  ;;  %3392 = vmatpush.bf16.msra.mxu3 %v3318_v37  ;;  %1496 = vmatpush.bf16.msra.mxu0 %v3318_v37  ;;  %v4639_v37 = vunpack.c.l.bf16 %v4139_v0  ;;  %v725_v0 = vmul.f32 %v4500_v12, %v4595_v44  ;;  %v4667_v12 = vsel %vm4644_vm12, 1.0, %v5933_v61 }
  0x54   : > { %5948 = vst [vmem:[#allocation33_spill] sm:$0xff] %v4595_v44  ;;  %v4607_v7 = vsel %vm702_vm0, %v695_v27, %v5857_v56  ;;  %v740_v56 = vmul.f32 %v4589_v62, %v4573_v45 }
  0x55   : > { %v806_v47 = vmul.f32 %v4607_v7, %v4592_v51  ;;  %v4628_v51 = vadd.s32 64, %v4151_v6  ;;  %5953 = vst [vmem:[#allocation35_spill] sm:$0xff] %v4667_v12 }
  0x57   : > { %v373_v9 = vand.u32 7, %v4628_v51  ;;  %v4655_v51 = vsel %vm468_vm11, 1.0, %v5933_v61 }
  0x58   : > { %3544 = vrot.lane.b32.xlu2 %v3548_v48, %s4082_s14  ;;  %v757_v48 = vmul.f32 %v4506_v21, %v4595_v44  ;;  %5952 = vst [vmem:[#allocation34_spill] sm:$0xff] %v4655_v51  ;;  %v3583_v21 = vpack.i.bf16 %v726_v42, %v725_v0  ;;  %v5959_v42 = vrot.slane %v4543_v50, 1 }
  0x59   : > { %3564 = vrot.lane.b32.xlu0 %v3563_v52, %s4079_s9  ;;  %v4601_v52 = vsel %vm702_vm0, %v5949_v57, %v695_v27  ;;  %v771_v57 = vmul.f32 %v4589_v62, %v4568_v20  ;;  %v3578_v27 = vpack.i.bf16 %v4458_v23, %v4414_v16  ;;  %v3558_v16 = vpack.i.bf16 %v740_v56, %v739_v33  ;;  %v3316_v56 = vld [vmem:[%s4292_s20 + $0x18] sm:$0xff] }
  0x5a   : > { %v805_v11 = vmul.f32 %v4601_v52, %v4595_v44  ;;  %3554 = vrot.lane.b32.xlu1 %v3553_v54, %s4081_s10  ;;  %v3317_v54 = vld [vmem:[%s4292_s20 + $0x20] sm:$0xff]  ;;  %v758_v62 = vmul.f32 %v4601_v52, %v4576_v43  ;;  %vm501_vm13 = vcmp.lt.s32.totalorder %v373_v9, 7  ;;  %v5955_v33 = vrot.slane %v4458_v23, 7  ;;  %v3314_v44 = vld [vmem:[%s4292_s20 + $0x8] sm:$0xff] }
  0x5b   : > { %v3568_v40 = vpack.i.bf16 %v772_v46, %v771_v57  ;;  %3393 = vmatpush.bf16.msra.mxu3 %v3317_v54  ;;  %v5866_v46 = vand.u32 7, %v4631_v36  ;;  %1497 = vmatpush.bf16.msra.mxu0 %v3317_v54  ;;  %v697_v57 = vrot.slane %v4639_v37, 1  ;;  %vm469_vm2 = vcmp.ge.s32.totalorder %v373_v9, 1 }
  0x5c   : > { %v1309_v15 = vpack.c.bf16 %v806_v47, %v805_v11  ;;  %v3593_v11 = vpack.i.bf16 %v758_v62, %v757_v48  ;;  %v4670_v62 = vmul.f32 0.0, %v4655_v51  ;;  %v678_v48 = vmul.f32 0.0, %v4461_v17 }
  0x5d   : > { %vm502_vm15 = vcmp.lt.s32.totalorder %v5866_v46, 7  ;;  %v4687_v47 = vsel %vm501_vm13, 1.0, %v5933_v61  ;;  %v5962_v9 = vand.u32 7, %v4631_v36  ;;  %v5963_v36 = vrot.slane %v4539_v19, 7 }
  0x5e   : > { %3205 = vmatmul.msk.bf16.gmra.mxu2 %vm1199_vm14, %v1309_v15  ;;  %v629_v15 = vrot.slane %v4461_v17, 7  ;;  %5954 = vst [vmem:[#allocation36_spill] sm:$0xff] %v4670_v62  ;;  %v4690_v0 = vsel %vm502_vm15, 1.0, %v5933_v61 }
  0x5f   : > { %3394 = vmatpush.bf16.msra.mxu3 %v3316_v56  ;;  %1498 = vmatpush.bf16.msra.mxu0 %v3316_v56  ;;  %5957 = vst [vmem:[#allocation38_spill] sm:$0xff] %v4687_v47  ;;  %v4696_v56 = vsel %vm702_vm0, %v5959_v42, %v697_v57  ;;  %vm470_vm3 = vcmp.ge.s32.totalorder %v5962_v9, 1 }
  0x60   : > { %3559 = vrot.lane.b32.xlu2 %v3558_v16, %s4082_s14  ;;  %v4677_v16 = vsel %vm637_vm1, %v629_v15, %v5865_v63  ;;  %v4683_v54 = vsel %vm637_vm1, %v5955_v33, %v629_v15  ;;  %5958 = vst [vmem:[#allocation39_spill] sm:$0xff] %v4690_v0  ;;  %v807_v33 = vmul.f32 %v4696_v56, %v4687_v47 }
  0x61   : > { %3579 = vrot.lane.b32.xlu0 %v3578_v27, %s4079_s9  ;;  %5956 = vst [vmem:[#allocation37_spill] sm:$0xff] %v4683_v54  ;;  %v773_v42 = vmul.f32 %v4683_v54, %v4667_v12  ;;  %v774_v46 = vmul.f32 %v4677_v16, %v4670_v62  ;;  %v742_v43 = vmul.f32 %v4683_v54, %v4655_v51  ;;  %v3313_v62 = vld [vmem:[%s4292_s20] sm:$0xff] }
  0x62   : > { %3569 = vrot.lane.b32.xlu1 %v3568_v40, %s4081_s10  ;;  %v3315_v40 = vld [vmem:[%s4292_s20 + $0x10] sm:$0xff]  ;;  %v759_v54 = vmul.f32 %v4607_v7, %v4687_v47 }
  0x63   : > { %3395 = vmatpush.bf16.msra.mxu3 %v3315_v40  ;;  %1499 = vmatpush.bf16.msra.mxu0 %v3315_v40  ;;  %v4721_v40 = vadd.s32 80, %v4151_v6 }
  0x67   : > { %3396 = vmatpush.bf16.msra.mxu3 %v3314_v44  ;;  %1500 = vmatpush.bf16.msra.mxu0 %v3314_v44 }
  0x68   : > { %3574 = vrot.lane.b32.xlu2 %v3578_v27, %s4082_s14  ;;  %v4728_v27 = vmul.f32 0.0, %v4687_v47 }
  0x69   : > { %3594 = vrot.lane.b32.xlu0 %v3593_v11, %s4079_s9  ;;  %v5960_v11 = vrot.slane %v4145_v3, 1 }
  0x6a   : > { %3584 = vrot.lane.b32.xlu1 %v3583_v21, %s4081_s10  ;;  %v4724_v21 = vadd.s32 88, %v4151_v6  ;;  %5961 = vst [vmem:[#allocation40_spill] sm:$0xff] %v4728_v27  ;;  %v727_v44 = vmul.f32 %v4601_v52, %v4728_v27  ;;  %v4751_v52 = vsel %vm469_vm2, 1.0, %v5933_v61 }
  0x6b   : > { %v4702_v15 = vsel %vm702_vm0, %v697_v57, %v5960_v11  ;;  %v3608_v57 = vpack.i.bf16 %v4539_v19, %v678_v48  ;;  %v741_v11 = vmul.f32 %v4583_v38, %v4667_v12  ;;  %v3598_v48 = vpack.i.bf16 %v774_v46, %v773_v42  ;;  %3397 = vmatpush.bf16.msra.mxu3 %v3313_v62 }
  0x6c   : > { %v808_v63 = vmul.f32 %v4702_v15, %v4690_v0  ;;  %v760_v38 = vmul.f32 %v4696_v56, %v4690_v0  ;;  %v375_v12 = vand.u32 7, %v4721_v40  ;;  %1501 = vmatpush.bf16.msra.mxu0 %v3313_v62  ;;  %v728_v46 = vmul.f32 %v4607_v7, %v4690_v0  ;;  %v3327_v7 = vld [vmem:[%s4292_s20 + $0x70] sm:$0xff] }
  0x6d   : > { %v3588_v51 = vpack.i.bf16 %v742_v43, %v741_v11  ;;  %v631_v42 = vrot.slane %v4543_v50, 7  ;;  %v4755_v62 = vsel %vm470_vm3, 1.0, %v5933_v61 }
  0x6e   : > { %v1312_v23 = vpack.c.bf16 %v808_v63, %v807_v33  ;;  %v376_v63 = vand.u32 7, %v4724_v21  ;;  %v3328_v33 = vld [vmem:[%s4292_s20 + $0x78] sm:$0xff]  ;;  %v3623_v43 = vpack.i.bf16 %v760_v38, %v759_v54  ;;  %vm503_vm4 = vcmp.lt.s32.totalorder %v375_v12, 7 }
  0x6f   : > { %3398 = vmatpush.bf16.msrb.mxu3 %v3328_v33  ;;  %1543 = vmatpush.bf16.msra.mxu1 %v3328_v33  ;;  %v3613_v38 = vpack.i.bf16 %v728_v46, %v727_v44  ;;  %v4766_v54 = vsel %vm637_vm1, %v5963_v36, %v631_v42  ;;  %v4770_v40 = vsel %vm503_vm4, 1.0, %v5933_v61  ;;  %v3325_v36 = vld [vmem:[%s4292_s20 + $0x60] sm:$0xff]  ;;  %vm471_vm6 = vcmp.ge.s32.totalorder %v375_v12, 1 }
  0x70   : > { %3206 = vmatmul.msk.bf16.gmra.mxu2 %vm1199_vm14, %v1312_v23  ;;  %3589 = vrot.lane.b32.xlu2 %v3588_v51, %s4082_s14  ;;  %v790_v23 = vmul.f32 0.0, %v4539_v19  ;;  %vm504_vm5 = vcmp.lt.s32.totalorder %v376_v63, 7  ;;  %v809_v44 = vmul.f32 %v4178_v18, %v4770_v40  ;;  %v775_v33 = vmul.f32 %v4766_v54, %v4751_v52 }
  0x71   : > { %3609 = vrot.lane.b32.xlu0 %v3608_v57, %s4079_s9  ;;  %v632_v57 = vrot.slane %v4639_v37, 7  ;;  %v4773_v21 = vsel %vm504_vm5, 1.0, %v5933_v61  ;;  %v744_v9 = vmul.f32 %v4766_v54, %v4755_v62  ;;  %v761_v47 = vmul.f32 %v4702_v15, %v4770_v40 }
  0x72   : > { %3599 = vrot.lane.b32.xlu1 %v3598_v48, %s4081_s10  ;;  %v3603_v11 = vpack.i.bf16 %v790_v23, %v4461_v17  ;;  %v3326_v48 = vld [vmem:[%s4292_s20 + $0x68] sm:$0xff]  ;;  %v810_v46 = vmul.f32 %v4170_v14, %v4773_v21  ;;  %v743_v23 = vmul.f32 %v4677_v16, %v4751_v52  ;;  %vm472_vm7 = vcmp.ge.s32.totalorder %v376_v63, 1 }
  0x73   : > { %v4760_v51 = vsel %vm637_vm1, %v631_v42, %v632_v57  ;;  %3399 = vmatpush.bf16.msrb.mxu3 %v3327_v7  ;;  %1544 = vmatpush.bf16.msra.mxu1 %v3327_v7  ;;  %v3638_v42 = vpack.i.bf16 %v4639_v37, %v4543_v50  ;;  %v4821_v12 = vsel %vm472_vm7, 1.0, %v5933_v61 }
  0x74   : > { %v3618_v27 = vpack.i.bf16 %v744_v9, %v743_v23  ;;  %v3323_v9 = vld [vmem:[%s4292_s20 + $0x50] sm:$0xff] }
  0x77   : > { %3400 = vmatpush.bf16.msrb.mxu3 %v3326_v48  ;;  %1545 = vmatpush.bf16.msra.mxu1 %v3326_v48  ;;  %v729_v48 = vmul.f32 %v4696_v56, %v4770_v40  ;;  %v667_v56 = vmul.f32 %v4210_v31, %v4199_v29 }
  0x78   : > { %3604 = vrot.lane.b32.xlu2 %v3603_v11, %s4082_s14  ;;  %v762_v11 = vmul.f32 %v4178_v18, %v4773_v21  ;;  %v5964_v18 = vrot.slane %v4145_v3, 7 }
  0x79   : > { %3624 = vrot.lane.b32.xlu0 %v3623_v43, %s4079_s9  ;;  %v776_v43 = vmul.f32 %v4760_v51, %v4755_v62 }
  0x7a   : > { %3614 = vrot.lane.b32.xlu1 %v3613_v38, %s4081_s10  ;;  %v4792_v14 = vpop.permute.xlu2 %3449  ;;  %v1315_v38 = vpack.c.bf16 %v810_v46, %v809_v44  ;;  %v730_v44 = vmul.f32 %v4702_v15, %v4773_v21  ;;  %v3324_v46 = vld [vmem:[%s4292_s20 + $0x58] sm:$0xff]  ;;  %v4818_v15 = vsel %vm471_vm6, 1.0, %v5933_v61  ;;  %v812_v61 = vmul.f32 %v4262_v55, %v4189_v25 }
  0x7b   : > { %v3628_v7 = vpack.i.bf16 %v776_v43, %v775_v33  ;;  %3401 = vmatpush.bf16.msrb.mxu3 %v3325_v36  ;;  %1546 = vmatpush.bf16.msra.mxu1 %v3325_v36  ;;  %v3653_v33 = vpack.i.bf16 %v762_v11, %v761_v47  ;;  %v641_v43 = vsel %vm637_vm1, %v632_v57, %v5964_v18 }
  0x7c   : > { %v3643_v47 = vpack.i.bf16 %v730_v44, %v729_v48  ;;  %v666_v57 = vmul.f32 %v641_v43, %v4192_v26  ;;  %v778_v48 = vmul.f32 %v4210_v31, %v4821_v12  ;;  %v3322_v44 = vld [vmem:[%s4292_s20 + $0x48] sm:$0xff]  ;;  %v746_v55 = vmul.f32 %v641_v43, %v4821_v12 }
  0x7f   : > { %3402 = vmatpush.bf16.msrb.mxu3 %v3324_v46  ;;  %1547 = vmatpush.bf16.msra.mxu1 %v3324_v46 }
  0x80   : > { %3207 = vmatmul.msk.bf16.gmra.mxu2 %vm1199_vm14, %v1315_v38  ;;  %3619 = vrot.lane.b32.xlu2 %v3618_v27, %s4082_s14 }
  0x81   : > { %3639 = vrot.lane.b32.xlu0 %v3638_v42, %s4079_s9 }
  0x82   : > { %v3430_v0 = vpop.permute.xlu0 %3429  ;;  %3629 = vrot.lane.b32.xlu1 %v3628_v7, %s4081_s10  ;;  %v4812_v23 = vpop.permute.xlu2 %3454  ;;  %v811_v7 = vmul.f32 %v4214_v32, %v4186_v24  ;;  %v745_v32 = vmul.f32 %v4760_v51, %v4818_v15 }
  0x83   : > { %v3432_v27 = vunpack.i.h.bf16 %v3430_v0  ;;  %v3431_v63 = vunpack.i.l.bf16 %v3430_v0  ;;  %3403 = vmatpush.bf16.msrb.mxu3 %v3323_v9  ;;  %1548 = vmatpush.bf16.msra.mxu1 %v3323_v9  ;;  %v777_v0 = vmul.f32 %v641_v43, %v4818_v15 }
  0x84   : > { %v3648_v29 = vpack.i.bf16 %v746_v55, %v745_v32  ;;  %v3456_v32 = vunpack.i.l.bf16 %v4812_v23 }
  0x85   : > { %v1212_v46 = vsel %vm1199_vm14, %v666_v57, %v3431_v63  ;;  %v3658_v63 = vpack.i.bf16 %v778_v48, %v777_v0  ;;  %v3321_v57 = vld [vmem:[%s4292_s20 + $0x40] sm:$0xff]  ;;  %v3451_v0 = vunpack.i.l.bf16 %v4792_v14 }
  0x87   : > { %3404 = vmatpush.bf16.msrb.mxu3 %v3322_v44  ;;  %1549 = vmatpush.bf16.msra.mxu1 %v3322_v44 }
  0x88   : > { %3634 = vrot.lane.b32.xlu2 %v3638_v42, %s4082_s14 }
  0x89   : > { %3654 = vrot.lane.b32.xlu0 %v3653_v33, %s4079_s9  ;;  %v1213_v33 = vsel %vm1199_vm14, %v667_v56, %v3432_v27  ;;  %v1318_v27 = vpack.c.bf16 %v812_v61, %v811_v7  ;;  %v669_v7 = vmul.f32 %v4272_v58, %v4309_v13  ;;  %v3452_v61 = vunpack.i.h.bf16 %v4792_v14 }
  0x8a   : > { %3644 = vrot.lane.b32.xlu1 %v3643_v47, %s4081_s10  ;;  %v4846_v42 = vpop.permute.xlu2 %3469  ;;  %v4865_v58 = vmul.f32 0.0, %v4278_v60 }
  0x8b   : > { %v3435_v38 = vpop.permute.xlu0 %3434  ;;  %3405 = vmatpush.bf16.msrb.mxu3 %v3321_v57  ;;  %1550 = vmatpush.bf16.msra.mxu1 %v3321_v57 }
  0x8c   : > { %v3437_v36 = vunpack.i.h.bf16 %v3435_v38  ;;  %v3436_v11 = vunpack.i.l.bf16 %v3435_v38  ;;  %v3440_v18 = vpop.permute.xlu1 %3439 }
  0x8d   : > { %v3442_v56 = vunpack.i.h.bf16 %v3440_v18  ;;  %v3441_v47 = vunpack.i.l.bf16 %v3440_v18 }
  0x8e   : > { %v1229_v31 = vsel %vm1216_vm8, %v1212_v46, %v3436_v11  ;;  %v1230_v9 = vsel %vm1216_vm8, %v1213_v33, %v3437_v36  ;;  %v668_v36 = vmul.f32 %v4204_v30, %v4297_v2  ;;  %v3457_v33 = vunpack.i.h.bf16 %v4812_v23 }
  0x8f   : > { %v1246_v43 = vsel %vm1233_vm9, %v1229_v31, %v3441_v47  ;;  %v1247_v38 = vsel %vm1233_vm9, %v1230_v9, %v3442_v56  ;;  %v813_v23 = vmul.f32 %v4344_v41, %v4275_v59  ;;  %v814_v56 = vmul.f32 %v4340_v39, %v4865_v58 }
  0x90   : > { %v1316_v25 = vpack.c.bf16 %v1247_v38, %v1246_v43  ;;  %3208 = vmatmul.msk.bf16.gmra.mxu2 %vm1199_vm14, %v1318_v27  ;;  %3649 = vrot.lane.b32.xlu2 %v3648_v29, %s4082_s14  ;;  %v4878_v27 = vmul.f32 0.0, %v4389_v22 }
  0x91   : > { %v1321_v43 = vpack.c.bf16 %v814_v56, %v813_v23  ;;  %v3471_v23 = vunpack.i.l.bf16 %v4846_v42 }
  0x92   : > { %3659 = vrot.lane.b32.xlu1 %v3658_v63, %s4081_s10  ;;  %1532 = vmatmul.bf16.vlgmr.msra.gmra.mxu3 %v1316_v25  ;;  %v3485_v25 = vpop.permute.xlu2 %3484  ;;  %5965 = vst [vmem:[#allocation41_spill] sm:$0xff] %v4878_v27  ;;  %v654_v38 = vmul.f32 %v4328_v34, %v4878_v27 }
  0x93   : > { %v3460_v11 = vpop.permute.xlu0 %3459 }
  0x94   : > { %v3445_v48 = vpop.permute.xlu1 %3444  ;;  %v3462_v39 = vunpack.i.h.bf16 %v3460_v11 }
  0x95   : > { %v3447_v44 = vunpack.i.h.bf16 %v3445_v48  ;;  %v3446_v46 = vunpack.i.l.bf16 %v3445_v48 }
  0x97   : > { %v1215_v55 = vsel %vm1199_vm14, %v669_v7, %v3447_v44  ;;  %v1214_v30 = vsel %vm1199_vm14, %v668_v36, %v3446_v46  ;;  %v655_v36 = vmul.f32 %v4369_v1, %v4392_v28  ;;  %v3487_v46 = vunpack.i.h.bf16 %v3485_v25 }
  0x98   : > { %v1231_v29 = vsel %vm1216_vm8, %v1214_v30, %v3451_v0  ;;  %v1232_v18 = vsel %vm1216_vm8, %v1215_v55, %v3452_v61  ;;  %3664 = vrot.lane.b32.xlu2 %v4158_v8, %s4082_s14  ;;  %v3461_v8 = vunpack.i.l.bf16 %v3460_v11 }
  0x99   : > { %v1248_v31 = vsel %vm1233_vm9, %v1231_v29, %v3456_v32  ;;  %v1249_v9 = vsel %vm1233_vm9, %v1232_v18, %v3457_v33  ;;  %v3486_v33 = vunpack.i.l.bf16 %v3485_v25  ;;  %v1263_v29 = vsel %vm1199_vm14, %v4149_v5, %v3462_v39 }
  0x9a   : > { %v1319_v47 = vpack.c.bf16 %v1249_v9, %v1248_v31  ;;  %v3500_v57 = vpop.permute.xlu2 %3499  ;;  %v1262_v18 = vsel %vm1199_vm14, %v4147_v4, %v3461_v8  ;;  %v3472_v9 = vunpack.i.h.bf16 %v4846_v42 }
  0x9b   : > { %v3475_v14 = vpop.permute.xlu0 %3474  ;;  %v3502_v39 = vunpack.i.h.bf16 %v3500_v57  ;;  %v3501_v8 = vunpack.i.l.bf16 %v3500_v57 }
  0x9c   : > { %v3465_v63 = vpop.permute.xlu1 %3464  ;;  %v3477_v41 = vunpack.i.h.bf16 %v3475_v14  ;;  %v3476_v7 = vunpack.i.l.bf16 %v3475_v14 }
  0x9d   : > { %v3467_v1 = vunpack.i.h.bf16 %v3465_v63  ;;  %v3466_v30 = vunpack.i.l.bf16 %v3465_v63 }
  0x9e   : > { %v1200_v0 = vsel %vm1199_vm14, %v654_v38, %v3476_v7  ;;  %v1201_v48 = vsel %vm1199_vm14, %v655_v36, %v3477_v41 }
  0x9f   : > { %v1279_v63 = vsel %vm1216_vm8, %v1263_v29, %v3467_v1  ;;  %v1278_v5 = vsel %vm1216_vm8, %v1262_v18, %v3466_v30 }
  0xa0   : > { %3209 = vmatmul.msk.bf16.gmra.mxu2 %vm1199_vm14, %v1321_v43  ;;  %v1294_v36 = vsel %vm1233_vm9, %v1278_v5, %v3471_v23  ;;  %v1295_v41 = vsel %vm1233_vm9, %v1279_v63, %v3472_v9  ;;  %v5969_v9 = vld [vmem:[#allocation21_spill] sm:$0xff] }
  0xa2   : > { %1537 = vmatmul.bf16.gmra.mxu3 %v1319_v47  ;;  %v4887_v55 = vpop.permute.xlu2 %3514 }
  0xa3   : > { %v3490_v61 = vpop.permute.xlu0 %3489  ;;  %v3516_v5 = vunpack.i.l.bf16 %v4887_v55 }
  0xa4   : > { %v3480_v44 = vpop.permute.xlu1 %3479  ;;  %v3492_v43 = vunpack.i.h.bf16 %v3490_v61  ;;  %v3491_v38 = vunpack.i.l.bf16 %v3490_v61 }
  0xa5   : > { %v3482_v32 = vunpack.i.h.bf16 %v3480_v44  ;;  %v3481_v34 = vunpack.i.l.bf16 %v3480_v44 }
  0xa6   : > { %v1251_v42 = vsel %vm1199_vm14, %v4257_v53, %v3492_v43  ;;  %v656_v53 = vmul.f32 %v4396_v35, %v4475_v10 }
  0xa7   : > { %v1217_v11 = vsel %vm1216_vm8, %v1200_v0, %v3481_v34  ;;  %v1218_v14 = vsel %vm1216_vm8, %v1201_v48, %v3482_v32  ;;  %v1317_v0 = vpack.c.bf16 %v1295_v41, %v1294_v36  ;;  %v1250_v48 = vsel %vm1199_vm14, %v4243_v49, %v3491_v38 }
  0xa8   : > { %v1234_v31 = vsel %vm1233_vm9, %v1217_v11, %v3486_v33  ;;  %v1235_v25 = vsel %vm1233_vm9, %v1218_v14, %v3487_v46  ;;  %v1266_v61 = vsel %vm1216_vm8, %v1250_v48, %v3501_v8  ;;  %v1267_v34 = vsel %vm1216_vm8, %v1251_v42, %v3502_v39  ;;  %v5966_v11 = vld [vmem:[#allocation10_spill] sm:$0xff]  ;;  %v5967_v14 = vld [vmem:[#allocation5_spill] sm:$0xff] }
  0xa9   : > { %v1298_v56 = vpack.c.bf16 %v1235_v25, %v1234_v31  ;;  %v5968_v25 = vld [vmem:[#allocation24_spill] sm:$0xff] }
  0xaa   : > { %v3530_v7 = vpop.permute.xlu2 %3529  ;;  %v657_v23 = vmul.f32 %v5969_v9, %v5968_v25 }
  0xab   : > { %v3505_v47 = vpop.permute.xlu0 %3504  ;;  %1502 = vmatmul.bf16.vlgmr.msra.gmra.mxu0 %v1298_v56  ;;  %v3517_v56 = vunpack.i.h.bf16 %v4887_v55  ;;  %v3532_v8 = vunpack.i.h.bf16 %v3530_v7 }
  0xac   : > { %v3495_v4 = vpop.permute.xlu1 %3494  ;;  %v3507_v1 = vunpack.i.h.bf16 %v3505_v47  ;;  %v3506_v30 = vunpack.i.l.bf16 %v3505_v47 }
  0xad   : > { %v3497_v46 = vunpack.i.h.bf16 %v3495_v4  ;;  %v3496_v33 = vunpack.i.l.bf16 %v3495_v4 }
  0xae   : > { %v4923_v39 = vpop.f32.mrf.mxu2 }
  0xaf   : > { %v1265_v49 = vsel %vm1199_vm14, %v5966_v11, %v3497_v46  ;;  %v1264_v31 = vsel %vm1199_vm14, %v5967_v14, %v3496_v33 }
  0xb0   : > { %v1280_v36 = vsel %vm1216_vm8, %v1264_v31, %v3506_v30  ;;  %v1281_v41 = vsel %vm1216_vm8, %v1265_v49, %v3507_v1  ;;  %v5970_v31 = vld [vmem:[#allocation16_spill] sm:$0xff] }
  0xb1   : > { %v1296_v55 = vsel %vm1233_vm9, %v1280_v36, %v3516_v5  ;;  %v1297_v33 = vsel %vm1233_vm9, %v1281_v41, %v3517_v56  ;;  %v5973_v41 = vld [vmem:[#allocation25_spill] sm:$0xff] }
  0xb2   : > { %1581 = vmatmul.bf16.vlgmr.msrb.gmra.mxu3 %v1317_v0  ;;  %v3545_v18 = vpop.permute.xlu2 %3544  ;;  %v3531_v0 = vunpack.i.l.bf16 %v3530_v7 }
  0xb3   : > { %v3520_v44 = vpop.permute.xlu0 %3519  ;;  %v3546_v5 = vunpack.i.l.bf16 %v3545_v18 }
  0xb4   : > { %v3510_v32 = vpop.permute.xlu1 %3509  ;;  %v3522_v43 = vunpack.i.h.bf16 %v3520_v44  ;;  %v3521_v35 = vunpack.i.l.bf16 %v3520_v44 }
  0xb5   : > { %v3512_v29 = vunpack.i.h.bf16 %v3510_v32  ;;  %v3511_v57 = vunpack.i.l.bf16 %v3510_v32 }
  0xb6   : > { %v1203_v42 = vsel %vm1199_vm14, %v657_v23, %v3522_v43  ;;  %v1202_v48 = vsel %vm1199_vm14, %v656_v53, %v3521_v35  ;;  %v4933_v14 = vpop.f32.mrf.mxu2  ;;  %v5971_v23 = vld [vmem:[#allocation11_spill] sm:$0xff] }
  0xb7   : > { %v1282_v63 = vsel %vm1233_vm9, %v1266_v61, %v3511_v57  ;;  %v1283_v47 = vsel %vm1233_vm9, %v1267_v34, %v3512_v29  ;;  %v1320_v34 = vpack.c.bf16 %v1297_v33, %v1296_v55 }
  0xb8   : > { %v1299_v4 = vpack.c.bf16 %v1283_v47, %v1282_v63  ;;  %v3547_v47 = vunpack.i.h.bf16 %v3545_v18 }
  0xba   : > { %1551 = vmatmul.bf16.vlgmr.msra.gmra.mxu1 %v1299_v4  ;;  %v3560_v61 = vpop.permute.xlu2 %3559 }
  0xbb   : > { %v3535_v38 = vpop.permute.xlu0 %3534 }
  0xbc   : > { %v3525_v46 = vpop.permute.xlu1 %3524  ;;  %v3537_v29 = vunpack.i.h.bf16 %v3535_v38  ;;  %v3536_v57 = vunpack.i.l.bf16 %v3535_v38  ;;  %v5972_v38 = vld [vmem:[#allocation26_spill] sm:$0xff] }
  0xbd   : > { %v3527_v44 = vunpack.i.h.bf16 %v3525_v46  ;;  %v3526_v32 = vunpack.i.l.bf16 %v3525_v46  ;;  %v658_v36 = vmul.f32 %v5972_v38, %v4568_v20 }
  0xbe   : > { %v1253_v9 = vsel %vm1199_vm14, %v5970_v31, %v3537_v29  ;;  %v1252_v56 = vsel %vm1199_vm14, %v5971_v23, %v3536_v57  ;;  %v3561_v29 = vunpack.i.l.bf16 %v3560_v61 }
  0xbf   : > { %v1219_v1 = vsel %vm1216_vm8, %v1202_v48, %v3526_v32  ;;  %v1220_v30 = vsel %vm1216_vm8, %v1203_v42, %v3527_v44 }
  0xc0   : > { %v1236_v7 = vsel %vm1233_vm9, %v1219_v1, %v3531_v0  ;;  %v1237_v11 = vsel %vm1233_vm9, %v1220_v30, %v3532_v8  ;;  %v659_v8 = vmul.f32 %v5973_v41, %v4573_v45  ;;  %v3562_v30 = vunpack.i.h.bf16 %v3560_v61 }
  0xc1   : > { %v1301_v53 = vpack.c.bf16 %v1237_v11, %v1236_v7  ;;  %v4949_v11 = vpop.f32.mrf.mxu2 }
  0xc2   : > { %1586 = vmatmul.bf16.gmra.mxu3 %v1320_v34  ;;  %v3575_v35 = vpop.permute.xlu2 %3574 }
  0xc3   : > { %v3550_v49 = vpop.permute.xlu0 %3549  ;;  %1507 = vmatmul.bf16.gmra.mxu0 %v1301_v53  ;;  %v3577_v41 = vunpack.i.h.bf16 %v3575_v35 }
  0xc4   : > { %v3540_v63 = vpop.permute.xlu1 %3539  ;;  %v3552_v48 = vunpack.i.h.bf16 %v3550_v49  ;;  %v3551_v46 = vunpack.i.l.bf16 %v3550_v49 }
  0xc5   : > { %v3542_v4 = vunpack.i.h.bf16 %v3540_v63  ;;  %v3541_v43 = vunpack.i.l.bf16 %v3540_v63 }
  0xc6   : > { %v1205_v32 = vsel %vm1199_vm14, %v659_v8, %v3552_v48  ;;  %v1204_v34 = vsel %vm1199_vm14, %v658_v36, %v3551_v46  ;;  %v3576_v8 = vunpack.i.l.bf16 %v3575_v35  ;;  %v5976_v48 = vld [vmem:[#allocation35_spill] sm:$0xff] }
  0xc7   : > { %v1268_v0 = vsel %vm1216_vm8, %v1252_v56, %v3541_v43  ;;  %v1269_v42 = vsel %vm1216_vm8, %v1253_v9, %v3542_v4  ;;  %v5974_v4 = vld [vmem:[#allocation19_spill] sm:$0xff]  ;;  %v5975_v43 = vld [vmem:[#allocation18_spill] sm:$0xff] }
  0xc8   : > { %v1284_v55 = vsel %vm1233_vm9, %v1268_v0, %v3546_v5  ;;  %v1285_v33 = vsel %vm1233_vm9, %v1269_v42, %v3547_v47  ;;  %v5977_v46 = vld [vmem:[#allocation31_spill] sm:$0xff] }
  0xc9   : > { %v1302_v18 = vpack.c.bf16 %v1285_v33, %v1284_v55  ;;  %v660_v55 = vmul.f32 %v5977_v46, %v5976_v48  ;;  %v5978_v33 = vld [vmem:[#allocation34_spill] sm:$0xff] }
  0xca   : > { %v3590_v31 = vpop.permute.xlu2 %3589 }
  0xcb   : > { %v3565_v44 = vpop.permute.xlu0 %3564  ;;  %1556 = vmatmul.bf16.gmra.mxu1 %v1302_v18  ;;  %v5979_v18 = vld [vmem:[#allocation30_spill] sm:$0xff] }
  0xcc   : > { %v3555_v1 = vpop.permute.xlu1 %3554  ;;  %v3567_v9 = vunpack.i.h.bf16 %v3565_v44  ;;  %v3566_v23 = vunpack.i.l.bf16 %v3565_v44  ;;  %v661_v44 = vmul.f32 %v5979_v18, %v5978_v33 }
  0xcd   : > { %v3557_v57 = vunpack.i.h.bf16 %v3555_v1  ;;  %v3556_v7 = vunpack.i.l.bf16 %v3555_v1  ;;  %v4965_v1 = vpop.f32.mrf.mxu2 }
  0xce   : > { %v1255_v61 = vsel %vm1199_vm14, %v5974_v4, %v3567_v9  ;;  %v1254_v38 = vsel %vm1199_vm14, %v5975_v43, %v3566_v23 }
  0xcf   : > { %v1221_v53 = vsel %vm1216_vm8, %v1204_v34, %v3556_v7  ;;  %v1222_v49 = vsel %vm1216_vm8, %v1205_v32, %v3557_v57 }
  0xd0   : > { %v1238_v56 = vsel %vm1233_vm9, %v1221_v53, %v3561_v29  ;;  %v1239_v63 = vsel %vm1233_vm9, %v1222_v49, %v3562_v30 }
  0xd1   : > { %v1304_v47 = vpack.c.bf16 %v1239_v63, %v1238_v56  ;;  %v3592_v63 = vunpack.i.h.bf16 %v3590_v31 }
  0xd2   : > { %v3605_v49 = vpop.permute.xlu2 %3604 }
  0xd3   : > { %v3580_v5 = vpop.permute.xlu0 %3579  ;;  %1512 = vmatmul.bf16.gmra.mxu0 %v1304_v47  ;;  %v3591_v47 = vunpack.i.l.bf16 %v3590_v31 }
  0xd4   : > { %v3570_v36 = vpop.permute.xlu1 %3569  ;;  %v3582_v30 = vunpack.i.h.bf16 %v3580_v5  ;;  %v3581_v29 = vunpack.i.l.bf16 %v3580_v5 }
  0xd5   : > { %v3572_v0 = vunpack.i.h.bf16 %v3570_v36  ;;  %v3571_v42 = vunpack.i.l.bf16 %v3570_v36  ;;  %v4975_v46 = vpop.f32.mrf.mxu2 }
  0xd6   : > { %v1207_v9 = vsel %vm1199_vm14, %v661_v44, %v3582_v30  ;;  %v1206_v23 = vsel %vm1199_vm14, %v660_v55, %v3581_v29  ;;  %v4978_v55 = vmul.f32 0.0, %v4751_v52  ;;  %v5981_v44 = vld [vmem:[#allocation23_spill] sm:$0xff]  ;;  %v3607_v30 = vunpack.i.h.bf16 %v3605_v49 }
  0xd7   : > { %v1270_v32 = vsel %vm1216_vm8, %v1254_v38, %v3571_v42  ;;  %v1271_v34 = vsel %vm1216_vm8, %v1255_v61, %v3572_v0  ;;  %v3606_v29 = vunpack.i.l.bf16 %v3605_v49 }
  0xd8   : > { %v1286_v57 = vsel %vm1233_vm9, %v1270_v32, %v3576_v8  ;;  %v1287_v35 = vsel %vm1233_vm9, %v1271_v34, %v3577_v41  ;;  %5980 = vst [vmem:[#allocation10_spill] sm:$0xff] %v4978_v55 }
  0xd9   : > { %v1305_v7 = vpack.c.bf16 %v1287_v35, %v1286_v57 }
  0xda   : > { %v3620_v31 = vpop.permute.xlu2 %3619 }
  0xdb   : > { %v3595_v53 = vpop.permute.xlu0 %3594  ;;  %1561 = vmatmul.bf16.gmra.mxu1 %v1305_v7  ;;  %v5982_v7 = vld [vmem:[#allocation37_spill] sm:$0xff] }
  0xdc   : > { %v3585_v56 = vpop.permute.xlu1 %3584  ;;  %v3597_v38 = vunpack.i.h.bf16 %v3595_v53  ;;  %v3596_v36 = vunpack.i.l.bf16 %v3595_v53  ;;  %v662_v53 = vmul.f32 %v5982_v7, %v4978_v55  ;;  %v3346_v55 = vld [vmem:[%s5065_s18 + $0x78] sm:$0xff] }
  0xdd   : > { %v3587_v4 = vunpack.i.h.bf16 %v3585_v56  ;;  %v3586_v61 = vunpack.i.l.bf16 %v3585_v56  ;;  %2654 = vmatpush.bf16.msrb.mxu2 %v3346_v55 }
  0xde   : > { %v1257_v18 = vsel %vm1199_vm14, %v4461_v17, %v3597_v38  ;;  %v1256_v32 = vsel %vm1199_vm14, %v5981_v44, %v3596_v36  ;;  %v3622_v36 = vunpack.i.h.bf16 %v3620_v31 }
  0xdf   : > { %v1223_v43 = vsel %vm1216_vm8, %v1206_v23, %v3586_v61  ;;  %v1224_v5 = vsel %vm1216_vm8, %v1207_v9, %v3587_v4  ;;  %v663_v9 = vmul.f32 %v4677_v16, %v4755_v62 }
  0xe0   : > { %v1240_v41 = vsel %vm1233_vm9, %v1223_v43, %v3591_v47  ;;  %v1241_v8 = vsel %vm1233_vm9, %v1224_v5, %v3592_v63  ;;  %v4992_v43 = vpop.f32.mrf.mxu2 }
  0xe1   : > { %v1307_v0 = vpack.c.bf16 %v1241_v8, %v1240_v41  ;;  %v3621_v41 = vunpack.i.l.bf16 %v3620_v31 }
  0xe3   : > { %v3610_v42 = vpop.permute.xlu0 %3609  ;;  %1517 = vmatmul.bf16.gmra.mxu0 %v1307_v0 }
  0xe4   : > { %v3600_v34 = vpop.permute.xlu1 %3599  ;;  %v3612_v63 = vunpack.i.h.bf16 %v3610_v42  ;;  %v3611_v17 = vunpack.i.l.bf16 %v3610_v42 }
  0xe5   : > { %v3602_v57 = vunpack.i.h.bf16 %v3600_v34  ;;  %v3601_v35 = vunpack.i.l.bf16 %v3600_v34 }
  0xe6   : > { %v1209_v5 = vsel %vm1199_vm14, %v663_v9, %v3612_v63  ;;  %v1208_v38 = vsel %vm1199_vm14, %v662_v53, %v3611_v17 }
  0xe7   : > { %v1272_v23 = vsel %vm1216_vm8, %v1256_v32, %v3601_v35  ;;  %v1273_v56 = vsel %vm1216_vm8, %v1257_v18, %v3602_v57  ;;  %v3635_v18 = vpop.permute.xlu2 %3634 }
  0xe8   : > { %v1288_v47 = vsel %vm1233_vm9, %v1272_v23, %v3606_v29  ;;  %v1289_v4 = vsel %vm1233_vm9, %v1273_v56, %v3607_v30  ;;  %v3637_v9 = vunpack.i.h.bf16 %v3635_v18  ;;  %v3636_v23 = vunpack.i.l.bf16 %v3635_v18  ;;  %v5004_v17 = vpop.f32.mrf.mxu2 }
  0xe9   : > { %v1308_v61 = vpack.c.bf16 %v1289_v4, %v1288_v47  ;;  %v664_v47 = vmul.f32 %v4766_v54, %v4818_v15  ;;  %v665_v4 = vmul.f32 %v4760_v51, %v4821_v12 }
  0xeb   : > { %v3625_v49 = vpop.permute.xlu0 %3624  ;;  %1566 = vmatmul.bf16.gmra.mxu1 %v1308_v61 }
  0xec   : > { %v3615_v16 = vpop.permute.xlu1 %3614  ;;  %v3627_v32 = vunpack.i.h.bf16 %v3625_v49  ;;  %v3626_v34 = vunpack.i.l.bf16 %v3625_v49 }
  0xed   : > { %v3617_v8 = vunpack.i.h.bf16 %v3615_v16  ;;  %v3616_v0 = vunpack.i.l.bf16 %v3615_v16 }
  0xee   : > { %v1259_v7 = vsel %vm1199_vm14, %v4543_v50, %v3627_v32  ;;  %v1258_v31 = vsel %vm1199_vm14, %v4539_v19, %v3626_v34 }
  0xef   : > { %v1225_v42 = vsel %vm1216_vm8, %v1208_v38, %v3616_v0  ;;  %v1226_v44 = vsel %vm1216_vm8, %v1209_v5, %v3617_v8  ;;  %v3650_v49 = vpop.permute.xlu2 %3649 }
  0xf0   : > { %v1242_v30 = vsel %vm1233_vm9, %v1225_v42, %v3621_v41  ;;  %v1243_v29 = vsel %vm1233_vm9, %v1226_v44, %v3622_v36  ;;  %v3652_v0 = vunpack.i.h.bf16 %v3650_v49  ;;  %v3651_v51 = vunpack.i.l.bf16 %v3650_v49 }
  0xf1   : > { %v1310_v57 = vpack.c.bf16 %v1243_v29, %v1242_v30  ;;  %v5018_v30 = vpop.f32.mrf.mxu2 }
  0xf3   : > { %1522 = vmatmul.bf16.gmra.mxu0 %v1310_v57  ;;  %v3640_v35 = vpop.permute.xlu0 %3639 }
  0xf4   : > { %v3630_v53 = vpop.permute.xlu1 %3629  ;;  %v3642_v5 = vunpack.i.h.bf16 %v3640_v35  ;;  %v3641_v19 = vunpack.i.l.bf16 %v3640_v35 }
  0xf5   : > { %v3632_v56 = vunpack.i.h.bf16 %v3630_v53  ;;  %v3631_v63 = vunpack.i.l.bf16 %v3630_v53 }
  0xf6   : > { %v1211_v41 = vsel %vm1199_vm14, %v665_v4, %v3642_v5  ;;  %v1210_v54 = vsel %vm1199_vm14, %v664_v47, %v3641_v19 }
  0xf7   : > { %v1274_v61 = vsel %vm1216_vm8, %v1258_v31, %v3631_v63  ;;  %v1275_v50 = vsel %vm1216_vm8, %v1259_v7, %v3632_v56  ;;  %v3665_v31 = vpop.permute.xlu2 %3664 }
  0xf8   : > { %v1290_v38 = vsel %vm1233_vm9, %v1274_v61, %v3636_v23  ;;  %v1291_v16 = vsel %vm1233_vm9, %v1275_v50, %v3637_v9  ;;  %v3667_v63 = vunpack.i.h.bf16 %v3665_v31  ;;  %v3666_v47 = vunpack.i.l.bf16 %v3665_v31 }
  0xf9   : > { %v1311_v36 = vpack.c.bf16 %v1291_v16, %v1290_v38  ;;  %v5030_v16 = vpop.f32.mrf.mxu2 }
  0xfb   : > { %1571 = vmatmul.bf16.gmra.mxu1 %v1311_v36  ;;  %v3655_v44 = vpop.permute.xlu0 %3654 }
  0xfc   : > { %v3645_v8 = vpop.permute.xlu1 %3644  ;;  %v3657_v29 = vunpack.i.h.bf16 %v3655_v44  ;;  %v3656_v57 = vunpack.i.l.bf16 %v3655_v44 }
  0xfd   : > { %v3647_v18 = vunpack.i.h.bf16 %v3645_v8  ;;  %v3646_v42 = vunpack.i.l.bf16 %v3645_v8 }
  0xfe   : > { %v1261_v9 = vsel %vm1199_vm14, %v4145_v3, %v3657_v29  ;;  %v1260_v23 = vsel %vm1199_vm14, %v4639_v37, %v3656_v57 }
  0xff   : > { %v1227_v32 = vsel %vm1216_vm8, %v1210_v54, %v3646_v42  ;;  %v1228_v34 = vsel %vm1216_vm8, %v1211_v41, %v3647_v18  ;;  %v5043_v18 = vld [vmem:[%s330_s8] ss:$0 sm:$0xff] }
 0x100   : > { %v1244_v35 = vsel %vm1233_vm9, %v1227_v32, %v3651_v51  ;;  %v1245_v7 = vsel %vm1233_vm9, %v1228_v34, %v3652_v0 }
 0x101   : > { %v1313_v53 = vpack.c.bf16 %v1245_v7, %v1244_v35  ;;  %v5032_v3 = vpop.f32.mrf.mxu2 }
 0x103   : > { %1527 = vmatmul.bf16.gmra.mxu0 %v1313_v53 }
 0x104   : > { %v3660_v56 = vpop.permute.xlu1 %3659 }
 0x105   : > { %v3662_v4 = vunpack.i.h.bf16 %v3660_v56  ;;  %v3661_v61 = vunpack.i.l.bf16 %v3660_v56 }
 0x107   : > { %v1276_v50 = vsel %vm1216_vm8, %v1260_v23, %v3661_v61  ;;  %v1277_v49 = vsel %vm1216_vm8, %v1261_v9, %v3662_v4 }
 0x108   : > { %v1292_v5 = vsel %vm1233_vm9, %v1276_v50, %v3666_v47  ;;  %v1293_v19 = vsel %vm1233_vm9, %v1277_v49, %v3667_v63 }
 0x109   : > { %v1314_v38 = vpack.c.bf16 %v1293_v19, %v1292_v5  ;;  %v5034_v41 = vpop.f32.mrf.mxu2 }
 0x10b   : > { %1576 = vmatmul.bf16.gmra.mxu1 %v1314_v38 }
 0x111   : > { %v5036_v8 = vpop.f32.mrf.mxu2 }
 0x115   : > { %v1533_v37 = vpop.f32.mrf.mxu3 }
 0x116   : > { %v1534_v44 = vadd.f32 %v5043_v18, %v1533_v37 }
 0x119   : > { %v1631_v42 = vpop.f32.mrf.mxu2 }
 0x11d   : > { %v1535_v36 = vpop.f32.mrf.mxu3 }
 0x11e   : > { %v1536_v23 = vadd.f32 %v5043_v18, %v1535_v36 }
 0x121   : > { %v1633_v9 = vpop.f32.mrf.mxu2 }
 0x125   : > { %v1538_v54 = vpop.f32.mrf.mxu3 }
 0x128   : > { %v1503_v51 = vpop.f32.mrf.mxu0 }
 0x129   : > { %v1504_v34 = vadd.f32 %v5043_v18, %v1503_v51  ;;  %v1636_v51 = vpop.f32.mrf.mxu2 }
 0x12d   : > { %v1540_v0 = vpop.f32.mrf.mxu3 }
 0x130   : > { %v1505_v35 = vpop.f32.mrf.mxu0 }
 0x131   : > { %v1506_v63 = vadd.f32 %v5043_v18, %v1505_v35 }
 0x135   : > { %v1582_v32 = vpop.f32.mrf.mxu3 }
 0x136   : > { %v1583_v29 = vadd.f32 %v1582_v32, %v1534_v44 }
 0x137   : > { %v1552_v57 = vpop.f32.mrf.mxu1 }
 0x138   : > { %v5047_v7 = vadd.f32 %v1631_v42, %v1583_v29  ;;  %v1553_v31 = vadd.f32 %v1552_v57, %v1504_v34  ;;  %v3348_v57 = vld [vmem:[%s5065_s18 + $0x88] sm:$0xff] }
 0x139   : > { %2709 = vmatpush.bf16.msrb.mxu0 %v3348_v57 }
 0x13a   : > { %v5050_v53 = vadd.f32 %v4923_v39, %v1553_v31  ;;  %v1539_v39 = vadd.f32 %v5043_v18, %v1538_v54  ;;  %v1541_v31 = vadd.f32 %v5043_v18, %v1540_v0 }
 0x13c   : > { %v1641_v4 = vsub.f32 0.0, %v5050_v53 }
 0x13d   : > { %v1584_v56 = vpop.f32.mrf.mxu3 }
 0x13e   : > { %v1585_v47 = vadd.f32 %v1584_v56, %v1536_v23  ;;  %v1657_v38 = vmul.f32 1.442695, %v1641_v4 }
 0x13f   : > { %v1554_v61 = vpop.f32.mrf.mxu1 }
 0x140   : > { %v5055_v50 = vadd.f32 %v1633_v9, %v1585_v47  ;;  %v1555_v49 = vadd.f32 %v1554_v61, %v1506_v63  ;;  %v1508_v5 = vpop.f32.mrf.mxu0  ;;  %3911 = vpow2.f32 %v1657_v38  ;;  %v3347_v61 = vld [vmem:[%s5065_s18 + $0x80] sm:$0xff]  ;;  %v1638_v38 = vpop.f32.mrf.mxu2 }
 0x141   : > { %v1509_v36 = vadd.f32 %v5043_v18, %v1508_v5  ;;  %2710 = vmatpush.bf16.msrb.mxu0 %v3347_v61 }
 0x142   : > { %v1604_v19 = vadd.f32 %v4933_v14, %v1555_v49 }
 0x144   : > { %v1642_v37 = vsub.f32 0.0, %v1604_v19 }
 0x145   : > { %v1587_v42 = vpop.f32.mrf.mxu3 }
 0x146   : > { %v1659_v44 = vmul.f32 1.442695, %v1642_v37  ;;  %v1588_v32 = vadd.f32 %v1587_v42, %v1539_v39  ;;  %v3912_v9 = vpop.eup %3911 }
 0x147   : > { %v1689_v0 = vadd.f32 1.0, %v3912_v9 }
 0x148   : > { %3913 = vpow2.f32 %v1659_v44  ;;  %v5067_v14 = vadd.f32 %v1636_v51, %v1588_v32  ;;  %v1557_v54 = vpop.f32.mrf.mxu1  ;;  %v1510_v34 = vpop.f32.mrf.mxu0 }
 0x149   : > { %v1558_v29 = vadd.f32 %v1557_v54, %v1509_v36  ;;  %v1511_v56 = vadd.f32 %v5043_v18, %v1510_v34 }
 0x14a   : > { %v1655_v39 = vsub.f32 0.0, %v5067_v14 }
 0x14b   : > { %v5071_v35 = vadd.f32 %v4949_v11, %v1558_v29 }
 0x14c   : > { %v1685_v32 = vmul.f32 1.442695, %v1655_v39 }
 0x14d   : > { %v1643_v23 = vsub.f32 0.0, %v5071_v35  ;;  %v1589_v63 = vpop.f32.mrf.mxu3 }
 0x14e   : > { %v3914_v47 = vpop.eup %3913  ;;  %v1590_v4 = vadd.f32 %v1589_v63, %v1541_v31 }
 0x14f   : > { %v1690_v49 = vadd.f32 1.0, %v3914_v47  ;;  %v1661_v5 = vmul.f32 1.442695, %v1643_v23 }
 0x150   : > { %v1639_v37 = vadd.f32 %v1638_v38, %v1590_v4  ;;  %v1559_v11 = vpop.f32.mrf.mxu1  ;;  %v1513_v51 = vpop.f32.mrf.mxu0 }
 0x151   : > { %v1560_v36 = vadd.f32 %v1559_v11, %v1511_v56  ;;  %3915 = vpow2.f32 %v1661_v5  ;;  %v1514_v29 = vadd.f32 %v5043_v18, %v1513_v51 }
 0x152   : > { %v1656_v42 = vsub.f32 0.0, %v1639_v37  ;;  %3917 = vrcp.f32 %v1690_v49 }
 0x153   : > { %v1609_v44 = vadd.f32 %v4965_v1, %v1560_v36  ;;  %3919 = vrcp.f32 %v1689_v0 }
 0x154   : > { %v1687_v54 = vmul.f32 1.442695, %v1656_v42 }
 0x155   : > { %v1644_v34 = vsub.f32 0.0, %v1609_v44 }
 0x156   : > { %3921 = vpow2.f32 %v1687_v54 }
 0x157   : > { %v1663_v57 = vmul.f32 1.442695, %v1644_v34  ;;  %v3916_v31 = vpop.eup %3915  ;;  %3923 = vpow2.f32 %v1685_v32 }
 0x158   : > { %v1562_v23 = vpop.f32.mrf.mxu1  ;;  %v1515_v63 = vpop.f32.mrf.mxu0  ;;  %v1691_v9 = vadd.f32 1.0, %v3916_v31 }
 0x159   : > { %v3918_v47 = vpop.eup %3917  ;;  %3925 = vpow2.f32 %v1663_v57  ;;  %v1563_v56 = vadd.f32 %v1562_v23, %v1514_v29  ;;  %v1516_v39 = vadd.f32 %v5043_v18, %v1515_v63 }
 0x15a   : > { %v3920_v4 = vpop.eup %3919  ;;  %3927 = vrcp.f32 %v1691_v9  ;;  %v5083_v49 = vmul.f32 %v3918_v47, %v1604_v19 }
 0x15b   : > { %v5081_v1 = vadd.f32 %v4975_v46, %v1563_v56  ;;  %v5088_v51 = vmul.f32 %v3920_v4, %v5050_v53 }
 0x15c   : > { %v3922_v61 = vpop.eup %3921  ;;  %v1803_v46 = vrot.slane %v5083_v49, 1  ;;  %v1739_v31 = vrot.slane %v5083_v49, 7 }
 0x15d   : > { %v1704_v5 = vadd.f32 1.0, %v3922_v61  ;;  %v1645_v38 = vsub.f32 0.0, %v5081_v1  ;;  %v3924_v11 = vpop.eup %3923  ;;  %5983 = vst [vmem:[#allocation5_spill] sm:$0xff] %v5088_v51  ;;  %v1802_v57 = vrot.slane %v5088_v51, 1  ;;  %v1738_v47 = vrot.slane %v5088_v51, 7 }
 0x15e   : > { %v1703_v29 = vadd.f32 1.0, %v3924_v11 }
 0x15f   : > { %v3926_v0 = vpop.eup %3925  ;;  %3929 = vrcp.f32 %v1704_v5  ;;  %v1665_v36 = vmul.f32 1.442695, %v1645_v38  ;;  %v5101_v63 = vsel %vm702_vm0, %v1802_v57, %v1803_v46  ;;  %v5985_v38 = vld [vmem:[#allocation14_spill] sm:$0xff] }
 0x160   : > { %v1692_v42 = vadd.f32 1.0, %v3926_v0  ;;  %v1564_v32 = vpop.f32.mrf.mxu1  ;;  %v1518_v54 = vpop.f32.mrf.mxu0 }
 0x161   : > { %v3928_v34 = vpop.eup %3927  ;;  %3931 = vpow2.f32 %v1665_v36  ;;  %v1565_v19 = vadd.f32 %v1564_v32, %v1516_v39  ;;  %v1519_v4 = vadd.f32 %v5043_v18, %v1518_v54  ;;  %v1834_v39 = vmul.f32 %v5101_v63, %v5985_v38 }
 0x162   : > { %3933 = vrcp.f32 %v1692_v42  ;;  %v5094_v53 = vmul.f32 %v3928_v34, %v5071_v35  ;;  %v5110_v35 = vsel %vm637_vm1, %v1738_v47, %v1739_v31 }
 0x163   : > { %v5097_v23 = vadd.f32 %v4992_v43, %v1565_v19  ;;  %3935 = vrcp.f32 %v1703_v29  ;;  %v1881_v24 = vmul.f32 %v5110_v35, %v4389_v22 }
 0x164   : > { %5984 = vst [vmem:[#allocation21_spill] sm:$0xff] %v5094_v53  ;;  %v1804_v11 = vrot.slane %v5094_v53, 1  ;;  %v1740_v0 = vrot.slane %v5094_v53, 7 }
 0x165   : > { %v3930_v9 = vpop.eup %3929  ;;  %v1646_v56 = vsub.f32 0.0, %v5097_v23 }
 0x166   : > { %v5106_v61 = vmul.f32 %v3930_v9, %v1639_v37 }
 0x167   : > { %v3932_v43 = vpop.eup %3931  ;;  %v1667_v5 = vmul.f32 1.442695, %v1646_v56  ;;  %v1850_v56 = vmul.f32 %v5110_v35, %v4392_v28 }
 0x168   : > { %v3934_v36 = vpop.eup %3933  ;;  %v1693_v42 = vadd.f32 1.0, %v3932_v43  ;;  %v1567_v32 = vpop.f32.mrf.mxu1  ;;  %v1785_v37 = vmul.f32 0.0, %v5106_v61  ;;  %v5891_v34 = vrot.slane %v5106_v61, 1  ;;  %v5890_v19 = vrot.slane %v5106_v61, 7 }
 0x169   : > { %v1520_v54 = vpop.f32.mrf.mxu0  ;;  %v5119_v29 = vmul.f32 %v3934_v36, %v1609_v44  ;;  %3937 = vpow2.f32 %v1667_v5  ;;  %v1568_v9 = vadd.f32 %v1567_v32, %v1519_v4  ;;  %v5987_v5 = vld [vmem:[#allocation15_spill] sm:$0xff]  ;;  %v3936_v32 = vpop.eup %3935 }
 0x16a   : > { %3939 = vrcp.f32 %v1693_v42  ;;  %v3668_v27 = vpack.i.bf16 %v5088_v51, %v1785_v37  ;;  %v5129_v43 = vsel %vm702_vm0, %v5891_v34, %v1802_v57  ;;  %v5135_v44 = vsel %vm637_vm1, %v5890_v19, %v1738_v47 }
 0x16b   : > { %5986 = vst [vmem:[#allocation16_spill] sm:$0xff] %v5119_v29  ;;  %v5138_v4 = vadd.f32 %v5004_v17, %v1568_v9  ;;  %v1833_v36 = vmul.f32 %v5129_v43, %v5987_v5  ;;  %v1849_v42 = vmul.f32 %v5135_v44, %v4389_v22  ;;  %v1829_v57 = vsel %vm702_vm0, %v1803_v46, %v1804_v11 }
 0x16c   : > { %3669 = vrot.lane.b32.xlu0 %v3668_v27, %s4079_s9  ;;  %v1805_v37 = vrot.slane %v5119_v29, 1  ;;  %v5150_v47 = vsel %vm637_vm1, %v1739_v31, %v1740_v0  ;;  %v1521_v9 = vadd.f32 %v5043_v18, %v1520_v54  ;;  %v1866_v46 = vmul.f32 %v1829_v57, %v5985_v38  ;;  %v5989_v31 = vld [vmem:[#allocation13_spill] sm:$0xff] }
 0x16d   : > { %5988 = vst [vmem:[#allocation11_spill] sm:$0xff] %v5150_v47  ;;  %v1647_v17 = vsub.f32 0.0, %v5138_v4  ;;  %v3678_v5 = vpack.i.bf16 %v1834_v39, %v1833_v36  ;;  %v3688_v19 = vpack.i.bf16 %v1850_v56, %v1849_v42  ;;  %v1913_v51 = vmul.f32 %v1829_v57, %v5989_v31 }
 0x16e   : > { %v5156_v55 = vsel %vm702_vm0, %v1804_v11, %v1805_v37  ;;  %v1865_v11 = vmul.f32 %v5101_v63, %v5989_v31  ;;  %v1882_v42 = vmul.f32 %v5150_v47, %v4392_v28 }
 0x16f   : > { %v3938_v34 = vpop.eup %3937  ;;  %v1669_v27 = vmul.f32 1.442695, %v1647_v17  ;;  %3679 = vrot.lane.b32.xlu1 %v3678_v5, %s4081_s10  ;;  %3689 = vrot.lane.b32.xlu2 %v3688_v19, %s4082_s14  ;;  %v1914_v13 = vmul.f32 %v5156_v55, %v5985_v38  ;;  %v1741_v17 = vrot.slane %v5119_v29, 7  ;;  %v5173_v38 = vmul.f32 %v3936_v32, %v5067_v14 }
 0x170   : > { %v3940_v54 = vpop.eup %3939  ;;  %v1694_v39 = vadd.f32 1.0, %v3938_v34  ;;  %v1569_v56 = vpop.f32.mrf.mxu1  ;;  %v3673_v34 = vpack.i.bf16 %v1866_v46, %v1865_v11 }
 0x171   : > { %v1523_v36 = vpop.f32.mrf.mxu0  ;;  %v5170_v5 = vmul.f32 %v3940_v54, %v5081_v1  ;;  %3941 = vpow2.f32 %v1669_v27  ;;  %v1570_v19 = vadd.f32 %v1569_v56, %v1521_v9  ;;  %v2411_v26 = vpack.c.bf16 %v1914_v13, %v1913_v51 }
 0x172   : > { %3943 = vrcp.f32 %v1694_v39  ;;  %v3683_v1 = vpack.i.bf16 %v1882_v42, %v1881_v24  ;;  %v3693_v9 = vpack.i.bf16 %v5094_v53, %v5083_v49  ;;  %v1524_v14 = vadd.f32 %v5043_v18, %v1523_v36  ;;  %v5992_v24 = vld [vmem:[#allocation22_spill] sm:$0xff]  ;;  %v5993_v36 = vld [vmem:[#allocation20_spill] sm:$0xff] }
 0x173   : > { %5990 = vst [vmem:[#allocation26_spill] sm:$0xff] %v5170_v5  ;;  %v5178_v31 = vadd.f32 %v5018_v30, %v1570_v19  ;;  %3282 = vmatmul.msk.bf16.vlgmr.msrb.gmra.mxu0 %vm1199_vm14, %v2411_v26  ;;  %v5188_v51 = vsel %vm637_vm1, %v1740_v0, %v1741_v17  ;;  %v1806_v22 = vrot.slane %v5170_v5, 1  ;;  %v5901_v30 = vrot.slane %v5173_v38, 1 }
 0x174   : > { %3674 = vrot.lane.b32.xlu0 %v3673_v34, %s4079_s9  ;;  %5991 = vst [vmem:[#allocation25_spill] sm:$0xff] %v5188_v51  ;;  %v1836_v46 = vmul.f32 %v5156_v55, %v5992_v24  ;;  %v1835_v11 = vmul.f32 %v1829_v57, %v5993_v36  ;;  %v1852_v42 = vmul.f32 %v5188_v51, %v5968_v25  ;;  %v5994_v19 = vrot.slane %v5106_v61, 1 }
 0x175   : > { %v1648_v13 = vsub.f32 0.0, %v5178_v31  ;;  %v5214_v57 = vsel %vm702_vm0, %v1805_v37, %v1806_v22  ;;  %v1851_v27 = vmul.f32 %v5150_v47, %v4475_v10  ;;  %v1742_v53 = vrot.slane %v5170_v5, 7 }
 0x176   : > { %v5206_v34 = vsel %vm702_vm0, %v5901_v30, %v5994_v19  ;;  %v5221_v19 = vmul.f32 %v5129_v43, %v4275_v59  ;;  %v5229_v37 = vmul.f32 %v5101_v63, %v4865_v58 }
 0x177   : > { %v3942_v32 = vpop.eup %3941  ;;  %v1671_v26 = vmul.f32 1.442695, %v1648_v13  ;;  %3684 = vrot.lane.b32.xlu1 %v3683_v1, %s4081_s10  ;;  %3694 = vrot.lane.b32.xlu2 %v3693_v9, %s4082_s14 }
 0x178   : > { %v3944_v54 = vpop.eup %3943  ;;  %v1695_v39 = vadd.f32 1.0, %v3942_v32  ;;  %v1572_v0 = vpop.f32.mrf.mxu1  ;;  %v3345_v32 = vld [vmem:[%s5065_s18 + $0x70] sm:$0xff] }
 0x179   : > { %v1525_v56 = vpop.f32.mrf.mxu0  ;;  %v5209_v1 = vmul.f32 %v3944_v54, %v5097_v23  ;;  %3945 = vpow2.f32 %v1671_v26  ;;  %v1573_v13 = vadd.f32 %v1572_v0, %v1524_v14  ;;  %v3703_v26 = vpack.i.bf16 %v1836_v46, %v1835_v11  ;;  %2655 = vmatpush.bf16.msrb.mxu2 %v3345_v32 }
 0x17a   : > { %3947 = vrcp.f32 %v1695_v39  ;;  %v3708_v54 = vpack.i.bf16 %v1852_v42, %v1851_v27  ;;  %v1868_v39 = vmul.f32 %v5214_v57, %v5992_v24  ;;  %v5236_v0 = vmul.f32 %v5206_v34, %v4275_v59 }
 0x17b   : > { %v5224_v23 = vadd.f32 %v5030_v16, %v1573_v13  ;;  %v5902_v14 = vrot.slane %v5209_v1, 1  ;;  %v5240_v16 = vmul.f32 %v5129_v43, %v4278_v60  ;;  %v1526_v11 = vadd.f32 %v5043_v18, %v1525_v56 }
 0x17c   : > { %3699 = vrot.lane.b32.xlu0 %v3693_v9, %s4079_s9  ;;  %v1915_v9 = vmul.f32 %v5214_v57, %v5993_v36  ;;  %v5258_v27 = vsel %vm637_vm1, %v1741_v17, %v1742_v53  ;;  %v5996_v13 = vrot.slane %v5106_v61, 7  ;;  %v5997_v32 = vrot.slane %v5173_v38, 7 }
 0x17d   : > { %v1649_v46 = vsub.f32 0.0, %v5224_v23  ;;  %v5248_v58 = vsel %vm702_vm0, %v1806_v22, %v5902_v14  ;;  %5995 = vst [vmem:[#allocation19_spill] sm:$0xff] %v5258_v27  ;;  %v1867_v22 = vmul.f32 %v5156_v55, %v5993_v36  ;;  %v1884_v55 = vmul.f32 %v5258_v27, %v5968_v25  ;;  %v3342_v25 = vld [vmem:[%s5065_s18 + $0x58] sm:$0xff] }
 0x17e   : > { %v1916_v43 = vmul.f32 %v5248_v58, %v5992_v24  ;;  %v5270_v24 = vsel %vm637_vm1, %v5997_v32, %v5996_v13  ;;  %v1743_v36 = vrot.slane %v5209_v1, 7  ;;  %v5998_v32 = vld [vmem:[#allocation17_spill] sm:$0xff] }
 0x17f   : > { %v3946_v56 = vpop.eup %3945  ;;  %v1673_v42 = vmul.f32 1.442695, %v1649_v46  ;;  %3704 = vrot.lane.b32.xlu1 %v3703_v26, %s4081_s10  ;;  %3709 = vrot.lane.b32.xlu2 %v3708_v54, %s4082_s14  ;;  %v3713_v47 = vpack.i.bf16 %v1868_v39, %v1867_v22  ;;  %v5279_v13 = vmul.f32 %v5270_v24, %v4297_v2  ;;  %v5283_v17 = vmul.f32 %v5135_v44, %v5998_v32 }
 0x180   : > { %v3948_v63 = vpop.eup %3947  ;;  %v1696_v46 = vadd.f32 1.0, %v3946_v56  ;;  %v1574_v30 = vpop.f32.mrf.mxu1  ;;  %v2414_v26 = vpack.c.bf16 %v1916_v43, %v1915_v9  ;;  %v1883_v39 = vmul.f32 %v5188_v51, %v4475_v10 }
 0x181   : > { %v1528_v14 = vpop.f32.mrf.mxu0  ;;  %3949 = vpow2.f32 %v1673_v42  ;;  %v1575_v54 = vadd.f32 %v1574_v30, %v1526_v11  ;;  %v5286_v9 = vmul.f32 %v3948_v63, %v5138_v4  ;;  %v5303_v4 = vsel %vm637_vm1, %v1742_v53, %v1743_v36  ;;  %v6001_v11 = vld [vmem:[#allocation27_spill] sm:$0xff] }
 0x182   : > { %3951 = vrcp.f32 %v1696_v46  ;;  %v1529_v56 = vadd.f32 %v5043_v18, %v1528_v14  ;;  %v3718_v42 = vpack.i.bf16 %v1884_v55, %v1883_v39  ;;  %v1854_v39 = vmul.f32 %v5303_v4, %v4573_v45 }
 0x183   : > { %5999 = vst [vmem:[#allocation18_spill] sm:$0xff] %v5286_v9  ;;  %v5289_v30 = vadd.f32 %v5032_v3, %v1575_v54  ;;  %3283 = vmatmul.msk.bf16.gmra.mxu0 %vm1199_vm14, %v2414_v26  ;;  %v3723_v3 = vpack.i.bf16 %v5170_v5, %v5119_v29  ;;  %v6000_v54 = vld [vmem:[#allocation28_spill] sm:$0xff]  ;;  %v1837_v5 = vmul.f32 %v5214_v57, %v6001_v11  ;;  %v3343_v57 = vld [vmem:[%s5065_s18 + $0x60] sm:$0xff] }
 0x184   : > { %3714 = vrot.lane.b32.xlu0 %v3713_v47, %s4079_s9  ;;  %v1808_v47 = vrot.slane %v5286_v9, 1  ;;  %v1838_v55 = vmul.f32 %v5248_v58, %v6000_v54 }
 0x185   : > { %v1650_v43 = vsub.f32 0.0, %v5289_v30 }
 0x187   : > { %v3950_v63 = vpop.eup %3949  ;;  %v1675_v22 = vmul.f32 1.442695, %v1650_v43  ;;  %3719 = vrot.lane.b32.xlu1 %v3718_v42, %s4081_s10  ;;  %3724 = vrot.lane.b32.xlu2 %v3723_v3, %s4082_s14  ;;  %v3344_v43 = vld [vmem:[%s5065_s18 + $0x68] sm:$0xff] }
 0x188   : > { %v3952_v46 = vpop.eup %3951  ;;  %v1697_v26 = vadd.f32 1.0, %v3950_v63  ;;  %v1577_v14 = vpop.f32.mrf.mxu1  ;;  %v1744_v63 = vrot.slane %v5286_v9, 7  ;;  %2656 = vmatpush.bf16.msrb.mxu2 %v3344_v43 }
 0x189   : > { %v5311_v32 = vmul.f32 %v3952_v46, %v5178_v31  ;;  %3953 = vpow2.f32 %v1675_v22  ;;  %v1578_v53 = vadd.f32 %v1577_v14, %v1529_v56  ;;  %v1530_v42 = vpop.f32.mrf.mxu0  ;;  %v1853_v31 = vmul.f32 %v5258_v27, %v4568_v20 }
 0x18a   : > { %3955 = vrcp.f32 %v1697_v26  ;;  %v6002_v22 = vrot.slane %v5209_v1, 1  ;;  %v3733_v26 = vpack.i.bf16 %v1838_v55, %v1837_v5  ;;  %v5343_v5 = vsel %vm637_vm1, %v1743_v36, %v1744_v63 }
 0x18b   : > { %v5320_v51 = vadd.f32 %v5034_v41, %v1578_v53  ;;  %v1809_v56 = vrot.slane %v5311_v32, 1  ;;  %v1531_v41 = vadd.f32 %v5043_v18, %v1530_v42  ;;  %v3738_v53 = vpack.i.bf16 %v1854_v39, %v1853_v31 }
 0x18c   : > { %v1825_v46 = vsel %vm702_vm0, %v6002_v22, %v1808_v47  ;;  %3729 = vrot.lane.b32.xlu0 %v3723_v3, %s4079_s9  ;;  %v1869_v31 = vmul.f32 %v5248_v58, %v6001_v11  ;;  %2657 = vmatpush.bf16.msrb.mxu2 %v3343_v57  ;;  %v1886_v36 = vmul.f32 %v5343_v5, %v4573_v45  ;;  %v1653_v58 = vsub.f32 0.0, %v5047_v7 }
 0x18d   : > { %v1651_v14 = vsub.f32 0.0, %v5320_v51  ;;  %v5335_v43 = vsel %vm702_vm0, %v1808_v47, %v1809_v56  ;;  %v1917_v27 = vmul.f32 %v1825_v46, %v6001_v11  ;;  %v1870_v22 = vmul.f32 %v1825_v46, %v6000_v54 }
 0x18e   : > { %v1918_v29 = vmul.f32 %v5335_v43, %v6000_v54 }
 0x18f   : > { %v3954_v3 = vpop.eup %3953  ;;  %v1677_v55 = vmul.f32 1.442695, %v1651_v14  ;;  %3734 = vrot.lane.b32.xlu1 %v3733_v26, %s4081_s10  ;;  %3739 = vrot.lane.b32.xlu2 %v3738_v53, %s4082_s14  ;;  %v3743_v14 = vpack.i.bf16 %v1870_v22, %v1869_v31  ;;  %v1745_v26 = vrot.slane %v5311_v32, 7  ;;  %v6003_v31 = vld [vmem:[#allocation29_spill] sm:$0xff] }
 0x190   : > { %v3956_v18 = vpop.eup %3955  ;;  %v1698_v47 = vadd.f32 1.0, %v3954_v3  ;;  %v1579_v39 = vpop.f32.mrf.mxu1  ;;  %v2417_v42 = vpack.c.bf16 %v1918_v29, %v1917_v27  ;;  %v1885_v29 = vmul.f32 %v5303_v4, %v4568_v20  ;;  %v1654_v27 = vsub.f32 0.0, %v5055_v50  ;;  %2658 = vmatpush.bf16.msrb.mxu2 %v3342_v25 }
 0x191   : > { %3957 = vpow2.f32 %v1677_v55  ;;  %v1580_v54 = vadd.f32 %v1579_v39, %v1531_v41  ;;  %v5354_v53 = vmul.f32 %v3956_v18, %v5224_v23  ;;  %v3753_v23 = vpack.i.bf16 %v5286_v9, %v5209_v1 }
 0x192   : > { %3959 = vrcp.f32 %v1698_v47  ;;  %v3748_v57 = vpack.i.bf16 %v1886_v36, %v1885_v29  ;;  %v1681_v25 = vmul.f32 1.442695, %v1653_v58  ;;  %v1683_v47 = vmul.f32 1.442695, %v1654_v27 }
 0x193   : > { %v5357_v3 = vadd.f32 %v5036_v8, %v1580_v54  ;;  %3284 = vmatmul.msk.bf16.gmra.mxu0 %vm1199_vm14, %v2417_v42  ;;  %v5370_v8 = vsel %vm637_vm1, %v1744_v63, %v1745_v26  ;;  %v1810_v55 = vrot.slane %v5354_v53, 1  ;;  %v1840_v63 = vmul.f32 %v5335_v43, %v6003_v31 }
 0x194   : > { %3744 = vrot.lane.b32.xlu0 %v3743_v14, %s4079_s9  ;;  %v1856_v54 = vmul.f32 %v5370_v8, %v5978_v33  ;;  %v1746_v36 = vrot.slane %v5354_v53, 7  ;;  %v6004_v14 = vld [vmem:[#allocation33_spill] sm:$0xff]  ;;  %v1855_v58 = vmul.f32 %v5343_v5, %v5976_v48 }
 0x195   : > { %v1652_v11 = vsub.f32 0.0, %v5357_v3  ;;  %v1839_v29 = vmul.f32 %v1825_v46, %v6004_v14 }
 0x197   : > { %v3958_v41 = vpop.eup %3957  ;;  %v1679_v22 = vmul.f32 1.442695, %v1652_v11  ;;  %3749 = vrot.lane.b32.xlu1 %v3748_v57, %s4081_s10  ;;  %3754 = vrot.lane.b32.xlu2 %v3753_v23, %s4082_s14  ;;  %v3763_v11 = vpack.i.bf16 %v1840_v63, %v1839_v29  ;;  %v3768_v57 = vpack.i.bf16 %v1856_v54, %v1855_v58  ;;  %v1871_v54 = vmul.f32 %v5335_v43, %v6004_v14  ;;  %v6006_v29 = vld [vmem:[#allocation36_spill] sm:$0xff] }
 0x198   : > { %v3960_v18 = vpop.eup %3959  ;;  %v1699_v39 = vadd.f32 1.0, %v3958_v41  ;;  %v1887_v43 = vmul.f32 %v5370_v8, %v5976_v48 }
 0x199   : > { %v5376_v42 = vmul.f32 %v3960_v18, %v5289_v30  ;;  %3961 = vpow2.f32 %v1679_v22  ;;  %v1823_v30 = vsel %vm702_vm0, %v1809_v56, %v1810_v55  ;;  %v6005_v22 = vld [vmem:[#allocation32_spill] sm:$0xff]  ;;  %v5400_v56 = vsel %vm637_vm1, %v1745_v26, %v1746_v36 }
 0x19a   : > { %3963 = vrcp.f32 %v1699_v39  ;;  %v1919_v46 = vmul.f32 %v1823_v30, %v6004_v14  ;;  %v1872_v39 = vmul.f32 %v1823_v30, %v6003_v31  ;;  %v1888_v58 = vmul.f32 %v5400_v56, %v6006_v29 }
 0x19b   : > { %v1811_v27 = vrot.slane %v5376_v42, 1  ;;  %3965 = vpow2.f32 %v1681_v25  ;;  %v1904_v31 = vmul.f32 0.0, %v5354_v53 }
 0x19c   : > { %3759 = vrot.lane.b32.xlu0 %v3753_v23, %s4079_s9  ;;  %3967 = vpow2.f32 %v1683_v47  ;;  %v3341_v23 = vld [vmem:[%s5065_s18 + $0x50] sm:$0xff] }
 0x19d   : > { %v5392_v41 = vsel %vm702_vm0, %v1810_v55, %v1811_v27  ;;  %2659 = vmatpush.bf16.msrb.mxu2 %v3341_v23  ;;  %v3338_v23 = vld [vmem:[%s5065_s18 + $0x38] sm:$0xff] }
 0x19e   : > { %v1920_v18 = vmul.f32 %v5392_v41, %v6005_v22  ;;  %v3778_v22 = vpack.i.bf16 %v1872_v39, %v1871_v54  ;;  %v6007_v54 = vld [vmem:[#allocation39_spill] sm:$0xff]  ;;  %2605 = vmatpush.bf16.msra.mxu3 %v3338_v23  ;;  %v6009_v23 = vld [vmem:[#allocation38_spill] sm:$0xff] }
 0x19f   : > { %v3962_v25 = vpop.eup %3961  ;;  %3764 = vrot.lane.b32.xlu1 %v3763_v11, %s4081_s10  ;;  %3769 = vrot.lane.b32.xlu2 %v3768_v57, %s4082_s14  ;;  %v1747_v11 = vrot.slane %v5376_v42, 7  ;;  %v1842_v29 = vmul.f32 %v5392_v41, %v6007_v54 }
 0x1a0   : > { %v3964_v47 = vpop.eup %3963  ;;  %v1700_v55 = vadd.f32 1.0, %v3962_v25  ;;  %v2420_v63 = vpack.c.bf16 %v1920_v18, %v1919_v46  ;;  %v3788_v46 = vpack.i.bf16 %v1888_v58, %v1887_v43  ;;  %v3773_v18 = vpack.i.bf16 %v1904_v31, %v5311_v32 }
 0x1a1   : > { %v3966_v26 = vpop.eup %3965  ;;  %v5412_v9 = vmul.f32 %v3964_v47, %v5320_v51  ;;  %v5421_v39 = vsel %vm637_vm1, %v1746_v36, %v1747_v11 }
 0x1a2   : > { %3969 = vrcp.f32 %v1700_v55  ;;  %v3968_v57 = vpop.eup %3967  ;;  %v1701_v14 = vadd.f32 1.0, %v3966_v26  ;;  %v1793_v55 = vmul.f32 0.0, %v5311_v32  ;;  %v1858_v36 = vmul.f32 %v5421_v39, %v4755_v62  ;;  %v6008_v26 = vld [vmem:[#allocation40_spill] sm:$0xff] }
 0x1a3   : > { %3285 = vmatmul.msk.bf16.gmra.mxu0 %vm1199_vm14, %v2420_v63  ;;  %v1702_v25 = vadd.f32 1.0, %v3968_v57  ;;  %v1812_v51 = vrot.slane %v5412_v9, 1  ;;  %v1748_v31 = vrot.slane %v5412_v9, 7  ;;  %v1857_v57 = vmul.f32 %v5400_v56, %v4751_v52 }
 0x1a4   : > { %3779 = vrot.lane.b32.xlu0 %v3778_v22, %s4079_s9  ;;  %3971 = vrcp.f32 %v1701_v14  ;;  %v3783_v58 = vpack.i.bf16 %v5354_v53, %v1793_v55  ;;  %v1841_v22 = vmul.f32 %v1823_v30, %v6008_v26  ;;  %v3337_v14 = vld [vmem:[%s5065_s18 + $0x30] sm:$0xff] }
 0x1a5   : > { %3973 = vrcp.f32 %v1702_v25  ;;  %v1821_v43 = vsel %vm702_vm0, %v1811_v27, %v1812_v51  ;;  %v5452_v26 = vsel %vm637_vm1, %v1747_v11, %v1748_v31  ;;  %2606 = vmatpush.bf16.msra.mxu3 %v3337_v14  ;;  %v1889_v14 = vmul.f32 %v5421_v39, %v4751_v52  ;;  %v3334_v52 = vld [vmem:[%s5065_s18 + $0x18] sm:$0xff] }
 0x1a6   : > { %v1921_v30 = vmul.f32 %v1821_v43, %v6009_v23  ;;  %v1874_v55 = vmul.f32 %v1821_v43, %v6007_v54 }
 0x1a7   : > { %3789 = vrot.lane.b32.xlu1 %v3788_v46, %s4081_s10  ;;  %3774 = vrot.lane.b32.xlu2 %v3773_v18, %s4082_s14  ;;  %v3793_v46 = vpack.i.bf16 %v1842_v29, %v1841_v22  ;;  %v3798_v18 = vpack.i.bf16 %v1858_v36, %v1857_v57  ;;  %v3340_v29 = vld [vmem:[%s5065_s18 + $0x48] sm:$0xff]  ;;  %v1873_v22 = vmul.f32 %v5392_v41, %v6009_v23  ;;  %v3335_v41 = vld [vmem:[%s5065_s18 + $0x20] sm:$0xff] }
 0x1a8   : > { %v3970_v47 = vpop.eup %3969  ;;  %v3336_v36 = vld [vmem:[%s5065_s18 + $0x28] sm:$0xff]  ;;  %2660 = vmatpush.bf16.msrb.mxu2 %v3340_v29  ;;  %v1843_v29 = vmul.f32 %v1821_v43, %v4770_v40 }
 0x1a9   : > { %v5429_v63 = vmul.f32 %v3970_v47, %v5357_v3  ;;  %v3808_v11 = vpack.i.bf16 %v1874_v55, %v1873_v22  ;;  %2607 = vmatpush.bf16.msra.mxu3 %v3336_v36  ;;  %v1859_v36 = vmul.f32 %v5452_v26, %v4818_v15  ;;  %v3333_v22 = vld [vmem:[%s5065_s18 + $0x10] sm:$0xff] }
 0x1aa   : > { %v3972_v27 = vpop.eup %3971 }
 0x1ab   : > { %v1813_v3 = vrot.slane %v5429_v63, 1  ;;  %v1749_v57 = vrot.slane %v5429_v63, 7 }
 0x1ac   : > { %3784 = vrot.lane.b32.xlu0 %v3783_v58, %s4079_s9 }
 0x1ad   : > { %v1820_v25 = vsel %vm702_vm0, %v1812_v51, %v1813_v3  ;;  %v3974_v51 = vpop.eup %3973  ;;  %2608 = vmatpush.bf16.msra.mxu3 %v3335_v41 }
 0x1ae   : > { %v1922_v47 = vmul.f32 %v1820_v25, %v6007_v54  ;;  %v1890_v54 = vmul.f32 %v5452_v26, %v4755_v62  ;;  %v1844_v55 = vmul.f32 %v1820_v25, %v4773_v21 }
 0x1af   : > { %3794 = vrot.lane.b32.xlu1 %v3793_v46, %s4081_s10  ;;  %3799 = vrot.lane.b32.xlu2 %v3798_v18, %s4082_s14  ;;  %v5467_v46 = vmul.f32 %v3972_v27, %v5047_v7  ;;  %v5470_v18 = vmul.f32 %v3974_v51, %v5055_v50 }
 0x1b0   : > { %v2423_v58 = vpack.c.bf16 %v1922_v47, %v1921_v30  ;;  %v3818_v23 = vpack.i.bf16 %v1890_v54, %v1889_v14  ;;  %v3803_v30 = vpack.i.bf16 %v5412_v9, %v5376_v42  ;;  %v5478_v47 = vsel %vm637_vm1, %v1748_v31, %v1749_v57 }
 0x1b1   : > { %v1814_v7 = vrot.slane %v5467_v46, 1  ;;  %v1815_v50 = vrot.slane %v5470_v18, 1  ;;  %v1860_v27 = vmul.f32 %v5478_v47, %v4821_v12  ;;  %2609 = vmatpush.bf16.msra.mxu3 %v3334_v52  ;;  %v3823_v54 = vpack.i.bf16 %v1844_v55, %v1843_v29 }
 0x1b2   : > { %v1875_v14 = vmul.f32 %v1820_v25, %v4770_v40  ;;  %v1891_v52 = vmul.f32 %v5478_v47, %v4818_v15  ;;  %v3339_v25 = vld [vmem:[%s5065_s18 + $0x40] sm:$0xff]  ;;  %v3833_v29 = vpack.i.bf16 %v5467_v46, %v5429_v63 }
 0x1b3   : > { %3286 = vmatmul.msk.bf16.gmra.mxu0 %vm1199_vm14, %v2423_v58  ;;  %v1819_v31 = vsel %vm702_vm0, %v1813_v3, %v1814_v7  ;;  %v1818_v51 = vsel %vm702_vm0, %v1814_v7, %v1815_v50  ;;  %v1750_v58 = vrot.slane %v5467_v46, 7  ;;  %v3332_v7 = vld [vmem:[%s5065_s18 + $0x8] sm:$0xff]  ;;  %2661 = vmatpush.bf16.msrb.mxu2 %v3339_v25 }
 0x1b4   : > { %3809 = vrot.lane.b32.xlu0 %v3808_v11, %s4079_s9  ;;  %v3828_v11 = vpack.i.bf16 %v1860_v27, %v1859_v36  ;;  %v1923_v3 = vmul.f32 %v1819_v31, %v4770_v40  ;;  %v1876_v43 = vmul.f32 %v1819_v31, %v4773_v21  ;;  %v3331_v27 = vld [vmem:[%s5065_s18] sm:$0xff] }
 0x1b5   : > { %v5503_v41 = vsel %vm637_vm1, %v1749_v57, %v1750_v58  ;;  %2610 = vmatpush.bf16.msra.mxu3 %v3333_v22  ;;  %v1751_v57 = vrot.slane %v5470_v18, 7 }
 0x1b6   : > { %v1892_v40 = vmul.f32 %v5503_v41, %v4821_v12  ;;  %v3838_v55 = vpack.i.bf16 %v1876_v43, %v1875_v14  ;;  %v6012_v43 = vld [vmem:[#allocation7_spill] sm:$0xff] }
 0x1b7   : > { %3819 = vrot.lane.b32.xlu1 %v3818_v23, %s4081_s10  ;;  %3804 = vrot.lane.b32.xlu2 %v3803_v30, %s4082_s14  ;;  %v1924_v23 = vmul.f32 %v1818_v51, %v4773_v21  ;;  %v5524_v36 = vsel %vm637_vm1, %v1750_v58, %v1751_v57 }
 0x1b8   : > { %v3853_v21 = vpack.i.bf16 %v1892_v40, %v1891_v52  ;;  %v6014_v40 = vrot.slane %v5173_v38, 1 }
 0x1b9   : > { %2611 = vmatpush.bf16.msra.mxu3 %v3332_v7 }
 0x1ba   : > { %v1817_v25 = vsel %vm702_vm0, %v1815_v50, %v6014_v40  ;;  %v6016_v40 = vld [vmem:[#allocation12_spill] sm:$0xff] }
 0x1bc   : > { %3814 = vrot.lane.b32.xlu0 %v3803_v30, %s4079_s9  ;;  %v2426_v30 = vpack.c.bf16 %v1924_v23, %v1923_v3  ;;  %v6011_v3 = vld [vmem:[#allocation8_spill] sm:$0xff]  ;;  %v1846_v23 = vmul.f32 %v1818_v51, %v6012_v43 }
 0x1bd   : > { %2612 = vmatpush.bf16.msra.mxu3 %v3331_v27  ;;  %v1861_v14 = vmul.f32 %v5503_v41, %v6011_v3  ;;  %v6015_v27 = vrot.slane %v5173_v38, 7  ;;  %v1893_v6 = vmul.f32 %v5524_v36, %v6011_v3 }
 0x1bf   : > { %3824 = vrot.lane.b32.xlu1 %v3823_v54, %s4081_s10  ;;  %3829 = vrot.lane.b32.xlu2 %v3828_v11, %s4082_s14  ;;  %v6010_v54 = vld [vmem:[#allocation6_spill] sm:$0xff] }
 0x1c0   : > { %v1845_v11 = vmul.f32 %v1819_v31, %v6010_v54  ;;  %v1926_v31 = vmul.f32 %v5206_v34, %v6012_v43  ;;  %v1925_v50 = vmul.f32 %v1817_v25, %v6010_v54 }
 0x1c2   : > { %v3858_v58 = vpack.i.bf16 %v1846_v23, %v1845_v11  ;;  %v2429_v11 = vpack.c.bf16 %v1926_v31, %v1925_v50 }
 0x1c3   : > { %3287 = vmatmul.msk.bf16.gmra.mxu0 %vm1199_vm14, %v2426_v30  ;;  %v6013_v30 = vld [vmem:[#allocation9_spill] sm:$0xff] }
 0x1c4   : > { %3839 = vrot.lane.b32.xlu0 %v3838_v55, %s4079_s9  ;;  %v1862_v52 = vmul.f32 %v5524_v36, %v6013_v30  ;;  %v1878_v55 = vmul.f32 %v1817_v25, %v6012_v43 }
 0x1c6   : > { %v3868_v7 = vpack.i.bf16 %v1862_v52, %v1861_v14  ;;  %v3873_v52 = vpack.i.bf16 %v5173_v38, %v5470_v18 }
 0x1c7   : > { %3854 = vrot.lane.b32.xlu1 %v3853_v21, %s4081_s10  ;;  %3834 = vrot.lane.b32.xlu2 %v3833_v29, %s4082_s14  ;;  %v5544_v21 = vsel %vm637_vm1, %v1751_v57, %v6015_v27 }
 0x1c8   : > { %v1894_v23 = vmul.f32 %v5544_v21, %v6013_v30  ;;  %v1863_v31 = vmul.f32 %v5544_v21, %v4297_v2 }
 0x1c9   : > { %v3690_v22 = vpop.permute.xlu2 %3689 }
 0x1ca   : > { %v3863_v57 = vpack.i.bf16 %v1894_v23, %v1893_v6 }
 0x1cc   : > { %3844 = vrot.lane.b32.xlu0 %v3833_v29, %s4079_s9  ;;  %v1877_v29 = vmul.f32 %v1818_v51, %v6010_v54  ;;  %v1848_v54 = vmul.f32 %v5206_v34, %v4278_v60  ;;  %v1770_v60 = vmul.f32 %v5135_v44, %v4392_v28  ;;  %v6017_v34 = vld [vmem:[#allocation41_spill] sm:$0xff]  ;;  %v6019_v28 = vpack.c.bf16 %v5229_v37, %v5221_v19 }
 0x1ce   : > { %v3848_v43 = vpack.i.bf16 %v1878_v55, %v1877_v29 }
 0x1cf   : > { %3859 = vrot.lane.b32.xlu1 %v3858_v58, %s4081_s10  ;;  %3869 = vrot.lane.b32.xlu2 %v3868_v7, %s4082_s14  ;;  %v1864_v58 = vmul.f32 %v5270_v24, %v6016_v40  ;;  %v1847_v7 = vmul.f32 %v1817_v25, %v4275_v59  ;;  %v1769_v59 = vmul.f32 %v5270_v24, %v6017_v34 }
 0x1d1   : > { %v3695_v14 = vpop.permute.xlu2 %3694  ;;  %v3883_v55 = vpack.i.bf16 %v1848_v54, %v1847_v7  ;;  %v3888_v27 = vpack.i.bf16 %v1864_v58, %v1863_v31  ;;  %v3692_v54 = vunpack.i.h.bf16 %v3690_v22  ;;  %v3691_v58 = vunpack.i.l.bf16 %v3690_v22 }
 0x1d3   : > { %3288 = vmatmul.msk.bf16.gmra.mxu0 %vm1199_vm14, %v2429_v11 }
 0x1d4   : > { %3849 = vrot.lane.b32.xlu0 %v3848_v43, %s4079_s9 }
 0x1d7   : > { %3864 = vrot.lane.b32.xlu1 %v3863_v57, %s4081_s10  ;;  %3874 = vrot.lane.b32.xlu2 %v3873_v52, %s4082_s14  ;;  %v6018_v57 = vld [vmem:[#allocation5_spill] sm:$0xff] }
 0x1d9   : > { %v5560_v51 = vpop.permute.xlu2 %3709 }
 0x1dc   : > { %3879 = vrot.lane.b32.xlu0 %v3873_v52, %s4079_s9  ;;  %v1912_v52 = vmul.f32 0.0, %v6018_v57 }
 0x1de   : > { %v3670_v50 = vpop.permute.xlu0 %3669  ;;  %v3903_v22 = vpack.i.bf16 %v1912_v52, %v5106_v61 }
 0x1df   : > { %v3672_v29 = vunpack.i.h.bf16 %v3670_v50  ;;  %v3671_v11 = vunpack.i.l.bf16 %v3670_v50  ;;  %3884 = vrot.lane.b32.xlu1 %v3883_v55, %s4081_s10  ;;  %3889 = vrot.lane.b32.xlu2 %v3888_v27, %s4082_s14  ;;  %v6020_v55 = vpack.i.bf16 %v5240_v16, %v5236_v0 }
 0x1e1   : > { %v3680_v25 = vpop.permute.xlu1 %3679  ;;  %v5576_v23 = vpop.permute.xlu2 %3724  ;;  %v2313_v7 = vsel %vm1199_vm14, %v1769_v59, %v3671_v11  ;;  %v2314_v31 = vsel %vm1199_vm14, %v1770_v60, %v3672_v29  ;;  %v6021_v60 = vpack.i.bf16 %v5283_v17, %v5279_v13 }
 0x1e2   : > { %v3682_v43 = vunpack.i.h.bf16 %v3680_v25  ;;  %v3681_v6 = vunpack.i.l.bf16 %v3680_v25  ;;  %v3697_v25 = vunpack.i.h.bf16 %v3695_v14 }
 0x1e3   : > { %3289 = vmatmul.msk.bf16.gmra.mxu0 %vm1199_vm14, %v6019_v28 }
 0x1e4   : > { %v2329_v44 = vsel %vm1216_vm8, %v2313_v7, %v3681_v6  ;;  %v2330_v24 = vsel %vm1216_vm8, %v2314_v31, %v3682_v43  ;;  %3894 = vrot.lane.b32.xlu0 %v6020_v55, %s4079_s9  ;;  %v3696_v43 = vunpack.i.l.bf16 %v3695_v14  ;;  %v1771_v14 = vmul.f32 %v5110_v35, %v4475_v10 }
 0x1e5   : > { %v2345_v27 = vsel %vm1233_vm9, %v2329_v44, %v3691_v58  ;;  %v2346_v50 = vsel %vm1233_vm9, %v2330_v24, %v3692_v54  ;;  %v6023_v24 = vld [vmem:[#allocation11_spill] sm:$0xff] }
 0x1e6   : > { %v3675_v29 = vpop.permute.xlu0 %3674  ;;  %v2409_v11 = vpack.c.bf16 %v2346_v50, %v2345_v27  ;;  %v3712_v50 = vunpack.i.h.bf16 %v5560_v51 }
 0x1e7   : > { %v3677_v19 = vunpack.i.h.bf16 %v3675_v29  ;;  %v3676_v37 = vunpack.i.l.bf16 %v3675_v29  ;;  %3899 = vrot.lane.b32.xlu1 %v6021_v60, %s4081_s10  ;;  %3904 = vrot.lane.b32.xlu2 %v3903_v22, %s4082_s14  ;;  %v3711_v29 = vunpack.i.l.bf16 %v5560_v51  ;;  %s3312_s10 = sshll.u32 %s4232_s11, 4 }
 0x1e8   : > { %2613 = vmatmul.bf16.vlgmr.msra.gmra.mxu3 %v2409_v11  ;;  %s5669_s21 = scalar_lea.vmem %s5827_s5, %s3312_s10 }
 0x1e9   : > { %v3685_v0 = vpop.permute.xlu1 %3684  ;;  %v5603_v59 = vpop.permute.xlu2 %3739  ;;  %v2362_v6 = vsel %vm1199_vm14, %v5083_v49, %v3677_v19  ;;  %v2361_v17 = vsel %vm1199_vm14, %v6018_v57, %v3676_v37  ;;  %v6022_v49 = vld [vmem:[#allocation24_spill] sm:$0xff] }
 0x1ea   : > { %v3687_v16 = vunpack.i.h.bf16 %v3685_v0  ;;  %v3686_v34 = vunpack.i.l.bf16 %v3685_v0  ;;  %v1772_v55 = vmul.f32 %v6023_v24, %v6022_v49 }
 0x1ec   : > { %v2378_v13 = vsel %vm1216_vm8, %v2362_v6, %v3687_v16  ;;  %v2377_v52 = vsel %vm1216_vm8, %v2361_v17, %v3686_v34 }
 0x1ed   : > { %v2393_v54 = vsel %vm1233_vm9, %v2377_v52, %v3696_v43  ;;  %v2394_v58 = vsel %vm1233_vm9, %v2378_v13, %v3697_v25  ;;  %v3727_v13 = vunpack.i.h.bf16 %v5576_v23  ;;  %v3726_v52 = vunpack.i.l.bf16 %v5576_v23  ;;  %v6026_v23 = vld [vmem:[#allocation25_spill] sm:$0xff] }
 0x1ee   : > { %v3700_v7 = vpop.permute.xlu0 %3699  ;;  %v2410_v31 = vpack.c.bf16 %v2394_v58, %v2393_v54  ;;  %v6024_v54 = vld [vmem:[#allocation16_spill] sm:$0xff] }
 0x1ef   : > { %v3702_v28 = vunpack.i.h.bf16 %v3700_v7  ;;  %v3701_v44 = vunpack.i.l.bf16 %v3700_v7  ;;  %v6025_v7 = vld [vmem:[#allocation21_spill] sm:$0xff] }
 0x1f0   : > { %2662 = vmatmul.bf16.vlgmr.msrb.gmra.mxu2 %v2410_v31 }
 0x1f1   : > { %v3705_v57 = vpop.permute.xlu1 %3704  ;;  %v2316_v11 = vsel %vm1199_vm14, %v1772_v55, %v3702_v28  ;;  %v2315_v19 = vsel %vm1199_vm14, %v1771_v14, %v3701_v44  ;;  %v3755_v37 = vpop.permute.xlu2 %3754 }
 0x1f2   : > { %v3707_v22 = vunpack.i.h.bf16 %v3705_v57  ;;  %v3706_v27 = vunpack.i.l.bf16 %v3705_v57 }
 0x1f4   : > { %v2331_v60 = vsel %vm1216_vm8, %v2315_v19, %v3706_v27  ;;  %v2332_v0 = vsel %vm1216_vm8, %v2316_v11, %v3707_v22 }
 0x1f5   : > { %v2347_v10 = vsel %vm1233_vm9, %v2331_v60, %v3711_v29  ;;  %v2348_v35 = vsel %vm1233_vm9, %v2332_v0, %v3712_v50  ;;  %v1773_v50 = vmul.f32 %v6026_v23, %v4568_v20  ;;  %v6027_v29 = vld [vmem:[#allocation19_spill] sm:$0xff] }
 0x1f6   : > { %v3715_v16 = vpop.permute.xlu0 %3714  ;;  %v2412_v34 = vpack.c.bf16 %v2348_v35, %v2347_v10  ;;  %v1774_v11 = vmul.f32 %v6027_v29, %v4573_v45  ;;  %v3742_v10 = vunpack.i.h.bf16 %v5603_v59  ;;  %v3741_v35 = vunpack.i.l.bf16 %v5603_v59 }
 0x1f7   : > { %v3717_v25 = vunpack.i.h.bf16 %v3715_v16  ;;  %v3716_v43 = vunpack.i.l.bf16 %v3715_v16 }
 0x1f8   : > { %2618 = vmatmul.bf16.gmra.mxu3 %v2412_v34 }
 0x1f9   : > { %v3720_v6 = vpop.permute.xlu1 %3719  ;;  %v2364_v58 = vsel %vm1199_vm14, %v6024_v54, %v3717_v25  ;;  %v2363_v31 = vsel %vm1199_vm14, %v6025_v7, %v3716_v43  ;;  %v3770_v24 = vpop.permute.xlu2 %3769  ;;  %v3757_v7 = vunpack.i.h.bf16 %v3755_v37 }
 0x1fa   : > { %v3722_v51 = vunpack.i.h.bf16 %v3720_v6  ;;  %v3721_v17 = vunpack.i.l.bf16 %v3720_v6 }
 0x1fc   : > { %v2379_v28 = vsel %vm1216_vm8, %v2363_v31, %v3721_v17  ;;  %v2380_v44 = vsel %vm1216_vm8, %v2364_v58, %v3722_v51  ;;  %v3756_v31 = vunpack.i.l.bf16 %v3755_v37  ;;  %v1776_v37 = vmul.f32 %v5343_v5, %v5978_v33 }
 0x1fd   : > { %v2395_v14 = vsel %vm1233_vm9, %v2379_v28, %v3726_v52  ;;  %v2396_v49 = vsel %vm1233_vm9, %v2380_v44, %v3727_v13  ;;  %v6028_v44 = vld [vmem:[#allocation26_spill] sm:$0xff] }
 0x1fe   : > { %v3730_v55 = vpop.permute.xlu0 %3729  ;;  %v2413_v57 = vpack.c.bf16 %v2396_v49, %v2395_v14 }
 0x1ff   : > { %v3732_v22 = vunpack.i.h.bf16 %v3730_v55  ;;  %v3731_v27 = vunpack.i.l.bf16 %v3730_v55 }
 0x200   : > { %2667 = vmatmul.bf16.gmra.mxu2 %v2413_v57 }
 0x201   : > { %v3735_v19 = vpop.permute.xlu1 %3734  ;;  %v2318_v16 = vsel %vm1199_vm14, %v1774_v11, %v3732_v22  ;;  %v2317_v34 = vsel %vm1199_vm14, %v1773_v50, %v3731_v27  ;;  %v3775_v52 = vpop.permute.xlu2 %3774 }
 0x202   : > { %v3737_v60 = vunpack.i.h.bf16 %v3735_v19  ;;  %v3736_v0 = vunpack.i.l.bf16 %v3735_v19 }
 0x204   : > { %v2333_v25 = vsel %vm1216_vm8, %v2317_v34, %v3736_v0  ;;  %v2334_v43 = vsel %vm1216_vm8, %v2318_v16, %v3737_v60 }
 0x205   : > { %v2349_v20 = vsel %vm1233_vm9, %v2333_v25, %v3741_v35  ;;  %v2350_v6 = vsel %vm1233_vm9, %v2334_v43, %v3742_v10  ;;  %v3772_v10 = vunpack.i.h.bf16 %v3770_v24  ;;  %v3771_v35 = vunpack.i.l.bf16 %v3770_v24 }
 0x206   : > { %v3745_v45 = vpop.permute.xlu0 %3744  ;;  %v2415_v51 = vpack.c.bf16 %v2350_v6, %v2349_v20 }
 0x207   : > { %v3747_v17 = vunpack.i.h.bf16 %v3745_v45  ;;  %v3746_v13 = vunpack.i.l.bf16 %v3745_v45  ;;  %v3350_v45 = vld [vmem:[%s5669_s21 + $0x8] sm:$0xff] }
 0x208   : > { %2623 = vmatmul.bf16.gmra.mxu3 %v2415_v51  ;;  %2906 = vmatpush.bf16.msrb.mxu1 %v3350_v45 }
 0x209   : > { %v3750_v54 = vpop.permute.xlu1 %3749  ;;  %v2366_v28 = vsel %vm1199_vm14, %v5209_v1, %v3747_v17  ;;  %v2365_v14 = vsel %vm1199_vm14, %v6028_v44, %v3746_v13  ;;  %v1775_v1 = vmul.f32 %v5303_v4, %v5976_v48  ;;  %v3800_v19 = vpop.permute.xlu2 %3799  ;;  %v3777_v13 = vunpack.i.h.bf16 %v3775_v52 }
 0x20a   : > { %v3752_v59 = vunpack.i.h.bf16 %v3750_v54  ;;  %v3751_v58 = vunpack.i.l.bf16 %v3750_v54  ;;  %v3776_v54 = vunpack.i.l.bf16 %v3775_v52 }
 0x20c   : > { %v2381_v49 = vsel %vm1216_vm8, %v2365_v14, %v3751_v58  ;;  %v2382_v55 = vsel %vm1216_vm8, %v2366_v28, %v3752_v59  ;;  %v6029_v58 = vld [vmem:[#allocation18_spill] sm:$0xff] }
 0x20d   : > { %v2397_v57 = vsel %vm1233_vm9, %v2381_v49, %v3756_v31  ;;  %v2398_v22 = vsel %vm1233_vm9, %v2382_v55, %v3757_v7 }
 0x20e   : > { %v3760_v27 = vpop.permute.xlu0 %3759  ;;  %v2416_v23 = vpack.c.bf16 %v2398_v22, %v2397_v57 }
 0x20f   : > { %v3762_v50 = vunpack.i.h.bf16 %v3760_v27  ;;  %v3761_v29 = vunpack.i.l.bf16 %v3760_v27  ;;  %v6030_v27 = vld [vmem:[#allocation10_spill] sm:$0xff] }
 0x210   : > { %2672 = vmatmul.bf16.gmra.mxu2 %v2416_v23  ;;  %v1778_v23 = vmul.f32 %v5400_v56, %v4755_v62 }
 0x211   : > { %v3765_v11 = vpop.permute.xlu1 %3764  ;;  %v2320_v16 = vsel %vm1199_vm14, %v1776_v37, %v3762_v50  ;;  %v2319_v34 = vsel %vm1199_vm14, %v1775_v1, %v3761_v29  ;;  %v3805_v31 = vpop.permute.xlu2 %3804  ;;  %v3802_v37 = vunpack.i.h.bf16 %v3800_v19 }
 0x212   : > { %v3767_v60 = vunpack.i.h.bf16 %v3765_v11  ;;  %v3766_v0 = vunpack.i.l.bf16 %v3765_v11  ;;  %v3801_v11 = vunpack.i.l.bf16 %v3800_v19 }
 0x214   : > { %v2335_v25 = vsel %vm1216_vm8, %v2319_v34, %v3766_v0  ;;  %v2336_v43 = vsel %vm1216_vm8, %v2320_v16, %v3767_v60 }
 0x215   : > { %v2351_v48 = vsel %vm1233_vm9, %v2335_v25, %v3771_v35  ;;  %v2352_v4 = vsel %vm1233_vm9, %v2336_v43, %v3772_v10 }
 0x216   : > { %v3780_v33 = vpop.permute.xlu0 %3779  ;;  %v2418_v5 = vpack.c.bf16 %v2352_v4, %v2351_v48 }
 0x217   : > { %v3782_v24 = vunpack.i.h.bf16 %v3780_v33  ;;  %v3781_v20 = vunpack.i.l.bf16 %v3780_v33  ;;  %v3807_v33 = vunpack.i.h.bf16 %v3805_v31 }
 0x218   : > { %2628 = vmatmul.bf16.gmra.mxu3 %v2418_v5  ;;  %v3806_v5 = vunpack.i.l.bf16 %v3805_v31 }
 0x219   : > { %v3790_v6 = vpop.permute.xlu1 %3789  ;;  %v2368_v59 = vsel %vm1199_vm14, %v5311_v32, %v3782_v24  ;;  %v2367_v7 = vsel %vm1199_vm14, %v6029_v58, %v3781_v20  ;;  %v1777_v32 = vmul.f32 %v5370_v8, %v6030_v27  ;;  %v3830_v34 = vpop.permute.xlu2 %3829 }
 0x21a   : > { %v3792_v51 = vunpack.i.h.bf16 %v3790_v6  ;;  %v3791_v17 = vunpack.i.l.bf16 %v3790_v6 }
 0x21c   : > { %v2383_v28 = vsel %vm1216_vm8, %v2367_v7, %v3791_v17  ;;  %v2384_v44 = vsel %vm1216_vm8, %v2368_v59, %v3792_v51 }
 0x21d   : > { %v2399_v14 = vsel %vm1233_vm9, %v2383_v28, %v3776_v54  ;;  %v2400_v49 = vsel %vm1233_vm9, %v2384_v44, %v3777_v13 }
 0x21e   : > { %v3785_v55 = vpop.permute.xlu0 %3784  ;;  %v2419_v57 = vpack.c.bf16 %v2400_v49, %v2399_v14  ;;  %v3832_v14 = vunpack.i.h.bf16 %v3830_v34  ;;  %v3831_v49 = vunpack.i.l.bf16 %v3830_v34 }
 0x21f   : > { %v3787_v22 = vunpack.i.h.bf16 %v3785_v55  ;;  %v3786_v52 = vunpack.i.l.bf16 %v3785_v55 }
 0x220   : > { %2677 = vmatmul.bf16.gmra.mxu2 %v2419_v57 }
 0x221   : > { %v3795_v50 = vpop.permute.xlu1 %3794  ;;  %v2322_v60 = vsel %vm1199_vm14, %v1778_v23, %v3787_v22  ;;  %v2321_v0 = vsel %vm1199_vm14, %v1777_v32, %v3786_v52  ;;  %v3835_v7 = vpop.permute.xlu2 %3834 }
 0x222   : > { %v3797_v29 = vunpack.i.h.bf16 %v3795_v50  ;;  %v3796_v1 = vunpack.i.l.bf16 %v3795_v50 }
 0x224   : > { %v2337_v10 = vsel %vm1216_vm8, %v2321_v0, %v3796_v1  ;;  %v2338_v35 = vsel %vm1216_vm8, %v2322_v60, %v3797_v29 }
 0x225   : > { %v2353_v16 = vsel %vm1233_vm9, %v2337_v10, %v3801_v11  ;;  %v2354_v8 = vsel %vm1233_vm9, %v2338_v35, %v3802_v37  ;;  %v3837_v37 = vunpack.i.h.bf16 %v3835_v7  ;;  %v3836_v11 = vunpack.i.l.bf16 %v3835_v7 }
 0x226   : > { %v3810_v25 = vpop.permute.xlu0 %3809  ;;  %v2421_v62 = vpack.c.bf16 %v2354_v8, %v2353_v16 }
 0x227   : > { %v3812_v56 = vunpack.i.h.bf16 %v3810_v25  ;;  %v3811_v43 = vunpack.i.l.bf16 %v3810_v25 }
 0x228   : > { %2633 = vmatmul.bf16.gmra.mxu3 %v2421_v62 }
 0x229   : > { %v3820_v48 = vpop.permute.xlu1 %3819  ;;  %v2370_v24 = vsel %vm1199_vm14, %v5376_v42, %v3812_v56  ;;  %v2369_v20 = vsel %vm1199_vm14, %v5354_v53, %v3811_v43  ;;  %v1779_v42 = vmul.f32 %v5421_v39, %v4818_v15  ;;  %v1780_v53 = vmul.f32 %v5452_v26, %v4821_v12  ;;  %v3870_v50 = vpop.permute.xlu2 %3869 }
 0x22a   : > { %v3822_v19 = vunpack.i.h.bf16 %v3820_v48  ;;  %v3821_v4 = vunpack.i.l.bf16 %v3820_v48  ;;  %v1781_v43 = vmul.f32 %v5478_v47, %v6011_v3 }
 0x22c   : > { %v2386_v6 = vsel %vm1216_vm8, %v2370_v24, %v3822_v19  ;;  %v2385_v45 = vsel %vm1216_vm8, %v2369_v20, %v3821_v4  ;;  %v3872_v4 = vunpack.i.h.bf16 %v3870_v50 }
 0x22d   : > { %v2401_v51 = vsel %vm1233_vm9, %v2385_v45, %v3806_v5  ;;  %v2402_v17 = vsel %vm1233_vm9, %v2386_v6, %v3807_v33  ;;  %v3871_v33 = vunpack.i.l.bf16 %v3870_v50 }
 0x22e   : > { %v3815_v13 = vpop.permute.xlu0 %3814  ;;  %v2422_v54 = vpack.c.bf16 %v2402_v17, %v2401_v51 }
 0x22f   : > { %v3817_v59 = vunpack.i.h.bf16 %v3815_v13  ;;  %v3816_v58 = vunpack.i.l.bf16 %v3815_v13  ;;  %v3349_v13 = vld [vmem:[%s5669_s21] sm:$0xff] }
 0x230   : > { %2682 = vmatmul.bf16.gmra.mxu2 %v2422_v54  ;;  %2907 = vmatpush.bf16.msrb.mxu1 %v3349_v13 }
 0x231   : > { %v3825_v31 = vpop.permute.xlu1 %3824  ;;  %v2324_v55 = vsel %vm1199_vm14, %v1780_v53, %v3817_v59  ;;  %v2323_v57 = vsel %vm1199_vm14, %v1779_v42, %v3816_v58  ;;  %v3875_v20 = vpop.permute.xlu2 %3874 }
 0x232   : > { %v3827_v28 = vunpack.i.h.bf16 %v3825_v31  ;;  %v3826_v44 = vunpack.i.l.bf16 %v3825_v31  ;;  %v3877_v7 = vunpack.i.h.bf16 %v3875_v20  ;;  %v3876_v42 = vunpack.i.l.bf16 %v3875_v20 }
 0x234   : > { %v2339_v22 = vsel %vm1216_vm8, %v2323_v57, %v3826_v44  ;;  %v2340_v52 = vsel %vm1216_vm8, %v2324_v55, %v3827_v28 }
 0x235   : > { %v2355_v27 = vsel %vm1233_vm9, %v2339_v22, %v3831_v49  ;;  %v2356_v15 = vsel %vm1233_vm9, %v2340_v52, %v3832_v14 }
 0x236   : > { %v3840_v39 = vpop.permute.xlu0 %3839  ;;  %v2424_v32 = vpack.c.bf16 %v2356_v15, %v2355_v27 }
 0x237   : > { %v3842_v12 = vunpack.i.h.bf16 %v3840_v39  ;;  %v3841_v26 = vunpack.i.l.bf16 %v3840_v39 }
 0x238   : > { %2638 = vmatmul.bf16.gmra.mxu3 %v2424_v32 }
 0x239   : > { %v3855_v23 = vpop.permute.xlu1 %3854  ;;  %v2372_v60 = vsel %vm1199_vm14, %v5429_v63, %v3842_v12  ;;  %v2371_v0 = vsel %vm1199_vm14, %v5412_v9, %v3841_v26  ;;  %v1782_v63 = vmul.f32 %v5503_v41, %v6013_v30  ;;  %v3890_v55 = vpop.permute.xlu2 %3889 }
 0x23a   : > { %v3857_v29 = vunpack.i.h.bf16 %v3855_v23  ;;  %v3856_v1 = vunpack.i.l.bf16 %v3855_v23  ;;  %v3892_v12 = vunpack.i.h.bf16 %v3890_v55  ;;  %v3891_v26 = vunpack.i.l.bf16 %v3890_v55 }
 0x23c   : > { %v2388_v10 = vsel %vm1216_vm8, %v2372_v60, %v3857_v29  ;;  %v2387_v35 = vsel %vm1216_vm8, %v2371_v0, %v3856_v1 }
 0x23d   : > { %v2403_v16 = vsel %vm1233_vm9, %v2387_v35, %v3836_v11  ;;  %v2404_v8 = vsel %vm1233_vm9, %v2388_v10, %v3837_v37 }
 0x23e   : > { %v3845_v34 = vpop.permute.xlu0 %3844  ;;  %v2425_v25 = vpack.c.bf16 %v2404_v8, %v2403_v16 }
 0x23f   : > { %v3847_v62 = vunpack.i.h.bf16 %v3845_v34  ;;  %v3846_v56 = vunpack.i.l.bf16 %v3845_v34 }
 0x240   : > { %2687 = vmatmul.bf16.gmra.mxu2 %v2425_v25 }
 0x241   : > { %v3860_v9 = vpop.permute.xlu1 %3859  ;;  %v2326_v5 = vsel %vm1199_vm14, %v1782_v63, %v3847_v62  ;;  %v2325_v24 = vsel %vm1199_vm14, %v1781_v43, %v3846_v56  ;;  %v3905_v0 = vpop.permute.xlu2 %3904 }
 0x242   : > { %v3862_v48 = vunpack.i.h.bf16 %v3860_v9  ;;  %v3861_v19 = vunpack.i.l.bf16 %v3860_v9  ;;  %v3907_v8 = vunpack.i.h.bf16 %v3905_v0  ;;  %v3906_v34 = vunpack.i.l.bf16 %v3905_v0 }
 0x244   : > { %v2341_v6 = vsel %vm1216_vm8, %v2325_v24, %v3861_v19  ;;  %v2342_v45 = vsel %vm1216_vm8, %v2326_v5, %v3862_v48 }
 0x245   : > { %v2357_v47 = vsel %vm1233_vm9, %v2341_v6, %v3871_v33  ;;  %v2358_v3 = vsel %vm1233_vm9, %v2342_v45, %v3872_v4 }
 0x246   : > { %v3850_v41 = vpop.permute.xlu0 %3849  ;;  %v2427_v30 = vpack.c.bf16 %v2358_v3, %v2357_v47 }
 0x247   : > { %v3852_v51 = vunpack.i.h.bf16 %v3850_v41  ;;  %v3851_v17 = vunpack.i.l.bf16 %v3850_v41 }
 0x248   : > { %2643 = vmatmul.bf16.gmra.mxu3 %v2427_v30 }
 0x249   : > { %v3865_v54 = vpop.permute.xlu1 %3864  ;;  %v2374_v53 = vsel %vm1199_vm14, %v5470_v18, %v3852_v51  ;;  %v2373_v31 = vsel %vm1199_vm14, %v5467_v46, %v3851_v17  ;;  %v1783_v18 = vmul.f32 %v5524_v36, %v4297_v2  ;;  %v1784_v46 = vmul.f32 %v5544_v21, %v6016_v40  ;;  %v2712_v36 = vpop.f32.mrf.mxu0 }
 0x24a   : > { %v3867_v59 = vunpack.i.h.bf16 %v3865_v54  ;;  %v3866_v58 = vunpack.i.l.bf16 %v3865_v54 }
 0x24c   : > { %v2390_v28 = vsel %vm1216_vm8, %v2374_v53, %v3867_v59  ;;  %v2389_v44 = vsel %vm1216_vm8, %v2373_v31, %v3866_v58 }
 0x24d   : > { %v2405_v14 = vsel %vm1233_vm9, %v2389_v44, %v3876_v42  ;;  %v2406_v49 = vsel %vm1233_vm9, %v2390_v28, %v3877_v7 }
 0x24e   : > { %v3880_v57 = vpop.permute.xlu0 %3879  ;;  %v2428_v22 = vpack.c.bf16 %v2406_v49, %v2405_v14 }
 0x24f   : > { %v3882_v52 = vunpack.i.h.bf16 %v3880_v57  ;;  %v3881_v27 = vunpack.i.l.bf16 %v3880_v57 }
 0x250   : > { %2692 = vmatmul.bf16.gmra.mxu2 %v2428_v22 }
 0x251   : > { %v3885_v15 = vpop.permute.xlu1 %3884  ;;  %v2328_v23 = vsel %vm1199_vm14, %v1784_v46, %v3882_v52  ;;  %v2327_v50 = vsel %vm1199_vm14, %v1783_v18, %v3881_v27  ;;  %v2714_v19 = vpop.f32.mrf.mxu0 }
 0x252   : > { %v3887_v39 = vunpack.i.h.bf16 %v3885_v15  ;;  %v3886_v32 = vunpack.i.l.bf16 %v3885_v15 }
 0x254   : > { %v2343_v29 = vsel %vm1216_vm8, %v2327_v50, %v3886_v32  ;;  %v2344_v1 = vsel %vm1216_vm8, %v2328_v23, %v3887_v39 }
 0x255   : > { %v2359_v37 = vsel %vm1233_vm9, %v2343_v29, %v3891_v26  ;;  %v2360_v2 = vsel %vm1233_vm9, %v2344_v1, %v3892_v12 }
 0x256   : > { %v3895_v11 = vpop.permute.xlu0 %3894  ;;  %v2430_v21 = vpack.c.bf16 %v2360_v2, %v2359_v37 }
 0x257   : > { %v3897_v40 = vunpack.i.h.bf16 %v3895_v11  ;;  %v3896_v60 = vunpack.i.l.bf16 %v3895_v11 }
 0x258   : > { %2648 = vmatmul.bf16.gmra.mxu3 %v2430_v21 }
 0x259   : > { %v3900_v10 = vpop.permute.xlu1 %3899  ;;  %v2376_v25 = vsel %vm1199_vm14, %v5106_v61, %v3897_v40  ;;  %v2375_v62 = vsel %vm1199_vm14, %v5173_v38, %v3896_v60  ;;  %v2717_v4 = vpop.f32.mrf.mxu0  ;;  %v5758_v61 = vld [vmem:[%s338_s19] ss:$0 sm:$0xff] }
 0x25a   : > { %v3902_v35 = vunpack.i.h.bf16 %v3900_v10  ;;  %v3901_v16 = vunpack.i.l.bf16 %v3900_v10 }
 0x25c   : > { %v2392_v56 = vsel %vm1216_vm8, %v2376_v25, %v3902_v35  ;;  %v2391_v43 = vsel %vm1216_vm8, %v2375_v62, %v3901_v16 }
 0x25d   : > { %v2407_v63 = vsel %vm1233_vm9, %v2391_v43, %v3906_v34  ;;  %v2408_v9 = vsel %vm1233_vm9, %v2392_v56, %v3907_v8 }
 0x25e   : > { %v2431_v48 = vpack.c.bf16 %v2408_v9, %v2407_v63 }
 0x260   : > { %2697 = vmatmul.bf16.gmra.mxu2 %v2431_v48 }
 0x261   : > { %v2719_v20 = vpop.f32.mrf.mxu0 }
 0x269   : > { %v2722_v13 = vpop.f32.mrf.mxu0 }
 0x26b   : > { %v2614_v33 = vpop.f32.mrf.mxu3 }
 0x26c   : > { %v2615_v38 = vadd.f32 %v5758_v61, %v2614_v33 }
 0x271   : > { %v2724_v49 = vpop.f32.mrf.mxu0 }
 0x273   : > { %v2616_v5 = vpop.f32.mrf.mxu3  ;;  %v2663_v24 = vpop.f32.mrf.mxu2 }
 0x274   : > { %v2664_v6 = vadd.f32 %v2663_v24, %v2615_v38  ;;  %v2617_v3 = vadd.f32 %v5758_v61, %v2616_v5 }
 0x276   : > { %v2713_v45 = vadd.f32 %v2712_v36, %v2664_v6 }
 0x278   : > { %v2752_v47 = vsub.f32 0.0, %v2713_v45 }
 0x279   : > { %v2727_v26 = vpop.f32.mrf.mxu0 }
 0x27a   : > { %v2768_v41 = vmul.f32 1.442695, %v2752_v47 }
 0x27b   : > { %v2619_v30 = vpop.f32.mrf.mxu3  ;;  %v2665_v51 = vpop.f32.mrf.mxu2 }
 0x27c   : > { %v2666_v17 = vadd.f32 %v2665_v51, %v2617_v3  ;;  %3975 = vpow2.f32 %v2768_v41  ;;  %v2620_v58 = vadd.f32 %v5758_v61, %v2619_v30 }
 0x27e   : > { %v2715_v54 = vadd.f32 %v2714_v19, %v2666_v17 }
 0x280   : > { %v2753_v59 = vsub.f32 0.0, %v2715_v54 }
 0x281   : > { %v2729_v56 = vpop.f32.mrf.mxu0 }
 0x282   : > { %v2770_v7 = vmul.f32 1.442695, %v2753_v59  ;;  %v3976_v31 = vpop.eup %3975 }
 0x283   : > { %v2621_v42 = vpop.f32.mrf.mxu3  ;;  %v2668_v53 = vpop.f32.mrf.mxu2  ;;  %v2800_v14 = vadd.f32 1.0, %v3976_v31 }
 0x284   : > { %3977 = vpow2.f32 %v2770_v7  ;;  %v2669_v28 = vadd.f32 %v2668_v53, %v2620_v58  ;;  %v2622_v22 = vadd.f32 %v5758_v61, %v2621_v42 }
 0x285   : > { %3979 = vrcp.f32 %v2800_v14 }
 0x286   : > { %v2718_v44 = vadd.f32 %v2717_v4, %v2669_v28 }
 0x288   : > { %v2754_v55 = vsub.f32 0.0, %v2718_v44 }
 0x289   : > { %v2732_v47 = vpop.f32.mrf.mxu0 }
 0x28a   : > { %v3978_v57 = vpop.eup %3977  ;;  %v2772_v52 = vmul.f32 1.442695, %v2754_v55 }
 0x28b   : > { %v2801_v27 = vadd.f32 1.0, %v3978_v57  ;;  %v2624_v18 = vpop.f32.mrf.mxu3  ;;  %v2670_v46 = vpop.f32.mrf.mxu2 }
 0x28c   : > { %v2671_v15 = vadd.f32 %v2670_v46, %v2622_v22  ;;  %v3980_v12 = vpop.eup %3979  ;;  %v2625_v23 = vadd.f32 %v5758_v61, %v2624_v18 }
 0x28d   : > { %3981 = vrcp.f32 %v2801_v27  ;;  %v2832_v36 = vmul.f32 %v3980_v12, %v2713_v45 }
 0x28e   : > { %3983 = vpow2.f32 %v2772_v52  ;;  %v2720_v39 = vadd.f32 %v2719_v20, %v2671_v15 }
 0x290   : > { %v2755_v32 = vsub.f32 0.0, %v2720_v39 }
 0x291   : > { %v2734_v31 = vpop.f32.mrf.mxu0 }
 0x292   : > { %v2774_v50 = vmul.f32 1.442695, %v2755_v32 }
 0x293   : > { %v3982_v29 = vpop.eup %3981  ;;  %v2626_v1 = vpop.f32.mrf.mxu3 }
 0x294   : > { %v2673_v37 = vpop.f32.mrf.mxu2  ;;  %v3984_v2 = vpop.eup %3983  ;;  %v2833_v11 = vmul.f32 %v3982_v29, %v2715_v54  ;;  %3985 = vpow2.f32 %v2774_v50  ;;  %v2627_v16 = vadd.f32 %v5758_v61, %v2626_v1 }
 0x295   : > { %v2674_v21 = vadd.f32 %v2673_v37, %v2625_v23  ;;  %v2802_v0 = vadd.f32 1.0, %v3984_v2 }
 0x296   : > { %v2848_v40 = vpack.c.bf16 %v2833_v11, %v2832_v36 }
 0x297   : > { %v2723_v60 = vadd.f32 %v2722_v13, %v2674_v21  ;;  %3987 = vrcp.f32 %v2802_v0 }
 0x298   : > { %3298 = vmatmul.msk.bf16.vlgmr.msrb.gmra.mxu1 %vm1199_vm14, %v2848_v40 }
 0x299   : > { %v2756_v10 = vsub.f32 0.0, %v2723_v60  ;;  %v2737_v23 = vpop.f32.mrf.mxu0 }
 0x29a   : > { %v3986_v35 = vpop.eup %3985 }
 0x29b   : > { %v2776_v8 = vmul.f32 1.442695, %v2756_v10  ;;  %v2803_v34 = vadd.f32 1.0, %v3986_v35  ;;  %v2629_v25 = vpop.f32.mrf.mxu3 }
 0x29c   : > { %v2675_v62 = vpop.f32.mrf.mxu2  ;;  %v2630_v19 = vadd.f32 %v5758_v61, %v2629_v25 }
 0x29d   : > { %v2676_v43 = vadd.f32 %v2675_v62, %v2627_v16  ;;  %3989 = vrcp.f32 %v2803_v34  ;;  %v3988_v48 = vpop.eup %3987 }
 0x29e   : > { %3991 = vpow2.f32 %v2776_v8  ;;  %v2834_v20 = vmul.f32 %v3988_v48, %v2718_v44 }
 0x29f   : > { %v2725_v63 = vadd.f32 %v2724_v49, %v2676_v43 }
 0x2a1   : > { %v2757_v9 = vsub.f32 0.0, %v2725_v63 }
 0x2a3   : > { %v2778_v4 = vmul.f32 1.442695, %v2757_v9  ;;  %v3990_v33 = vpop.eup %3989  ;;  %v2631_v38 = vpop.f32.mrf.mxu3 }
 0x2a4   : > { %v2678_v5 = vpop.f32.mrf.mxu2  ;;  %v3992_v24 = vpop.eup %3991  ;;  %v2835_v6 = vmul.f32 %v3990_v33, %v2720_v39  ;;  %v2632_v13 = vadd.f32 %v5758_v61, %v2631_v38 }
 0x2a5   : > { %3993 = vpow2.f32 %v2778_v4  ;;  %v2679_v45 = vadd.f32 %v2678_v5, %v2630_v19  ;;  %v2804_v30 = vadd.f32 1.0, %v3992_v24 }
 0x2a6   : > { %v2849_v41 = vpack.c.bf16 %v2835_v6, %v2834_v20 }
 0x2a7   : > { %v2728_v3 = vadd.f32 %v2727_v26, %v2679_v45  ;;  %3995 = vrcp.f32 %v2804_v30 }
 0x2a8   : > { %3299 = vmatmul.msk.bf16.gmra.mxu1 %vm1199_vm14, %v2849_v41 }
 0x2a9   : > { %v2758_v51 = vsub.f32 0.0, %v2728_v3 }
 0x2ab   : > { %v3994_v17 = vpop.eup %3993  ;;  %v2780_v54 = vmul.f32 1.442695, %v2758_v51  ;;  %v2634_v58 = vpop.f32.mrf.mxu3 }
 0x2ac   : > { %v2805_v59 = vadd.f32 1.0, %v3994_v17  ;;  %v2680_v7 = vpop.f32.mrf.mxu2  ;;  %v2635_v14 = vadd.f32 %v5758_v61, %v2634_v58 }
 0x2ad   : > { %v2681_v42 = vadd.f32 %v2680_v7, %v2632_v13  ;;  %v3996_v44 = vpop.eup %3995 }
 0x2ae   : > { %3997 = vrcp.f32 %v2805_v59  ;;  %v2836_v27 = vmul.f32 %v3996_v44, %v2723_v60 }
 0x2af   : > { %3999 = vpow2.f32 %v2780_v54  ;;  %v2730_v53 = vadd.f32 %v2729_v56, %v2681_v42  ;;  %v2739_v56 = vpop.f32.mrf.mxu0 }
 0x2b1   : > { %v2759_v28 = vsub.f32 0.0, %v2730_v53 }
 0x2b3   : > { %v2782_v49 = vmul.f32 1.442695, %v2759_v28  ;;  %v2636_v57 = vpop.f32.mrf.mxu3 }
 0x2b4   : > { %v3998_v55 = vpop.eup %3997  ;;  %v2683_v22 = vpop.f32.mrf.mxu2  ;;  %v2637_v50 = vadd.f32 %v5758_v61, %v2636_v57 }
 0x2b5   : > { %v4000_v52 = vpop.eup %3999  ;;  %v2837_v18 = vmul.f32 %v3998_v55, %v2725_v63  ;;  %4001 = vpow2.f32 %v2782_v49  ;;  %v2684_v46 = vadd.f32 %v2683_v22, %v2635_v14 }
 0x2b6   : > { %v2806_v32 = vadd.f32 1.0, %v4000_v52 }
 0x2b7   : > { %v2733_v15 = vadd.f32 %v2732_v47, %v2684_v46  ;;  %v2850_v39 = vpack.c.bf16 %v2837_v18, %v2836_v27  ;;  %v2742_v45 = vpop.f32.mrf.mxu0 }
 0x2b8   : > { %4003 = vrcp.f32 %v2806_v32 }
 0x2b9   : > { %v2760_v12 = vsub.f32 0.0, %v2733_v15  ;;  %3300 = vmatmul.msk.bf16.gmra.mxu1 %vm1199_vm14, %v2850_v39 }
 0x2bb   : > { %v4002_v26 = vpop.eup %4001  ;;  %v2784_v29 = vmul.f32 1.442695, %v2760_v12  ;;  %v2639_v37 = vpop.f32.mrf.mxu3 }
 0x2bc   : > { %v2807_v1 = vadd.f32 1.0, %v4002_v26  ;;  %v2685_v2 = vpop.f32.mrf.mxu2  ;;  %v2640_v60 = vadd.f32 %v5758_v61, %v2639_v37 }
 0x2bd   : > { %v2686_v36 = vadd.f32 %v2685_v2, %v2637_v50 }
 0x2be   : > { %4005 = vrcp.f32 %v2807_v1  ;;  %v4004_v40 = vpop.eup %4003 }
 0x2bf   : > { %4007 = vpow2.f32 %v2784_v29  ;;  %v2735_v11 = vadd.f32 %v2734_v31, %v2686_v36  ;;  %v2838_v34 = vmul.f32 %v4004_v40, %v2728_v3  ;;  %v2744_v44 = vpop.f32.mrf.mxu0 }
 0x2c1   : > { %v2761_v21 = vsub.f32 0.0, %v2735_v11 }
 0x2c3   : > { %v2786_v0 = vmul.f32 1.442695, %v2761_v21  ;;  %v2641_v35 = vpop.f32.mrf.mxu3 }
 0x2c4   : > { %v4006_v10 = vpop.eup %4005  ;;  %v2688_v16 = vpop.f32.mrf.mxu2  ;;  %v2642_v4 = vadd.f32 %v5758_v61, %v2641_v35 }
 0x2c5   : > { %v4008_v8 = vpop.eup %4007  ;;  %v2839_v25 = vmul.f32 %v4006_v10, %v2730_v53  ;;  %4009 = vpow2.f32 %v2786_v0  ;;  %v2689_v62 = vadd.f32 %v2688_v16, %v2640_v60 }
 0x2c6   : > { %v2808_v9 = vadd.f32 1.0, %v4008_v8 }
 0x2c7   : > { %v2738_v43 = vadd.f32 %v2737_v23, %v2689_v62  ;;  %v2851_v63 = vpack.c.bf16 %v2839_v25, %v2838_v34  ;;  %v2747_v26 = vpop.f32.mrf.mxu0 }
 0x2c8   : > { %4011 = vrcp.f32 %v2808_v9 }
 0x2c9   : > { %v2762_v48 = vsub.f32 0.0, %v2738_v43  ;;  %3301 = vmatmul.msk.bf16.gmra.mxu1 %vm1199_vm14, %v2851_v63 }
 0x2cb   : > { %v4010_v19 = vpop.eup %4009  ;;  %v2788_v33 = vmul.f32 1.442695, %v2762_v48  ;;  %v2644_v5 = vpop.f32.mrf.mxu3 }
 0x2cc   : > { %v2809_v38 = vadd.f32 1.0, %v4010_v19  ;;  %v2690_v24 = vpop.f32.mrf.mxu2  ;;  %v2645_v41 = vadd.f32 %v5758_v61, %v2644_v5 }
 0x2cd   : > { %v2691_v20 = vadd.f32 %v2690_v24, %v2642_v4 }
 0x2ce   : > { %4013 = vrcp.f32 %v2809_v38  ;;  %v4012_v3 = vpop.eup %4011 }
 0x2cf   : > { %4015 = vpow2.f32 %v2788_v33  ;;  %v2740_v6 = vadd.f32 %v2739_v56, %v2691_v20  ;;  %v2840_v59 = vmul.f32 %v4012_v3, %v2733_v15  ;;  %v2749_v34 = vpop.f32.mrf.mxu0 }
 0x2d1   : > { %v2763_v47 = vsub.f32 0.0, %v2740_v6 }
 0x2d3   : > { %v2790_v30 = vmul.f32 1.442695, %v2763_v47  ;;  %v2646_v17 = vpop.f32.mrf.mxu3  ;;  %v3910_v47 = vld [vmem:[%s346_s28] ss:$0 sm:$0xff] }
 0x2d4   : > { %v4014_v51 = vpop.eup %4013  ;;  %v2693_v13 = vpop.f32.mrf.mxu2  ;;  %v2647_v49 = vadd.f32 %v5758_v61, %v2646_v17 }
 0x2d5   : > { %v4016_v54 = vpop.eup %4015  ;;  %v2841_v58 = vmul.f32 %v4014_v51, %v2735_v11  ;;  %4017 = vpow2.f32 %v2790_v30  ;;  %v2694_v7 = vadd.f32 %v2693_v13, %v2645_v41 }
 0x2d6   : > { %v2810_v31 = vadd.f32 1.0, %v4016_v54 }
 0x2d7   : > { %v2743_v42 = vadd.f32 %v2742_v45, %v2694_v7  ;;  %v2852_v53 = vpack.c.bf16 %v2841_v58, %v2840_v59 }
 0x2d8   : > { %4019 = vrcp.f32 %v2810_v31 }
 0x2d9   : > { %v2764_v28 = vsub.f32 0.0, %v2743_v42  ;;  %3302 = vmatmul.msk.bf16.gmra.mxu1 %vm1199_vm14, %v2852_v53 }
 0x2db   : > { %v4018_v14 = vpop.eup %4017  ;;  %v2792_v55 = vmul.f32 1.442695, %v2764_v28  ;;  %v2649_v27 = vpop.f32.mrf.mxu3 }
 0x2dc   : > { %v2811_v57 = vadd.f32 1.0, %v4018_v14  ;;  %v2695_v22 = vpop.f32.mrf.mxu2  ;;  %v2650_v39 = vadd.f32 %v5758_v61, %v2649_v27 }
 0x2dd   : > { %v2696_v52 = vadd.f32 %v2695_v22, %v2647_v49 }
 0x2de   : > { %4021 = vrcp.f32 %v2811_v57  ;;  %v4020_v15 = vpop.eup %4019 }
 0x2df   : > { %4023 = vpow2.f32 %v2792_v55  ;;  %v2745_v18 = vadd.f32 %v2744_v44, %v2696_v52  ;;  %v2842_v29 = vmul.f32 %v4020_v15, %v2738_v43 }
 0x2e1   : > { %v2765_v46 = vsub.f32 0.0, %v2745_v18 }
 0x2e3   : > { %v2794_v32 = vmul.f32 1.442695, %v2765_v46  ;;  %v2651_v21 = vpop.f32.mrf.mxu3 }
 0x2e4   : > { %v4022_v12 = vpop.eup %4021  ;;  %v2698_v23 = vpop.f32.mrf.mxu2  ;;  %v2652_v0 = vadd.f32 %v5758_v61, %v2651_v21 }
 0x2e5   : > { %v4024_v50 = vpop.eup %4023  ;;  %v2843_v1 = vmul.f32 %v4022_v12, %v2740_v6  ;;  %4025 = vpow2.f32 %v2794_v32  ;;  %v2699_v37 = vadd.f32 %v2698_v23, %v2650_v39 }
 0x2e6   : > { %v2812_v11 = vadd.f32 1.0, %v4024_v50 }
 0x2e7   : > { %v2748_v2 = vadd.f32 %v2747_v26, %v2699_v37  ;;  %v2853_v36 = vpack.c.bf16 %v2843_v1, %v2842_v29 }
 0x2e8   : > { %4027 = vrcp.f32 %v2812_v11 }
 0x2e9   : > { %v2766_v40 = vsub.f32 0.0, %v2748_v2  ;;  %3303 = vmatmul.msk.bf16.gmra.mxu1 %vm1199_vm14, %v2853_v36 }
 0x2eb   : > { %v4026_v60 = vpop.eup %4025  ;;  %v2796_v10 = vmul.f32 1.442695, %v2766_v40 }
 0x2ec   : > { %v2813_v35 = vadd.f32 1.0, %v4026_v60  ;;  %v2700_v16 = vpop.f32.mrf.mxu2 }
 0x2ed   : > { %v2701_v8 = vadd.f32 %v2700_v16, %v2652_v0 }
 0x2ee   : > { %4029 = vrcp.f32 %v2813_v35  ;;  %v4028_v56 = vpop.eup %4027 }
 0x2ef   : > { %4031 = vpow2.f32 %v2796_v10  ;;  %v2750_v25 = vadd.f32 %v2749_v34, %v2701_v8  ;;  %v2844_v48 = vmul.f32 %v4028_v56, %v2743_v42 }
 0x2f1   : > { %v2767_v62 = vsub.f32 0.0, %v2750_v25 }
 0x2f3   : > { %v2798_v43 = vmul.f32 1.442695, %v2767_v62 }
 0x2f4   : > { %v4030_v63 = vpop.eup %4029 }
 0x2f5   : > { %v4032_v9 = vpop.eup %4031  ;;  %v2845_v19 = vmul.f32 %v4030_v63, %v2745_v18  ;;  %4033 = vpow2.f32 %v2798_v43 }
 0x2f6   : > { %v2814_v61 = vadd.f32 1.0, %v4032_v9 }
 0x2f7   : > { %v2854_v4 = vpack.c.bf16 %v2845_v19, %v2844_v48 }
 0x2f8   : > { %4035 = vrcp.f32 %v2814_v61 }
 0x2f9   : > { %3304 = vmatmul.msk.bf16.gmra.mxu1 %vm1199_vm14, %v2854_v4 }
 0x2fb   : > { %v4034_v33 = vpop.eup %4033 }
 0x2fc   : > { %v2815_v38 = vadd.f32 1.0, %v4034_v33 }
 0x2fe   : > { %4037 = vrcp.f32 %v2815_v38  ;;  %v4036_v5 = vpop.eup %4035 }
 0x2ff   : > { %v2846_v20 = vmul.f32 %v4036_v5, %v2748_v2 }
 0x304   : > { %v4038_v24 = vpop.eup %4037 }
 0x305   : > { %v2847_v6 = vmul.f32 %v4038_v24, %v2750_v25 }
 0x307   : > { %v2855_v45 = vpack.c.bf16 %v2847_v6, %v2846_v20 }
 0x309   : > { %3305 = vmatmul.msk.bf16.gmra.mxu1 %vm1199_vm14, %v2855_v45 }
 0x315   : > { %v2909_v3 = vpop.f32.mrf.mxu1 }
 0x316   : > { %v2910_v41 = vadd.f32 %v3910_v47, %v2909_v3 }
 0x31d   : > { %v2911_v30 = vpop.f32.mrf.mxu1 }
 0x31e   : > { %v2912_v51 = vadd.f32 %v3910_v47, %v2911_v30 }
 0x325   : > { %v2914_v17 = vpop.f32.mrf.mxu1 }
 0x326   : > { %v2915_v13 = vadd.f32 %v3910_v47, %v2914_v17 }
 0x32d   : > { %v2916_v54 = vpop.f32.mrf.mxu1 }
 0x32e   : > { %v2917_v59 = vadd.f32 %v3910_v47, %v2916_v54 }
 0x336   : > { %v2919_v58 = vpop.f32.mrf.mxu1 }
 0x337   : > { %v2920_v7 = vadd.f32 %v3910_v47, %v2919_v58 }
 0x33e   : > { %v2921_v42 = vpop.f32.mrf.mxu1 }
 0x33f   : > { %v2922_v53 = vadd.f32 %v3910_v47, %v2921_v42 }
 0x346   : > { %v2924_v31 = vpop.f32.mrf.mxu1 }
 0x347   : > { %v2925_v28 = vadd.f32 %v3910_v47, %v2924_v31 }
 0x34e   : > { %v2926_v44 = vpop.f32.mrf.mxu1 }
 0x34f   : > { %v2927_v14 = vadd.f32 %v3910_v47, %v2926_v44 }
 0x356   : > { %v2929_v49 = vpop.f32.mrf.mxu1 }
 0x357   : > { %v2930_v55 = vadd.f32 %v3910_v47, %v2929_v49 }
 0x35e   : > { %v2931_v57 = vpop.f32.mrf.mxu1 }
 0x35f   : > { %v2932_v22 = vadd.f32 %v3910_v47, %v2931_v57 }
 0x366   : > { %v2934_v52 = vpop.f32.mrf.mxu1 }
 0x367   : > { %v2935_v27 = vadd.f32 %v3910_v47, %v2934_v52 }
 0x36e   : > { %v2936_v18 = vpop.f32.mrf.mxu1 }
 0x36f   : > { %v5793_v46 = vadd.f32 %v3910_v47, %v2936_v18 }
 0x376   : > { %v2939_v15 = vpop.f32.mrf.mxu1 }
 0x377   : > { %v5795_v39 = vadd.f32 %v3910_v47, %v2939_v15 }
 0x37e   : > { %v2941_v32 = vpop.f32.mrf.mxu1 }
 0x37f   : > { %v5797_v12 = vadd.f32 %v3910_v47, %v2941_v32 }
 0x386   : > { %v2944_v26 = vpop.f32.mrf.mxu1 }
 0x387   : > { %v5799_v23 = vadd.f32 %v3910_v47, %v2944_v26 }
 0x38b   : > { %2952 = sbr.rel (%p3306_p4) target bundleno = 928 (0x3a0), region = 52 }
 0x38e   : > { %v2946_v50 = vpop.f32.mrf.mxu1 }
 0x38f   : > { %v5801_v29 = vadd.f32 %v3910_v47, %v2946_v50 }
 0x390   : > { %2953 = vst [vmem:[#allocation2] sm:$0xff] %v2910_v41 }
 0x391   : > { %2954 = vst [vmem:[#allocation2 + $0x8] sm:$0xff] %v2912_v51 }
 0x392   : > { %2955 = vst [vmem:[#allocation2 + $0x10] sm:$0xff] %v2915_v13 }
 0x393   : > { %2956 = vst [vmem:[#allocation2 + $0x18] sm:$0xff] %v2917_v59 }
 0x394   : > { %2957 = vst [vmem:[#allocation2 + $0x20] sm:$0xff] %v2920_v7 }
 0x395   : > { %2958 = vst [vmem:[#allocation2 + $0x28] sm:$0xff] %v2922_v53 }
 0x396   : > { %2959 = vst [vmem:[#allocation2 + $0x30] sm:$0xff] %v2925_v28 }
 0x397   : > { %2960 = vst [vmem:[#allocation2 + $0x38] sm:$0xff] %v2927_v14 }
 0x398   : > { %2961 = vst [vmem:[#allocation2 + $0x40] sm:$0xff] %v2930_v55 }
 0x399   : > { %2962 = vst [vmem:[#allocation2 + $0x48] sm:$0xff] %v2932_v22 }
 0x39a   : > { %2963 = vst [vmem:[#allocation2 + $0x50] sm:$0xff] %v2935_v27 }
 0x39b   : > { %2964 = vst [vmem:[#allocation2 + $0x58] sm:$0xff] %v5793_v46 }
 0x39c   : > { %2965 = vst [vmem:[#allocation2 + $0x60] sm:$0xff] %v5795_v39 }
 0x39d   : > { %2966 = vst [vmem:[#allocation2 + $0x68] sm:$0xff] %v5797_v12 }
 0x39e   : > { %2967 = vst [vmem:[#allocation2 + $0x70] sm:$0xff] %v5799_v23 }
 0x39f   : > { %2968 = vst [vmem:[#allocation2 + $0x78] sm:$0xff] %v5801_v29 }
 0x3a0 PF: > { %p3307_p5 = scmp.eq.s32.totalorder %s4132_s25, 0 }
 0x3a2   : > { %2972 = sbr.rel (%p3307_p5) target bundleno = 954 (0x3ba), region = 56 }
 0x3a7   : > { %v2973_v1 = vld [vmem:[#allocation2] sm:$0xff]  ;;  %v2974_v37 = vld [vmem:[#allocation2 + $0x8] sm:$0xff]  ;;  %v2975_v2 = vld [vmem:[#allocation2 + $0x10] sm:$0xff] }
 0x3a8   : > { %v2989_v36 = vadd.f32 %v2973_v1, %v2910_v41  ;;  %v2990_v11 = vadd.f32 %v2974_v37, %v2912_v51  ;;  %v2991_v21 = vadd.f32 %v2975_v2, %v2915_v13  ;;  %v2976_v40 = vld [vmem:[#allocation2 + $0x18] sm:$0xff]  ;;  %v2977_v60 = vld [vmem:[#allocation2 + $0x20] sm:$0xff]  ;;  %v2978_v0 = vld [vmem:[#allocation2 + $0x28] sm:$0xff] }
 0x3a9   : > { %v2992_v10 = vadd.f32 %v2976_v40, %v2917_v59  ;;  %v2979_v35 = vld [vmem:[#allocation2 + $0x30] sm:$0xff]  ;;  %v2993_v16 = vadd.f32 %v2977_v60, %v2920_v7  ;;  %v2980_v8 = vld [vmem:[#allocation2 + $0x38] sm:$0xff]  ;;  %v2994_v34 = vadd.f32 %v2978_v0, %v2922_v53  ;;  %v2981_v25 = vld [vmem:[#allocation2 + $0x40] sm:$0xff] }
 0x3aa   : > { %3005 = vst [vmem:[#allocation2] sm:$0xff] %v2989_v36  ;;  %v2995_v62 = vadd.f32 %v2979_v35, %v2925_v28  ;;  %v2982_v56 = vld [vmem:[#allocation2 + $0x48] sm:$0xff]  ;;  %v2996_v43 = vadd.f32 %v2980_v8, %v2927_v14  ;;  %v2983_v63 = vld [vmem:[#allocation2 + $0x50] sm:$0xff]  ;;  %v2997_v9 = vadd.f32 %v2981_v25, %v2930_v55  ;;  %v2984_v48 = vld [vmem:[#allocation2 + $0x58] sm:$0xff] }
 0x3ab   : > { %3006 = vst [vmem:[#allocation2 + $0x8] sm:$0xff] %v2990_v11  ;;  %v2998_v19 = vadd.f32 %v2982_v56, %v2932_v22  ;;  %v2985_v4 = vld [vmem:[#allocation2 + $0x60] sm:$0xff]  ;;  %v2999_v61 = vadd.f32 %v2983_v63, %v2935_v27  ;;  %v2986_v33 = vld [vmem:[#allocation2 + $0x68] sm:$0xff]  ;;  %v3000_v38 = vadd.f32 %v2984_v48, %v5793_v46  ;;  %v2987_v5 = vld [vmem:[#allocation2 + $0x70] sm:$0xff] }
 0x3ac   : > { %3007 = vst [vmem:[#allocation2 + $0x10] sm:$0xff] %v2991_v21  ;;  %v3001_v24 = vadd.f32 %v2985_v4, %v5795_v39  ;;  %v2988_v20 = vld [vmem:[#allocation2 + $0x78] sm:$0xff]  ;;  %v3002_v6 = vadd.f32 %v2986_v33, %v5797_v12  ;;  %v3003_v45 = vadd.f32 %v2987_v5, %v5799_v23 }
 0x3ad   : > { %3008 = vst [vmem:[#allocation2 + $0x18] sm:$0xff] %v2992_v10  ;;  %v3004_v47 = vadd.f32 %v2988_v20, %v5801_v29 }
 0x3ae   : > { %3009 = vst [vmem:[#allocation2 + $0x20] sm:$0xff] %v2993_v16 }
 0x3af   : > { %3010 = vst [vmem:[#allocation2 + $0x28] sm:$0xff] %v2994_v34 }
 0x3b0   : > { %3011 = vst [vmem:[#allocation2 + $0x30] sm:$0xff] %v2995_v62 }
 0x3b1   : > { %3012 = vst [vmem:[#allocation2 + $0x38] sm:$0xff] %v2996_v43 }
 0x3b2   : > { %3013 = vst [vmem:[#allocation2 + $0x40] sm:$0xff] %v2997_v9 }
 0x3b3   : > { %3014 = vst [vmem:[#allocation2 + $0x48] sm:$0xff] %v2998_v19 }
 0x3b4   : > { %3015 = vst [vmem:[#allocation2 + $0x50] sm:$0xff] %v2999_v61 }
 0x3b5   : > { %3016 = vst [vmem:[#allocation2 + $0x58] sm:$0xff] %v3000_v38 }
 0x3b6   : > { %3017 = vst [vmem:[#allocation2 + $0x60] sm:$0xff] %v3001_v24 }
 0x3b7   : > { %3018 = vst [vmem:[#allocation2 + $0x68] sm:$0xff] %v3002_v6 }
 0x3b8   : > { %3019 = vst [vmem:[#allocation2 + $0x70] sm:$0xff] %v3003_v45 }
 0x3b9   : > { %3020 = vst [vmem:[#allocation2 + $0x78] sm:$0xff] %v3004_v47 }
 0x3ba PF: > { %p3411_p6 = scmp.eq.s32.totalorder %s4132_s25, 1  ;;  %s3028_s12 = sshll.u32 %s5829_s7, 4  ;;  %s3029_s12 = int_to_ptr.hbm [resolvable:$true] %s3028_s12 }
 0x3bb   : > { %s4083_s13 = smov [#allocation2]   ;;  %s4084_s16 = smov 128  }
 0x3bc   : > { %s3026_s15 = sshll.u32 %s4083_s13, 4  ;;  %s4085_s18 = smov 8   ;;  %s3027_s15 = int_to_ptr.vmem [resolvable:$true] %s3026_s15 }
 0x3bd   : > { %3408 = dma.vmem_to_hbm [thread:$0]  (%p3411_p6), %s3027_s15, 2048, %s3029_s12, [#allocation3], %s4084_s16, %s4084_s16, %s4085_s18  }
 0x3be   : > { %4072 = dma.done.wait (%p3411_p6), [#allocation3], 2048  }
 0x3bf   : > { %4074 = vsyncadd (%p3411_p6), [#allocation3], 4294965248 }
 0x3c0 PF: > { %s18_s24 = sadd.s32 1, %s4077_s24  }
 0x3c1   : > { %p15_p7 = scmp.ge.s32.totalorder %s18_s24, 4  }
 0x3c3   :  { %17 = sbr.rel (!%p15_p7) target bundleno = 1 (0x1), region = 98 }
 0x3c8   :  { %3045 = vsyncpa [#allocation3], 1 }
 0x3c9   :  { %3047 = vsyncpa [#allocation3 + $0x1], 1 }

</bundles_post_ra>
